<compile_context>
chip_gen: v7x
topology: tpu7x:2x2x1
jax: 0.10.0
libtpu: 0.0.40
codegen_flags: <defaults>
</compile_context>

<pallas_src>
import jax
import jax.numpy as jnp
from jax.experimental import pallas as pl
from jax.experimental.pallas import tpu as pltpu

EPS = 1e-5


def _make_kernel(p_true):
    inv_p = 1.0 / float(p_true)

    def kernel(x1_ref, x2_ref, w_ref, gamma_ref, beta_ref, o_ref):
        # x1_ref, x2_ref:     (Cin, P)
        # w_ref:              (Cblk, Cin)
        # gamma_ref/beta_ref: (Cblk, 1)
        # o_ref:              (Cblk, P)
        m = x1_ref[...] + x2_ref[...]                                # VPU add
        y = jnp.dot(w_ref[...], m,
                    preferred_element_type=jnp.float32)              # MXU, (Cblk, P)

        # BatchNorm (training-mode batch statistics), single pass over the lane axis.
        s1 = jnp.sum(y, axis=1, keepdims=True)                       # (Cblk, 1)  XLU
        s2 = jnp.sum(y * y, axis=1, keepdims=True)                   # (Cblk, 1)  XLU
        mean = s1 * inv_p
        var = jnp.maximum(s2 * inv_p - mean * mean, 0.0)             # biased variance
        inv_std = jax.lax.rsqrt(var + EPS)                           # EUP
        scale = gamma_ref[...] * inv_std                             # (Cblk, 1)
        shift = beta_ref[...] - mean * scale                         # (Cblk, 1)
        o_ref[...] = (y * scale + shift).astype(o_ref.dtype)         # folded affine

    return kernel


def _num_cout_blocks(cout):
    """Split Cout across TensorCores only on multi-core (v7x-class) chips."""
    try:
        kind = jax.devices()[0].device_kind.lower()
    except Exception:  # pragma: no cover - defensive: never fail the wrapper
        return 1
    two_core = ("v7" in kind) or ("7x" in kind)
    if two_core and cout % 16 == 0:
        return 2
    return 1


def fused_add_conv1x1_bn(x204, x190, w, gamma, beta):
    """x204, x190: (1, Cin, H, W) f32; w: (Cout, Cin, 1, 1); gamma/beta: (Cout,)."""
    N, Cin, H, W_sp = x204.shape
    Cout = w.shape[0]
    assert N == 1, "layout relies on the free NCHW <-> (Cin, P) reshape for N == 1"
    P = H * W_sp

    # Free reshapes only — no data-moving transposes anywhere in the wrapper.
    x1 = x204.reshape(Cin, P)
    x2 = x190.reshape(Cin, P)
    w_mat = w[:, :, 0, 0]                  # (Cout, Cin) — already the orientation we need
    gamma2 = gamma.reshape(Cout, 1)
    beta2 = beta.reshape(Cout, 1)

    nblk = _num_cout_blocks(Cout)
    cblk = Cout // nblk

    cost = pl.CostEstimate(
        flops=2 * P * Cin * Cout,
        transcendentals=Cout,  # one rsqrt per output channel
        bytes_accessed=(2 * Cin * P + Cout * Cin + 2 * Cout + Cout * P) * 4,
    )

    out_flat = pl.pallas_call(
        _make_kernel(P),
        out_shape=jax.ShapeDtypeStruct((Cout, P), jnp.float32),
        grid=(nblk,),
        in_specs=[
            pl.BlockSpec((Cin, P), lambda j: (0, 0)),    # resident across grid steps
            pl.BlockSpec((Cin, P), lambda j: (0, 0)),    # resident across grid steps
            pl.BlockSpec((cblk, Cin), lambda j: (j, 0)),
            pl.BlockSpec((cblk, 1), lambda j: (j, 0)),
            pl.BlockSpec((cblk, 1), lambda j: (j, 0)),
        ],
        out_specs=pl.BlockSpec((cblk, P), lambda j: (j, 0)),
        compiler_params=pltpu.CompilerParams(
            dimension_semantics=("parallel",),
        ),
        cost_estimate=cost,
    )(x1, x2, w_mat, gamma2, beta2)

    # (Cout, P) -> NCHW, free reshape.
    return out_flat.reshape(N, Cout, H, W_sp)


def reference(x204, x190, w, gamma, beta):
    m = x204 + x190
    y = jax.lax.conv_general_dilated(m, w, (1, 1), "VALID",
                                     dimension_numbers=("NCHW", "OIHW", "NCHW"))
    mean = jnp.mean(y, axis=(0, 2, 3), keepdims=True)
    var = jnp.var(y, axis=(0, 2, 3), keepdims=True)
    g = gamma.reshape(1, -1, 1, 1)
    b = beta.reshape(1, -1, 1, 1)
    return (y - mean) * jax.lax.rsqrt(var + EPS) * g + b


if __name__ == "__main__":
    key = jax.random.PRNGKey(0)
    k1, k2, k3 = jax.random.split(key, 3)

    N, Cin, H, W, Cout = 1, 112, 14, 14, 672

    x204 = jax.random.normal(k1, (N, Cin, H, W), dtype=jnp.float32)
    x190 = jax.random.normal(k2, (N, Cin, H, W), dtype=jnp.float32)

    # Conv2d(112, 672, 1x1, bias=False) weight: deterministic init (kaiming-like scale).
    fan_in = Cin
    w = jax.random.normal(k3, (Cout, Cin, 1, 1), dtype=jnp.float32) / jnp.sqrt(fan_in)

    # BatchNorm2d affine params: PyTorch default init -> weight=1, bias=0.
    gamma = jnp.ones((Cout,), dtype=jnp.float32)
    beta = jnp.zeros((Cout,), dtype=jnp.float32)

    out = fused_add_conv1x1_bn(x204, x190, w, gamma, beta)
    jax.block_until_ready(out)

    ref = reference(x204, x190, w, gamma, beta)
    assert out.shape == (N, Cout, H, W)
    assert jnp.allclose(out, ref, atol=1e-3, rtol=1e-3)

    print("KERNEL_OK")
</pallas_src>

<mosaic_0001>
module attributes {stable_mosaic.version = 11 : i64} {
  func.func @kernel(%arg0: i32, %arg1: memref<112x196xf32, #tpu.memory_space<vmem>>, %arg2: memref<112x196xf32, #tpu.memory_space<vmem>>, %arg3: memref<672x112xf32, #tpu.memory_space<vmem>>, %arg4: memref<672x1xf32, #tpu.memory_space<vmem>>, %arg5: memref<672x1xf32, #tpu.memory_space<vmem>>, %arg6: memref<672x196xf32, #tpu.memory_space<vmem>>) attributes {dimension_semantics = [#tpu.dimension_semantics<parallel>], iteration_bounds = array<i64: 1>, scalar_prefetch = 0 : i64, scratch_operands = 0 : i64, tpu.core_type = #tpu.core_type<tc>, window_params = [{pipeline_mode = #tpu.pipeline_mode<synchronous>, transform_indices = @transform_0, window_bounds = array<i64: 112, 196>}, {pipeline_mode = #tpu.pipeline_mode<synchronous>, transform_indices = @transform_1, window_bounds = array<i64: 112, 196>}, {transform_indices = @transform_2, window_bounds = array<i64: 672, 112>}, {transform_indices = @transform_3, window_bounds = array<i64: 672, 1>}, {transform_indices = @transform_4, window_bounds = array<i64: 672, 1>}, {transform_indices = @transform_5, window_bounds = array<i64: 672, 196>}]} {
    %c0 = arith.constant 0 : index
    %c0_0 = arith.constant 0 : index
    %0 = vector.load %arg1[%c0, %c0_0] : memref<112x196xf32, #tpu.memory_space<vmem>>, vector<112x196xf32>
    %c0_1 = arith.constant 0 : index
    %c0_2 = arith.constant 0 : index
    %1 = vector.load %arg2[%c0_1, %c0_2] : memref<112x196xf32, #tpu.memory_space<vmem>>, vector<112x196xf32>
    %2 = arith.addf %0, %1 : vector<112x196xf32>
    %c0_3 = arith.constant 0 : index
    %c0_4 = arith.constant 0 : index
    %3 = vector.load %arg3[%c0_3, %c0_4] : memref<672x112xf32, #tpu.memory_space<vmem>>, vector<672x112xf32>
    %cst = arith.constant dense<0.000000e+00> : vector<672x196xf32>
    %4 = tpu.matmul %3, %2, %cst {dimension_numbers = #tpu.dot_dimension_numbers<[1], [0], [0], [1], [0, 0, 1, 1], [], []>} : vector<672x112xf32>, vector<112x196xf32>, vector<672x196xf32> -> vector<672x196xf32>
    %cst_5 = arith.constant dense<0.000000e+00> : vector<672xf32>
    %5 = vector.multi_reduction <add>, %4, %cst_5 [1] : vector<672x196xf32> to vector<672xf32>
    %6 = vector.shape_cast %5 : vector<672xf32> to vector<672x1xf32>
    %7 = arith.mulf %4, %4 : vector<672x196xf32>
    %cst_6 = arith.constant dense<0.000000e+00> : vector<672xf32>
    %8 = vector.multi_reduction <add>, %7, %cst_6 [1] : vector<672x196xf32> to vector<672xf32>
    %9 = vector.shape_cast %8 : vector<672xf32> to vector<672x1xf32>
    %cst_7 = arith.constant 0.00510204071 : f32
    %10 = vector.broadcast %cst_7 : f32 to vector<672x1xf32>
    %11 = arith.mulf %6, %10 : vector<672x1xf32>
    %cst_8 = arith.constant 0.00510204071 : f32
    %12 = vector.broadcast %cst_8 : f32 to vector<672x1xf32>
    %13 = arith.mulf %9, %12 : vector<672x1xf32>
    %14 = arith.mulf %11, %11 : vector<672x1xf32>
    %15 = arith.subf %13, %14 : vector<672x1xf32>
    %cst_9 = arith.constant 0.000000e+00 : f32
    %16 = vector.broadcast %cst_9 : f32 to vector<672x1xf32>
    %17 = arith.maximumf %15, %16 : vector<672x1xf32>
    %cst_10 = arith.constant 9.99999974E-6 : f32
    %18 = vector.broadcast %cst_10 : f32 to vector<672x1xf32>
    %19 = arith.addf %17, %18 : vector<672x1xf32>
    %20 = math.rsqrt %19 : vector<672x1xf32>
    %c0_11 = arith.constant 0 : index
    %c0_12 = arith.constant 0 : index
    %21 = vector.load %arg4[%c0_11, %c0_12] : memref<672x1xf32, #tpu.memory_space<vmem>>, vector<672x1xf32>
    %22 = arith.mulf %21, %20 : vector<672x1xf32>
    %c0_13 = arith.constant 0 : index
    %c0_14 = arith.constant 0 : index
    %23 = vector.load %arg5[%c0_13, %c0_14] : memref<672x1xf32, #tpu.memory_space<vmem>>, vector<672x1xf32>
    %24 = arith.mulf %11, %22 : vector<672x1xf32>
    %25 = arith.subf %23, %24 : vector<672x1xf32>
    %26 = vector.broadcast %22 : vector<672x1xf32> to vector<672x196xf32>
    %27 = arith.mulf %4, %26 : vector<672x196xf32>
    %28 = vector.broadcast %25 : vector<672x1xf32> to vector<672x196xf32>
    %29 = arith.addf %27, %28 : vector<672x196xf32>
    %c0_15 = arith.constant 0 : index
    %c0_16 = arith.constant 0 : index
    %30 = vector.load %arg6[%c0_15, %c0_16] : memref<672x196xf32, #tpu.memory_space<vmem>>, vector<672x196xf32>
    tpu.vector_store %arg6[%c0_15, %c0_16], %29 {strides = array<i32>} : memref<672x196xf32, #tpu.memory_space<vmem>>, vector<672x196xf32>,
    return
  }
  func.func @transform_0(%arg0: i32) -> (i32, i32) {
    %c0_i32 = arith.constant 0 : i32
    %c0_i32_0 = arith.constant 0 : i32
    %c0_i32_1 = arith.constant 0 : i32
    return %c0_i32, %c0_i32_0 : i32, i32
  }
  func.func @transform_1(%arg0: i32) -> (i32, i32) {
    %c0_i32 = arith.constant 0 : i32
    %c0_i32_0 = arith.constant 0 : i32
    %c0_i32_1 = arith.constant 0 : i32
    return %c0_i32, %c0_i32_0 : i32, i32
  }
  func.func @transform_2(%arg0: i32) -> (i32, i32) {
    %c0_i32 = arith.constant 0 : i32
    %c0_i32_0 = arith.constant 0 : i32
    return %arg0, %c0_i32 : i32, i32
  }
  func.func @transform_3(%arg0: i32) -> (i32, i32) {
    %c0_i32 = arith.constant 0 : i32
    %c0_i32_0 = arith.constant 0 : i32
    return %arg0, %c0_i32 : i32, i32
  }
  func.func @transform_4(%arg0: i32) -> (i32, i32) {
    %c0_i32 = arith.constant 0 : i32
    %c0_i32_0 = arith.constant 0 : i32
    return %arg0, %c0_i32 : i32, i32
  }
  func.func @transform_5(%arg0: i32) -> (i32, i32) {
    %c0_i32 = arith.constant 0 : i32
    %c0_i32_0 = arith.constant 0 : i32
    return %arg0, %c0_i32 : i32, i32
  }
}

</mosaic_0001>

<bundles_post_ra>
// kernel: tpu_custom_call.1
= control target key start
LH: loop header
LB: loop body
LE: loop exit
PB: predicated region body
PF: predicated region fallthrough
CT: control target
= control target key end

     0   :  { %v4505_v3 = vmov 0.0   ;;  %vm188_vm0 = vcmask 916480   ;;  %vm1010_vm1 = vcmask 556032   ;;  %s9374_s0 = inlined_call_operand.vmem [shape: f32[112,196], index: 0, kind: input, shape index: {}]   ;;  %s9375_s1 = inlined_call_operand.vmem [shape: f32[112,196], index: 1, kind: input, shape index: {}]   ;;  %s9376_s2 = inlined_call_operand.vmem [shape: f32[672,112], index: 2, kind: input, shape index: {}]   ;;  %s9377_s3 = inlined_call_operand.vmem [shape: f32[672,1], index: 3, kind: input, shape index: {}]   ;;  %s9378_s4 = inlined_call_operand.vmem [shape: f32[672,1], index: 4, kind: input, shape index: {}]   ;;  %s9379_s5 = inlined_call_operand.vmem [shape: f32[672,196], index: 5, kind: output, shape index: {}]  }
   0x1   :  { %v21_v0 = vld [vmem:[%s9374_s0 + $0x8] sm:$0xff]  ;;  %v23_v1 = vld [vmem:[%s9374_s0 + $0x18] sm:$0xff]  ;;  %505 = vmatprep.mubr.f32.mxu0 %v4505_v3  ;;  %757 = vmatprep.mubr.f32.mxu1 %v4505_v3  ;;  %v20_v6 = vld [vmem:[%s9374_s0] sm:$0xff] }
   0x2   :  { %v49_v2 = vld [vmem:[%s9375_s1 + $0x8] sm:$0xff]  ;;  %v51_v4 = vld [vmem:[%s9375_s1 + $0x18] sm:$0xff]  ;;  %v22_v7 = vld [vmem:[%s9374_s0 + $0x10] sm:$0xff] }
   0x3   :  { %v77_v5 = vadd.f32 %v49_v2, %v21_v0  ;;  %v79_v8 = vadd.f32 %v51_v4, %v23_v1  ;;  %v48_v9 = vld [vmem:[%s9375_s1] sm:$0xff]  ;;  %v50_v10 = vld [vmem:[%s9375_s1 + $0x10] sm:$0xff]  ;;  %v25_v11 = vld [vmem:[%s9374_s0 + $0x28] sm:$0xff] }
   0x4   :  { %v76_v12 = vadd.f32 %v48_v9, %v20_v6  ;;  %v78_v13 = vadd.f32 %v50_v10, %v22_v7  ;;  %v27_v14 = vld [vmem:[%s9374_s0 + $0x38] sm:$0xff]  ;;  %v53_v15 = vld [vmem:[%s9375_s1 + $0x28] sm:$0xff]  ;;  %v24_v20 = vld [vmem:[%s9374_s0 + $0x20] sm:$0xff] }
   0x5   :  { %v55_v16 = vld [vmem:[%s9375_s1 + $0x38] sm:$0xff]  ;;  %v4291_v17 = vpack.c.bf16 %v79_v8, %v77_v5  ;;  %v81_v18 = vadd.f32 %v53_v15, %v25_v11  ;;  %v26_v21 = vld [vmem:[%s9374_s0 + $0x30] sm:$0xff]  ;;  %v52_v22 = vld [vmem:[%s9375_s1 + $0x20] sm:$0xff] }
   0x6   :  { %v83_v19 = vadd.f32 %v55_v16, %v27_v14  ;;  %v4293_v23 = vpack.c.bf16 %v78_v13, %v76_v12  ;;  %v54_v24 = vld [vmem:[%s9375_s1 + $0x30] sm:$0xff]  ;;  %v80_v25 = vadd.f32 %v52_v22, %v24_v20  ;;  %v29_v26 = vld [vmem:[%s9374_s0 + $0x48] sm:$0xff]  ;;  %v31_v27 = vld [vmem:[%s9374_s0 + $0x58] sm:$0xff] }
   0x7   :  { %4292 = vmatprep.subr.bf16.mxu0 %v4291_v17  ;;  %4319 = vmatprep.subr.bf16.mxu1 %v4291_v17  ;;  %v82_v29 = vadd.f32 %v54_v24, %v26_v21  ;;  %v57_v30 = vld [vmem:[%s9375_s1 + $0x48] sm:$0xff]  ;;  %v59_v31 = vld [vmem:[%s9375_s1 + $0x58] sm:$0xff]  ;;  %v28_v32 = vld [vmem:[%s9374_s0 + $0x40] sm:$0xff] }
   0x8   :  { %v4295_v28 = vpack.c.bf16 %v83_v19, %v81_v18  ;;  %4294 = vmatpush1.bf16.msra.mxu0 %v4293_v23  ;;  %4326 = vmatpush1.bf16.msra.mxu1 %v4293_v23  ;;  %v85_v33 = vadd.f32 %v57_v30, %v29_v26  ;;  %v87_v34 = vadd.f32 %v59_v31, %v31_v27  ;;  %v30_v35 = vld [vmem:[%s9374_s0 + $0x50] sm:$0xff]  ;;  %v56_v36 = vld [vmem:[%s9375_s1 + $0x40] sm:$0xff]  ;;  %v33_v41 = vld [vmem:[%s9374_s0 + $0x68] sm:$0xff] }
   0x9   :  { %v58_v37 = vld [vmem:[%s9375_s1 + $0x50] sm:$0xff]  ;;  %v4297_v38 = vpack.c.bf16 %v82_v29, %v80_v25  ;;  %v84_v39 = vadd.f32 %v56_v36, %v28_v32  ;;  %v35_v42 = vld [vmem:[%s9374_s0 + $0x78] sm:$0xff]  ;;  %v61_v43 = vld [vmem:[%s9375_s1 + $0x68] sm:$0xff] }
   0xa   :  { %4296 = vmatprep.subr.bf16.mxu0 %v4295_v28  ;;  %4320 = vmatprep.subr.bf16.mxu1 %v4295_v28  ;;  %v86_v40 = vadd.f32 %v58_v37, %v30_v35  ;;  %v4299_v44 = vpack.c.bf16 %v87_v34, %v85_v33  ;;  %v63_v45 = vld [vmem:[%s9375_s1 + $0x78] sm:$0xff]  ;;  %v89_v46 = vadd.f32 %v61_v43, %v33_v41  ;;  %v32_v47 = vld [vmem:[%s9374_s0 + $0x60] sm:$0xff]  ;;  %v34_v48 = vld [vmem:[%s9374_s0 + $0x70] sm:$0xff] }
   0xb   :  { %v91_v49 = vadd.f32 %v63_v45, %v35_v42  ;;  %v60_v50 = vld [vmem:[%s9375_s1 + $0x60] sm:$0xff]  ;;  %v62_v51 = vld [vmem:[%s9375_s1 + $0x70] sm:$0xff]  ;;  %v37_v52 = vld [vmem:[%s9374_s0 + $0x88] sm:$0xff] }
   0xc   :  { %4298 = vmatpush1.bf16.msra.mxu0 %v4297_v38  ;;  %4327 = vmatpush1.bf16.msra.mxu1 %v4297_v38  ;;  %v4301_v53 = vpack.c.bf16 %v86_v40, %v84_v39  ;;  %v88_v54 = vadd.f32 %v60_v50, %v32_v47  ;;  %v90_v55 = vadd.f32 %v62_v51, %v34_v48  ;;  %v39_v56 = vld [vmem:[%s9374_s0 + $0x98] sm:$0xff]  ;;  %v65_v57 = vld [vmem:[%s9375_s1 + $0x88] sm:$0xff]  ;;  %v36_v62 = vld [vmem:[%s9374_s0 + $0x80] sm:$0xff] }
   0xd   :  { %v67_v58 = vld [vmem:[%s9375_s1 + $0x98] sm:$0xff]  ;;  %4300 = vmatprep.subr.bf16.mxu0 %v4299_v44  ;;  %4321 = vmatprep.subr.bf16.mxu1 %v4299_v44  ;;  %v4303_v59 = vpack.c.bf16 %v91_v49, %v89_v46  ;;  %v93_v60 = vadd.f32 %v65_v57, %v37_v52  ;;  %v38_v63 = vld [vmem:[%s9374_s0 + $0x90] sm:$0xff]  ;;  %v64_v0 = vld [vmem:[%s9375_s1 + $0x80] sm:$0xff] }
   0xe   :  { %v95_v61 = vadd.f32 %v67_v58, %v39_v56  ;;  %v66_v1 = vld [vmem:[%s9375_s1 + $0x90] sm:$0xff]  ;;  %v41_v2 = vld [vmem:[%s9374_s0 + $0xa8] sm:$0xff]  ;;  %v43_v4 = vld [vmem:[%s9374_s0 + $0xb8] sm:$0xff]  ;;  %v4305_v7 = vpack.c.bf16 %v90_v55, %v88_v54  ;;  %v92_v8 = vadd.f32 %v64_v0, %v36_v62 }
   0xf   :  { %v69_v5 = vld [vmem:[%s9375_s1 + $0xa8] sm:$0xff]  ;;  %v71_v6 = vld [vmem:[%s9375_s1 + $0xb8] sm:$0xff]  ;;  %v94_v9 = vadd.f32 %v66_v1, %v38_v63  ;;  %v40_v10 = vld [vmem:[%s9374_s0 + $0xa0] sm:$0xff] }
  0x10   :  { %4302 = vmatpush1.bf16.msra.mxu0 %v4301_v53  ;;  %4328 = vmatpush1.bf16.msra.mxu1 %v4301_v53  ;;  %v42_v11 = vld [vmem:[%s9374_s0 + $0xb0] sm:$0xff]  ;;  %v4307_v12 = vpack.c.bf16 %v95_v61, %v93_v60  ;;  %v97_v13 = vadd.f32 %v69_v5, %v41_v2  ;;  %v99_v14 = vadd.f32 %v71_v6, %v43_v4  ;;  %v68_v15 = vld [vmem:[%s9375_s1 + $0xa0] sm:$0xff]  ;;  %v45_v17 = vld [vmem:[%s9374_s0 + $0xc8] sm:$0xff] }
  0x11   :  { %4304 = vmatprep.subr.bf16.mxu0 %v4303_v59  ;;  %4322 = vmatprep.subr.bf16.mxu1 %v4303_v59  ;;  %v70_v16 = vld [vmem:[%s9375_s1 + $0xb0] sm:$0xff]  ;;  %v47_v18 = vld [vmem:[%s9374_s0 + $0xd8] sm:$0xff]  ;;  %v73_v19 = vld [vmem:[%s9375_s1 + $0xc8] sm:$0xff]  ;;  %v4309_v21 = vpack.c.bf16 %v94_v9, %v92_v8  ;;  %v96_v22 = vadd.f32 %v68_v15, %v40_v10 }
  0x12   :  { %v75_v20 = vld [vmem:[%s9375_s1 + $0xd8] sm:$0xff]  ;;  %v98_v23 = vadd.f32 %v70_v16, %v42_v11  ;;  %v44_v24 = vld [vmem:[%s9374_s0 + $0xc0] sm:$0xff]  ;;  %v4311_v25 = vpack.c.bf16 %v99_v14, %v97_v13  ;;  %v101_v26 = vadd.f32 %v73_v19, %v45_v17  ;;  %v46_v28 = vld [vmem:[%s9374_s0 + $0xd0] sm:$0xff] }
  0x13   :  { %v103_v27 = vadd.f32 %v75_v20, %v47_v18  ;;  %v72_v29 = vld [vmem:[%s9375_s1 + $0xc0] sm:$0xff]  ;;  %v74_v30 = vld [vmem:[%s9375_s1 + $0xd0] sm:$0xff]  ;;  %v105_v38 = vld [vmem:[%s9376_s2 + $0x8] sm:$0xff] }
  0x14   :  { %4306 = vmatpush1.bf16.msra.mxu0 %v4305_v7  ;;  %4329 = vmatpush1.bf16.msra.mxu1 %v4305_v7  ;;  %v4313_v31 = vpack.c.bf16 %v98_v23, %v96_v22  ;;  %v100_v32 = vadd.f32 %v72_v29, %v44_v24  ;;  %v102_v33 = vadd.f32 %v74_v30, %v46_v28  ;;  %v104_v36 = vld [vmem:[%s9376_s2] sm:$0xff]  ;;  %v146_v37 = vld [vmem:[%s9376_s2 + $0x150] sm:$0xff]  ;;  %v147_v39 = vld [vmem:[%s9376_s2 + $0x158] sm:$0xff] }
  0x15   :  { %4308 = vmatprep.subr.bf16.mxu0 %v4307_v12  ;;  %4323 = vmatprep.subr.bf16.mxu1 %v4307_v12  ;;  %v4315_v34 = vpack.c.bf16 %v103_v27, %v101_v26  ;;  %v106_v40 = vld [vmem:[%s9376_s2 + $0x10] sm:$0xff]  ;;  %v148_v41 = vld [vmem:[%s9376_s2 + $0x160] sm:$0xff]  ;;  %v107_v42 = vld [vmem:[%s9376_s2 + $0x18] sm:$0xff] }
  0x16   :  { %v4317_v35 = vpack.c.bf16 %v102_v33, %v100_v32  ;;  %v149_v43 = vld [vmem:[%s9376_s2 + $0x168] sm:$0xff]  ;;  %v108_v44 = vld [vmem:[%s9376_s2 + $0x20] sm:$0xff]  ;;  %v150_v45 = vld [vmem:[%s9376_s2 + $0x170] sm:$0xff] }
  0x17   :  { %v109_v46 = vld [vmem:[%s9376_s2 + $0x28] sm:$0xff]  ;;  %v151_v47 = vld [vmem:[%s9376_s2 + $0x178] sm:$0xff]  ;;  %v110_v48 = vld [vmem:[%s9376_s2 + $0x30] sm:$0xff] }
  0x18   :  { %4310 = vmatpush1.bf16.msra.mxu0 %v4309_v21  ;;  %4330 = vmatpush1.bf16.msra.mxu1 %v4309_v21  ;;  %v152_v49 = vld [vmem:[%s9376_s2 + $0x180] sm:$0xff]  ;;  %v111_v50 = vld [vmem:[%s9376_s2 + $0x38] sm:$0xff]  ;;  %v153_v51 = vld [vmem:[%s9376_s2 + $0x188] sm:$0xff] }
  0x19   :  { %4312 = vmatprep.subr.bf16.mxu0 %v4311_v25  ;;  %4324 = vmatprep.subr.bf16.mxu1 %v4311_v25  ;;  %v112_v52 = vld [vmem:[%s9376_s2 + $0x40] sm:$0xff]  ;;  %v154_v53 = vld [vmem:[%s9376_s2 + $0x190] sm:$0xff]  ;;  %v113_v54 = vld [vmem:[%s9376_s2 + $0x48] sm:$0xff] }
  0x1a   :  { %v155_v55 = vld [vmem:[%s9376_s2 + $0x198] sm:$0xff]  ;;  %v114_v56 = vld [vmem:[%s9376_s2 + $0x50] sm:$0xff]  ;;  %v156_v57 = vld [vmem:[%s9376_s2 + $0x1a0] sm:$0xff] }
  0x1b   :  { %v115_v58 = vld [vmem:[%s9376_s2 + $0x58] sm:$0xff]  ;;  %v157_v59 = vld [vmem:[%s9376_s2 + $0x1a8] sm:$0xff]  ;;  %v116_v60 = vld [vmem:[%s9376_s2 + $0x60] sm:$0xff] }
  0x1c   :  { %4314 = vmatpush1.bf16.msra.mxu0 %v4313_v31  ;;  %4331 = vmatpush1.bf16.msra.mxu1 %v4313_v31  ;;  %v158_v61 = vld [vmem:[%s9376_s2 + $0x1b0] sm:$0xff]  ;;  %v117_v62 = vld [vmem:[%s9376_s2 + $0x68] sm:$0xff]  ;;  %v159_v63 = vld [vmem:[%s9376_s2 + $0x1b8] sm:$0xff] }
  0x1d   :  { %4316 = vmatprep.subr.bf16.mxu0 %v4315_v34  ;;  %4325 = vmatprep.subr.bf16.mxu1 %v4315_v34  ;;  %v118_v0 = vld [vmem:[%s9376_s2 + $0x70] sm:$0xff]  ;;  %v160_v1 = vld [vmem:[%s9376_s2 + $0x1c0] sm:$0xff]  ;;  %v119_v2 = vld [vmem:[%s9376_s2 + $0x78] sm:$0xff] }
  0x1e   :  { %v161_v4 = vld [vmem:[%s9376_s2 + $0x1c8] sm:$0xff]  ;;  %v120_v5 = vld [vmem:[%s9376_s2 + $0x80] sm:$0xff]  ;;  %v162_v6 = vld [vmem:[%s9376_s2 + $0x1d0] sm:$0xff] }
  0x1f   :  { %v121_v7 = vld [vmem:[%s9376_s2 + $0x88] sm:$0xff]  ;;  %v163_v8 = vld [vmem:[%s9376_s2 + $0x1d8] sm:$0xff]  ;;  %v122_v9 = vld [vmem:[%s9376_s2 + $0x90] sm:$0xff] }
  0x20   :  { %4318 = vmatpush1.bf16.msra.mxu0 %v4317_v35  ;;  %4332 = vmatpush1.bf16.msra.mxu1 %v4317_v35  ;;  %v164_v10 = vld [vmem:[%s9376_s2 + $0x1e0] sm:$0xff]  ;;  %v123_v11 = vld [vmem:[%s9376_s2 + $0x98] sm:$0xff]  ;;  %v165_v12 = vld [vmem:[%s9376_s2 + $0x1e8] sm:$0xff] }
  0x21   :  { %v124_v13 = vld [vmem:[%s9376_s2 + $0xa0] sm:$0xff]  ;;  %v166_v14 = vld [vmem:[%s9376_s2 + $0x1f0] sm:$0xff]  ;;  %v125_v15 = vld [vmem:[%s9376_s2 + $0xa8] sm:$0xff] }
  0x22   :  { %v167_v16 = vld [vmem:[%s9376_s2 + $0x1f8] sm:$0xff]  ;;  %v126_v17 = vld [vmem:[%s9376_s2 + $0xb0] sm:$0xff]  ;;  %v168_v18 = vld [vmem:[%s9376_s2 + $0x200] sm:$0xff] }
  0x23   :  { %4207 = vmatmul.mubr.msk.f32.vlgmr.msra.gmra.mrb[0].mxu0 %vm188_vm0, %v104_v36  ;;  %4249 = vmatmul.mubr.msk.f32.vlgmr.msra.gmra.mrb[0].mxu1 %vm188_vm0, %v146_v37  ;;  %v127_v19 = vld [vmem:[%s9376_s2 + $0xb8] sm:$0xff]  ;;  %v169_v20 = vld [vmem:[%s9376_s2 + $0x208] sm:$0xff]  ;;  %v128_v21 = vld [vmem:[%s9376_s2 + $0xc0] sm:$0xff] }
  0x24   :  { %511 = vmatprep.mubr.f32.mxu0 %v4505_v3  ;;  %763 = vmatprep.mubr.f32.mxu1 %v4505_v3  ;;  %v170_v22 = vld [vmem:[%s9376_s2 + $0x210] sm:$0xff]  ;;  %v129_v23 = vld [vmem:[%s9376_s2 + $0xc8] sm:$0xff]  ;;  %v171_v24 = vld [vmem:[%s9376_s2 + $0x218] sm:$0xff] }
  0x25   :  { %v130_v25 = vld [vmem:[%s9376_s2 + $0xd0] sm:$0xff]  ;;  %v172_v26 = vld [vmem:[%s9376_s2 + $0x220] sm:$0xff]  ;;  %v131_v27 = vld [vmem:[%s9376_s2 + $0xd8] sm:$0xff] }
  0x26   :  { %v173_v28 = vld [vmem:[%s9376_s2 + $0x228] sm:$0xff]  ;;  %v132_v29 = vld [vmem:[%s9376_s2 + $0xe0] sm:$0xff]  ;;  %v174_v30 = vld [vmem:[%s9376_s2 + $0x230] sm:$0xff] }
  0x27   :  { %4208 = vmatmul.mubr.msk.f32.gmra.mrb[2].mxu0 %vm188_vm0, %v105_v38  ;;  %4250 = vmatmul.mubr.msk.f32.gmra.mrb[2].mxu1 %vm188_vm0, %v147_v39  ;;  %v133_v31 = vld [vmem:[%s9376_s2 + $0xe8] sm:$0xff]  ;;  %v175_v32 = vld [vmem:[%s9376_s2 + $0x238] sm:$0xff]  ;;  %v134_v33 = vld [vmem:[%s9376_s2 + $0xf0] sm:$0xff] }
  0x28   :  { %517 = vmatprep.mubr.f32.mxu0 %v4505_v3  ;;  %769 = vmatprep.mubr.f32.mxu1 %v4505_v3  ;;  %v176_v34 = vld [vmem:[%s9376_s2 + $0x240] sm:$0xff]  ;;  %v135_v35 = vld [vmem:[%s9376_s2 + $0xf8] sm:$0xff]  ;;  %v177_v36 = vld [vmem:[%s9376_s2 + $0x248] sm:$0xff] }
  0x29   :  { %v136_v37 = vld [vmem:[%s9376_s2 + $0x100] sm:$0xff]  ;;  %v178_v38 = vld [vmem:[%s9376_s2 + $0x250] sm:$0xff]  ;;  %v137_v39 = vld [vmem:[%s9376_s2 + $0x108] sm:$0xff] }
  0x2b   :  { %4209 = vmatmul.mubr.msk.f32.gmra.mrb[4].mxu0 %vm188_vm0, %v106_v40  ;;  %4251 = vmatmul.mubr.msk.f32.gmra.mrb[4].mxu1 %vm188_vm0, %v148_v41  ;;  %v179_v40 = vld [vmem:[%s9376_s2 + $0x258] sm:$0xff]  ;;  %v138_v41 = vld [vmem:[%s9376_s2 + $0x110] sm:$0xff] }
  0x2c   :  { %523 = vmatprep.mubr.f32.mxu0 %v4505_v3  ;;  %775 = vmatprep.mubr.f32.mxu1 %v4505_v3 }
  0x2f   :  { %4210 = vmatmul.mubr.msk.f32.gmra.mrb[6].mxu0 %vm188_vm0, %v107_v42  ;;  %4252 = vmatmul.mubr.msk.f32.gmra.mrb[6].mxu1 %vm188_vm0, %v149_v43  ;;  %v139_v42 = vld [vmem:[%s9376_s2 + $0x118] sm:$0xff]  ;;  %v180_v43 = vld [vmem:[%s9376_s2 + $0x260] sm:$0xff] }
  0x30   :  { %529 = vmatprep.mubr.f32.mxu0 %v4505_v3  ;;  %781 = vmatprep.mubr.f32.mxu1 %v4505_v3 }
  0x33   :  { %4211 = vmatmul.mubr.msk.f32.gmra.mrb[8].mxu0 %vm188_vm0, %v108_v44  ;;  %4253 = vmatmul.mubr.msk.f32.gmra.mrb[8].mxu1 %vm188_vm0, %v150_v45  ;;  %v181_v44 = vld [vmem:[%s9376_s2 + $0x268] sm:$0xff]  ;;  %v140_v45 = vld [vmem:[%s9376_s2 + $0x120] sm:$0xff] }
  0x34   :  { %535 = vmatprep.mubr.f32.mxu0 %v4505_v3  ;;  %787 = vmatprep.mubr.f32.mxu1 %v4505_v3 }
  0x37   :  { %4212 = vmatmul.mubr.msk.f32.gmra.mrb[10].mxu0 %vm188_vm0, %v109_v46  ;;  %4254 = vmatmul.mubr.msk.f32.gmra.mrb[10].mxu1 %vm188_vm0, %v151_v47  ;;  %v141_v46 = vld [vmem:[%s9376_s2 + $0x128] sm:$0xff]  ;;  %v182_v47 = vld [vmem:[%s9376_s2 + $0x270] sm:$0xff] }
  0x38   :  { %541 = vmatprep.mubr.f32.mxu0 %v4505_v3  ;;  %793 = vmatprep.mubr.f32.mxu1 %v4505_v3 }
  0x3b   :  { %4213 = vmatmul.mubr.msk.f32.gmra.mrb[12].mxu0 %vm188_vm0, %v110_v48  ;;  %4255 = vmatmul.mubr.msk.f32.gmra.mrb[12].mxu1 %vm188_vm0, %v152_v49  ;;  %v183_v48 = vld [vmem:[%s9376_s2 + $0x278] sm:$0xff]  ;;  %v142_v49 = vld [vmem:[%s9376_s2 + $0x130] sm:$0xff] }
  0x3c   :  { %547 = vmatprep.mubr.f32.mxu0 %v4505_v3  ;;  %799 = vmatprep.mubr.f32.mxu1 %v4505_v3 }
  0x3f   :  { %4214 = vmatmul.mubr.msk.f32.gmra.mrb[14].mxu0 %vm188_vm0, %v111_v50  ;;  %4256 = vmatmul.mubr.msk.f32.gmra.mrb[14].mxu1 %vm188_vm0, %v153_v51  ;;  %v143_v50 = vld [vmem:[%s9376_s2 + $0x138] sm:$0xff]  ;;  %v184_v51 = vld [vmem:[%s9376_s2 + $0x280] sm:$0xff] }
  0x40   :  { %553 = vmatprep.mubr.f32.mxu0 %v4505_v3  ;;  %805 = vmatprep.mubr.f32.mxu1 %v4505_v3 }
  0x43   :  { %4215 = vmatmul.mubr.msk.f32.gmra.mrb[16].mxu0 %vm188_vm0, %v112_v52  ;;  %4257 = vmatmul.mubr.msk.f32.gmra.mrb[16].mxu1 %vm188_vm0, %v154_v53  ;;  %v185_v52 = vld [vmem:[%s9376_s2 + $0x288] sm:$0xff]  ;;  %v144_v53 = vld [vmem:[%s9376_s2 + $0x140] sm:$0xff] }
  0x44   :  { %559 = vmatprep.mubr.f32.mxu0 %v4505_v3  ;;  %811 = vmatprep.mubr.f32.mxu1 %v4505_v3 }
  0x47   :  { %4216 = vmatmul.mubr.msk.f32.gmra.mrb[18].mxu0 %vm188_vm0, %v113_v54  ;;  %4258 = vmatmul.mubr.msk.f32.gmra.mrb[18].mxu1 %vm188_vm0, %v155_v55  ;;  %v145_v54 = vld [vmem:[%s9376_s2 + $0x148] sm:$0xff]  ;;  %v186_v55 = vld [vmem:[%s9376_s2 + $0x290] sm:$0xff] }
  0x48   :  { %565 = vmatprep.mubr.f32.mxu0 %v4505_v3  ;;  %817 = vmatprep.mubr.f32.mxu1 %v4505_v3 }
  0x4b   :  { %4217 = vmatmul.mubr.msk.f32.gmra.mrb[20].mxu0 %vm188_vm0, %v114_v56  ;;  %4259 = vmatmul.mubr.msk.f32.gmra.mrb[20].mxu1 %vm188_vm0, %v156_v57  ;;  %v187_v56 = vld [vmem:[%s9376_s2 + $0x298] sm:$0xff] }
  0x4c   :  { %571 = vmatprep.mubr.f32.mxu0 %v4505_v3  ;;  %823 = vmatprep.mubr.f32.mxu1 %v4505_v3 }
  0x4f   :  { %4218 = vmatmul.mubr.msk.f32.gmra.mrb[22].mxu0 %vm188_vm0, %v115_v58  ;;  %4260 = vmatmul.mubr.msk.f32.gmra.mrb[22].mxu1 %vm188_vm0, %v157_v59 }
  0x50   :  { %577 = vmatprep.mubr.f32.mxu0 %v4505_v3  ;;  %829 = vmatprep.mubr.f32.mxu1 %v4505_v3 }
  0x53   :  { %4219 = vmatmul.mubr.msk.f32.gmra.mrb[24].mxu0 %vm188_vm0, %v116_v60  ;;  %4261 = vmatmul.mubr.msk.f32.gmra.mrb[24].mxu1 %vm188_vm0, %v158_v61 }
  0x54   :  { %583 = vmatprep.mubr.f32.mxu0 %v4505_v3  ;;  %835 = vmatprep.mubr.f32.mxu1 %v4505_v3 }
  0x57   :  { %4220 = vmatmul.mubr.msk.f32.gmra.mrb[26].mxu0 %vm188_vm0, %v117_v62  ;;  %4262 = vmatmul.mubr.msk.f32.gmra.mrb[26].mxu1 %vm188_vm0, %v159_v63 }
  0x58   :  { %589 = vmatprep.mubr.f32.mxu0 %v4505_v3  ;;  %841 = vmatprep.mubr.f32.mxu1 %v4505_v3 }
  0x5b   :  { %4221 = vmatmul.mubr.msk.f32.gmra.mrb[28].mxu0 %vm188_vm0, %v118_v0  ;;  %4263 = vmatmul.mubr.msk.f32.gmra.mrb[28].mxu1 %vm188_vm0, %v160_v1 }
  0x5c   :  { %595 = vmatprep.mubr.f32.mxu0 %v4505_v3  ;;  %847 = vmatprep.mubr.f32.mxu1 %v4505_v3 }
  0x5f   :  { %4222 = vmatmul.mubr.msk.f32.gmra.mrb[30].mxu0 %vm188_vm0, %v119_v2  ;;  %4264 = vmatmul.mubr.msk.f32.gmra.mrb[30].mxu1 %vm188_vm0, %v161_v4 }
  0x60   :  { %601 = vmatprep.mubr.f32.mxu0 %v4505_v3  ;;  %853 = vmatprep.mubr.f32.mxu1 %v4505_v3 }
  0x63   :  { %4223 = vmatmul.mubr.msk.f32.gmra.mrb[32].mxu0 %vm188_vm0, %v120_v5  ;;  %4265 = vmatmul.mubr.msk.f32.gmra.mrb[32].mxu1 %vm188_vm0, %v162_v6 }
  0x64   :  { %607 = vmatprep.mubr.f32.mxu0 %v4505_v3  ;;  %859 = vmatprep.mubr.f32.mxu1 %v4505_v3 }
  0x67   :  { %4224 = vmatmul.mubr.msk.f32.gmra.mrb[34].mxu0 %vm188_vm0, %v121_v7  ;;  %4266 = vmatmul.mubr.msk.f32.gmra.mrb[34].mxu1 %vm188_vm0, %v163_v8 }
  0x68   :  { %613 = vmatprep.mubr.f32.mxu0 %v4505_v3  ;;  %865 = vmatprep.mubr.f32.mxu1 %v4505_v3 }
  0x6b   :  { %4225 = vmatmul.mubr.msk.f32.gmra.mrb[36].mxu0 %vm188_vm0, %v122_v9  ;;  %4267 = vmatmul.mubr.msk.f32.gmra.mrb[36].mxu1 %vm188_vm0, %v164_v10 }
  0x6c   :  { %619 = vmatprep.mubr.f32.mxu0 %v4505_v3  ;;  %871 = vmatprep.mubr.f32.mxu1 %v4505_v3 }
  0x6f   :  { %4226 = vmatmul.mubr.msk.f32.gmra.mrb[38].mxu0 %vm188_vm0, %v123_v11  ;;  %4268 = vmatmul.mubr.msk.f32.gmra.mrb[38].mxu1 %vm188_vm0, %v165_v12 }
  0x70   :  { %625 = vmatprep.mubr.f32.mxu0 %v4505_v3  ;;  %877 = vmatprep.mubr.f32.mxu1 %v4505_v3 }
  0x73   :  { %4227 = vmatmul.mubr.msk.f32.gmra.mrb[40].mxu0 %vm188_vm0, %v124_v13  ;;  %4269 = vmatmul.mubr.msk.f32.gmra.mrb[40].mxu1 %vm188_vm0, %v166_v14 }
  0x74   :  { %631 = vmatprep.mubr.f32.mxu0 %v4505_v3  ;;  %883 = vmatprep.mubr.f32.mxu1 %v4505_v3 }
  0x77   :  { %4228 = vmatmul.mubr.msk.f32.gmra.mrb[42].mxu0 %vm188_vm0, %v125_v15  ;;  %4270 = vmatmul.mubr.msk.f32.gmra.mrb[42].mxu1 %vm188_vm0, %v167_v16 }
  0x78   :  { %637 = vmatprep.mubr.f32.mxu0 %v4505_v3  ;;  %889 = vmatprep.mubr.f32.mxu1 %v4505_v3 }
  0x7b   :  { %4229 = vmatmul.mubr.msk.f32.gmra.mrb[44].mxu0 %vm188_vm0, %v126_v17  ;;  %4271 = vmatmul.mubr.msk.f32.gmra.mrb[44].mxu1 %vm188_vm0, %v168_v18 }
  0x7c   :  { %643 = vmatprep.mubr.f32.mxu0 %v4505_v3  ;;  %895 = vmatprep.mubr.f32.mxu1 %v4505_v3 }
  0x7f   :  { %4230 = vmatmul.mubr.msk.f32.gmra.mrb[46].mxu0 %vm188_vm0, %v127_v19  ;;  %4272 = vmatmul.mubr.msk.f32.gmra.mrb[46].mxu1 %vm188_vm0, %v169_v20 }
  0x80   :  { %649 = vmatprep.mubr.f32.mxu0 %v4505_v3  ;;  %901 = vmatprep.mubr.f32.mxu1 %v4505_v3 }
  0x83   :  { %4231 = vmatmul.mubr.msk.f32.gmra.mrb[48].mxu0 %vm188_vm0, %v128_v21  ;;  %4273 = vmatmul.mubr.msk.f32.gmra.mrb[48].mxu1 %vm188_vm0, %v170_v22 }
  0x84   :  { %655 = vmatprep.mubr.f32.mxu0 %v4505_v3  ;;  %907 = vmatprep.mubr.f32.mxu1 %v4505_v3 }
  0x87   :  { %4232 = vmatmul.mubr.msk.f32.gmra.mrb[50].mxu0 %vm188_vm0, %v129_v23  ;;  %4274 = vmatmul.mubr.msk.f32.gmra.mrb[50].mxu1 %vm188_vm0, %v171_v24 }
  0x88   :  { %661 = vmatprep.mubr.f32.mxu0 %v4505_v3  ;;  %913 = vmatprep.mubr.f32.mxu1 %v4505_v3 }
  0x8b   :  { %4233 = vmatmul.mubr.msk.f32.gmra.mrb[52].mxu0 %vm188_vm0, %v130_v25  ;;  %4275 = vmatmul.mubr.msk.f32.gmra.mrb[52].mxu1 %vm188_vm0, %v172_v26 }
  0x8c   :  { %667 = vmatprep.mubr.f32.mxu0 %v4505_v3  ;;  %919 = vmatprep.mubr.f32.mxu1 %v4505_v3 }
  0x8f   :  { %4234 = vmatmul.mubr.msk.f32.gmra.mrb[54].mxu0 %vm188_vm0, %v131_v27  ;;  %4276 = vmatmul.mubr.msk.f32.gmra.mrb[54].mxu1 %vm188_vm0, %v173_v28 }
  0x90   :  { %673 = vmatprep.mubr.f32.mxu0 %v4505_v3  ;;  %925 = vmatprep.mubr.f32.mxu1 %v4505_v3 }
  0x93   :  { %4235 = vmatmul.mubr.msk.f32.gmra.mrb[56].mxu0 %vm188_vm0, %v132_v29  ;;  %4277 = vmatmul.mubr.msk.f32.gmra.mrb[56].mxu1 %vm188_vm0, %v174_v30 }
  0x94   :  { %679 = vmatprep.mubr.f32.mxu0 %v4505_v3  ;;  %931 = vmatprep.mubr.f32.mxu1 %v4505_v3 }
  0x97   :  { %4236 = vmatmul.mubr.msk.f32.gmra.mrb[58].mxu0 %vm188_vm0, %v133_v31  ;;  %4278 = vmatmul.mubr.msk.f32.gmra.mrb[58].mxu1 %vm188_vm0, %v175_v32 }
  0x98   :  { %685 = vmatprep.mubr.f32.mxu0 %v4505_v3  ;;  %937 = vmatprep.mubr.f32.mxu1 %v4505_v3 }
  0x9b   :  { %4237 = vmatmul.mubr.msk.f32.gmra.mrb[60].mxu0 %vm188_vm0, %v134_v33  ;;  %4279 = vmatmul.mubr.msk.f32.gmra.mrb[60].mxu1 %vm188_vm0, %v176_v34 }
  0x9c   :  { %691 = vmatprep.mubr.f32.mxu0 %v4505_v3  ;;  %943 = vmatprep.mubr.f32.mxu1 %v4505_v3 }
  0x9f   :  { %4238 = vmatmul.mubr.msk.f32.gmra.mrb[62].mxu0 %vm188_vm0, %v135_v35  ;;  %4280 = vmatmul.mubr.msk.f32.gmra.mrb[62].mxu1 %vm188_vm0, %v177_v36 }
  0xa0   :  { %697 = vmatprep.mubr.f32.mxu0 %v4505_v3  ;;  %949 = vmatprep.mubr.f32.mxu1 %v4505_v3 }
  0xa3   :  { %4239 = vmatmul.mubr.msk.f32.gmra.mrb[64].mxu0 %vm188_vm0, %v136_v37  ;;  %4281 = vmatmul.mubr.msk.f32.gmra.mrb[64].mxu1 %vm188_vm0, %v178_v38 }
  0xa4   :  { %703 = vmatprep.mubr.f32.mxu0 %v4505_v3  ;;  %955 = vmatprep.mubr.f32.mxu1 %v4505_v3 }
  0xa7   :  { %4240 = vmatmul.mubr.msk.f32.gmra.mrb[66].mxu0 %vm188_vm0, %v137_v39  ;;  %4282 = vmatmul.mubr.msk.f32.gmra.mrb[66].mxu1 %vm188_vm0, %v179_v40 }
  0xa8   :  { %709 = vmatprep.mubr.f32.mxu0 %v4505_v3  ;;  %961 = vmatprep.mubr.f32.mxu1 %v4505_v3 }
  0xab   :  { %4241 = vmatmul.mubr.msk.f32.gmra.mrb[68].mxu0 %vm188_vm0, %v138_v41  ;;  %4283 = vmatmul.mubr.msk.f32.gmra.mrb[68].mxu1 %vm188_vm0, %v180_v43 }
  0xac   :  { %715 = vmatprep.mubr.f32.mxu0 %v4505_v3  ;;  %967 = vmatprep.mubr.f32.mxu1 %v4505_v3 }
  0xaf   :  { %4242 = vmatmul.mubr.msk.f32.gmra.mrb[70].mxu0 %vm188_vm0, %v139_v42  ;;  %4284 = vmatmul.mubr.msk.f32.gmra.mrb[70].mxu1 %vm188_vm0, %v181_v44 }
  0xb0   :  { %721 = vmatprep.mubr.f32.mxu0 %v4505_v3  ;;  %973 = vmatprep.mubr.f32.mxu1 %v4505_v3 }
  0xb3   :  { %4243 = vmatmul.mubr.msk.f32.gmra.mrb[72].mxu0 %vm188_vm0, %v140_v45  ;;  %4285 = vmatmul.mubr.msk.f32.gmra.mrb[72].mxu1 %vm188_vm0, %v182_v47 }
  0xb4   :  { %727 = vmatprep.mubr.f32.mxu0 %v4505_v3  ;;  %979 = vmatprep.mubr.f32.mxu1 %v4505_v3 }
  0xb7   :  { %4244 = vmatmul.mubr.msk.f32.gmra.mrb[74].mxu0 %vm188_vm0, %v141_v46  ;;  %4286 = vmatmul.mubr.msk.f32.gmra.mrb[74].mxu1 %vm188_vm0, %v183_v48 }
  0xb8   :  { %733 = vmatprep.mubr.f32.mxu0 %v4505_v3  ;;  %985 = vmatprep.mubr.f32.mxu1 %v4505_v3 }
  0xbb   :  { %4245 = vmatmul.mubr.msk.f32.gmra.mrb[76].mxu0 %vm188_vm0, %v142_v49  ;;  %4287 = vmatmul.mubr.msk.f32.gmra.mrb[76].mxu1 %vm188_vm0, %v184_v51 }
  0xbc   :  { %739 = vmatprep.mubr.f32.mxu0 %v4505_v3  ;;  %991 = vmatprep.mubr.f32.mxu1 %v4505_v3 }
  0xbf   :  { %4246 = vmatmul.mubr.msk.f32.gmra.mrb[78].mxu0 %vm188_vm0, %v143_v50  ;;  %4288 = vmatmul.mubr.msk.f32.gmra.mrb[78].mxu1 %vm188_vm0, %v185_v52 }
  0xc0   :  { %745 = vmatprep.mubr.f32.mxu0 %v4505_v3  ;;  %997 = vmatprep.mubr.f32.mxu1 %v4505_v3 }
  0xc3   :  { %4247 = vmatmul.mubr.msk.f32.gmra.mrb[80].mxu0 %vm188_vm0, %v144_v53  ;;  %4289 = vmatmul.mubr.msk.f32.gmra.mrb[80].mxu1 %vm188_vm0, %v186_v55 }
  0xc4   :  { %751 = vmatprep.mubr.f32.mxu0 %v4505_v3  ;;  %1003 = vmatprep.mubr.f32.mxu1 %v4505_v3 }
  0xc7   :  { %4248 = vmatmul.mubr.msk.f32.gmra.mrb[82].mxu0 %vm188_vm0, %v145_v54  ;;  %4290 = vmatmul.mubr.msk.f32.gmra.mrb[82].mxu1 %vm188_vm0, %v187_v56 }
  0xf6   :  { %v5125_v57 = vpop.f32.mrb[0].mxu0  ;;  %v5127_v58 = vpop.f32.mrb[0].mxu1 }
  0xf7   :  { %9661 = vst [vmem:[#allocation2_spill] sm:$0xff] %v5125_v57  ;;  %9662 = vst [vmem:[#allocation3_spill] sm:$0xff] %v5127_v58  ;;  %v5129_v59 = vpop.f32.mrb[1].mxu0  ;;  %v5131_v60 = vpop.f32.mrb[1].mxu1  ;;  %v1347_v61 = vmul.f32 %v5125_v57, %v5125_v57  ;;  %v1431_v4 = vmul.f32 %v5127_v58, %v5127_v58 }
  0xf8   :  { %9663 = vst [vmem:[#allocation4_spill] sm:$0xff] %v5129_v59  ;;  %9664 = vst [vmem:[#allocation5_spill] sm:$0xff] %v5131_v60  ;;  %v1348_v3 = vmul.f32 %v5129_v59, %v5129_v59  ;;  %v1432_v62 = vmul.f32 %v5131_v60, %v5131_v60  ;;  %v1011_v63 = vsel %vm1010_vm1, %v5129_v59, 0.0  ;;  %v1179_v0 = vsel %vm1010_vm1, %v5131_v60, 0.0 }
  0xf9   :  { %v1012_v1 = vadd.f32 %v1011_v63, %v5125_v57  ;;  %v1180_v2 = vadd.f32 %v1179_v0, %v5127_v58 }
  0xfa   :  { %v5147_v5 = vpop.f32.mrb[2].mxu0  ;;  %v5149_v6 = vpop.f32.mrb[2].mxu1  ;;  %v1515_v7 = vsel %vm1010_vm1, %v1348_v3, 0.0  ;;  %v1683_v8 = vsel %vm1010_vm1, %v1432_v62, 0.0 }
  0xfb   :  { %9665 = vst [vmem:[#allocation6_spill] sm:$0xff] %v5147_v5  ;;  %9666 = vst [vmem:[#allocation7_spill] sm:$0xff] %v5149_v6  ;;  %v5153_v9 = vpop.f32.mrb[3].mxu1  ;;  %1013 = vadd.xlane.f32.xlu0 %v1012_v1  ;;  %v5155_v10 = vpop.f32.mrb[3].mxu0  ;;  %v1516_v11 = vadd.f32 %v1515_v7, %v1347_v61  ;;  %v1349_v12 = vmul.f32 %v5147_v5, %v5147_v5  ;;  %v1684_v13 = vadd.f32 %v1683_v8, %v1431_v4 }
  0xfc   :  { %9667 = vst [vmem:[#allocation8_spill] sm:$0xff] %v5153_v9  ;;  %9668 = vst [vmem:[#allocation9_spill] sm:$0xff] %v5155_v10  ;;  %v1434_v14 = vmul.f32 %v5153_v9, %v5153_v9  ;;  %v1350_v15 = vmul.f32 %v5155_v10, %v5155_v10  ;;  %v1183_v16 = vsel %vm1010_vm1, %v5153_v9, 0.0  ;;  %v1015_v17 = vsel %vm1010_vm1, %v5155_v10, 0.0 }
  0xfd   :  { %v1184_v18 = vadd.f32 %v1183_v16, %v5149_v6  ;;  %v1433_v19 = vmul.f32 %v5149_v6, %v5149_v6  ;;  %v1016_v20 = vadd.f32 %v1015_v17, %v5147_v5 }
  0xfe   :  { %v1519_v21 = vsel %vm1010_vm1, %v1350_v15, 0.0  ;;  %v5172_v22 = vpop.f32.mrb[4].mxu0  ;;  %v1687_v23 = vsel %vm1010_vm1, %v1434_v14, 0.0  ;;  %v5175_v24 = vpop.f32.mrb[4].mxu1 }
  0xff   :  { %9669 = vst [vmem:[#allocation10_spill] sm:$0xff] %v5172_v22  ;;  %9670 = vst [vmem:[#allocation11_spill] sm:$0xff] %v5175_v24  ;;  %1185 = vadd.xlane.f32.xlu1 %v1184_v18  ;;  %1181 = vadd.xlane.f32.xlu0 %v1180_v2  ;;  %v1520_v25 = vadd.f32 %v1519_v21, %v1349_v12  ;;  %v5177_v26 = vpop.f32.mrb[5].mxu0  ;;  %v1688_v27 = vadd.f32 %v1687_v23, %v1433_v19  ;;  %v5179_v28 = vpop.f32.mrb[5].mxu1 }
 0x100   :  { %9671 = vst [vmem:[#allocation12_spill] sm:$0xff] %v5177_v26  ;;  %9672 = vst [vmem:[#allocation13_spill] sm:$0xff] %v5179_v28  ;;  %v1351_v29 = vmul.f32 %v5172_v22, %v5172_v22  ;;  %v1352_v30 = vmul.f32 %v5177_v26, %v5177_v26  ;;  %v1436_v31 = vmul.f32 %v5179_v28, %v5179_v28  ;;  %v1019_v32 = vsel %vm1010_vm1, %v5177_v26, 0.0 }
 0x101   :  { %v1187_v33 = vsel %vm1010_vm1, %v5179_v28, 0.0  ;;  %v1020_v34 = vadd.f32 %v1019_v32, %v5172_v22  ;;  %v1435_v36 = vmul.f32 %v5175_v24, %v5175_v24 }
 0x102   :  { %v1188_v35 = vadd.f32 %v1187_v33, %v5175_v24  ;;  %v5195_v37 = vpop.f32.mrb[6].mxu0  ;;  %v5197_v38 = vpop.f32.mrb[6].mxu1  ;;  %v1523_v39 = vsel %vm1010_vm1, %v1352_v30, 0.0  ;;  %v1691_v40 = vsel %vm1010_vm1, %v1436_v31, 0.0 }
 0x103   :  { %9673 = vst [vmem:[#allocation14_spill] sm:$0xff] %v5195_v37  ;;  %9674 = vst [vmem:[#allocation15_spill] sm:$0xff] %v5197_v38  ;;  %1517 = vadd.xlane.f32.xlu0 %v1516_v11  ;;  %1521 = vadd.xlane.f32.xlu1 %v1520_v25  ;;  %v5201_v41 = vpop.f32.mrb[7].mxu0  ;;  %v5203_v42 = vpop.f32.mrb[7].mxu1  ;;  %v5205_v43 = vadd.f32 %v1523_v39, %v1351_v29  ;;  %v5207_v44 = vadd.f32 %v1691_v40, %v1435_v36 }
 0x104   :  { %9675 = vst [vmem:[#allocation16_spill] sm:$0xff] %v5201_v41  ;;  %9676 = vst [vmem:[#allocation17_spill] sm:$0xff] %v5203_v42  ;;  %v1353_v45 = vmul.f32 %v5195_v37, %v5195_v37  ;;  %v1354_v46 = vmul.f32 %v5201_v41, %v5201_v41  ;;  %v1438_v47 = vmul.f32 %v5203_v42, %v5203_v42  ;;  %v1023_v48 = vsel %vm1010_vm1, %v5201_v41, 0.0 }
 0x105   :  { %v1191_v49 = vsel %vm1010_vm1, %v5203_v42, 0.0  ;;  %v1024_v50 = vadd.f32 %v1023_v48, %v5195_v37  ;;  %v1437_v52 = vmul.f32 %v5197_v38, %v5197_v38 }
 0x106   :  { %v1192_v51 = vadd.f32 %v1191_v49, %v5197_v38  ;;  %v5223_v53 = vpop.f32.mrb[8].mxu0  ;;  %v1527_v54 = vsel %vm1010_vm1, %v1354_v46, 0.0  ;;  %v5226_v55 = vpop.f32.mrb[8].mxu1  ;;  %v1695_v56 = vsel %vm1010_vm1, %v1438_v47, 0.0 }
 0x107   :  { %9677 = vst [vmem:[#allocation18_spill] sm:$0xff] %v5223_v53  ;;  %9678 = vst [vmem:[#allocation19_spill] sm:$0xff] %v5226_v55  ;;  %1685 = vadd.xlane.f32.xlu0 %v1684_v13  ;;  %1689 = vadd.xlane.f32.xlu1 %v1688_v27  ;;  %v5229_v61 = vpop.f32.mrb[9].mxu0  ;;  %v5231_v3 = vadd.f32 %v1527_v54, %v1353_v45  ;;  %v5233_v62 = vpop.f32.mrb[9].mxu1  ;;  %v5235_v63 = vadd.f32 %v1695_v56, %v1437_v52 }
 0x108   :  { %9679 = vst [vmem:[#allocation20_spill] sm:$0xff] %v5229_v61  ;;  %9680 = vst [vmem:[#allocation21_spill] sm:$0xff] %v5233_v62  ;;  %v1355_v0 = vmul.f32 %v5223_v53, %v5223_v53  ;;  %v1356_v1 = vmul.f32 %v5229_v61, %v5229_v61  ;;  %v1440_v2 = vmul.f32 %v5233_v62, %v5233_v62  ;;  %v1027_v4 = vsel %vm1010_vm1, %v5229_v61, 0.0 }
 0x109   :  { %v1195_v7 = vsel %vm1010_vm1, %v5233_v62, 0.0  ;;  %v5248_v8 = vadd.f32 %v1027_v4, %v5223_v53  ;;  %v1439_v12 = vmul.f32 %v5226_v55, %v5226_v55 }
 0x10a   :  { %v5251_v11 = vadd.f32 %v1195_v7, %v5226_v55  ;;  %v5255_v13 = vpop.f32.mrb[10].mxu0  ;;  %v5257_v14 = vpop.f32.mrb[10].mxu1  ;;  %v1531_v15 = vsel %vm1010_vm1, %v1356_v1, 0.0  ;;  %v1699_v16 = vsel %vm1010_vm1, %v1440_v2, 0.0 }
 0x10b   :  { %9681 = vst [vmem:[#allocation22_spill] sm:$0xff] %v5255_v13  ;;  %9682 = vst [vmem:[#allocation23_spill] sm:$0xff] %v5257_v14  ;;  %1017 = vadd.xlane.f32.xlu0 %v1016_v20  ;;  %1021 = vadd.xlane.f32.xlu1 %v1020_v34  ;;  %v5261_v17 = vpop.f32.mrb[11].mxu0  ;;  %v5263_v18 = vpop.f32.mrb[11].mxu1  ;;  %v5265_v19 = vadd.f32 %v1531_v15, %v1355_v0  ;;  %v5267_v21 = vadd.f32 %v1699_v16, %v1439_v12 }
 0x10c   :  { %9683 = vst [vmem:[#allocation24_spill] sm:$0xff] %v5261_v17  ;;  %9684 = vst [vmem:[#allocation25_spill] sm:$0xff] %v5263_v18  ;;  %v1357_v23 = vmul.f32 %v5255_v13, %v5255_v13  ;;  %v1358_v25 = vmul.f32 %v5261_v17, %v5261_v17  ;;  %v1442_v27 = vmul.f32 %v5263_v18, %v5263_v18  ;;  %v1031_v20 = vsel %vm1010_vm1, %v5261_v17, 0.0 }
 0x10d   :  { %v1199_v29 = vsel %vm1010_vm1, %v5263_v18, 0.0  ;;  %v5280_v30 = vadd.f32 %v1031_v20, %v5255_v13  ;;  %v1441_v32 = vmul.f32 %v5257_v14, %v5257_v14 }
 0x10e   :  { %v5283_v31 = vadd.f32 %v1199_v29, %v5257_v14  ;;  %v5287_v33 = vpop.f32.mrb[12].mxu0  ;;  %v1535_v34 = vsel %vm1010_vm1, %v1358_v25, 0.0  ;;  %v5290_v36 = vpop.f32.mrb[12].mxu1  ;;  %v1703_v39 = vsel %vm1010_vm1, %v1442_v27, 0.0 }
 0x10f   :  { %9685 = vst [vmem:[#allocation26_spill] sm:$0xff] %v5287_v33  ;;  %9686 = vst [vmem:[#allocation27_spill] sm:$0xff] %v5290_v36  ;;  %1189 = vadd.xlane.f32.xlu0 %v1188_v35  ;;  %1025 = vadd.xlane.f32.xlu1 %v1024_v50  ;;  %v5293_v40 = vpop.f32.mrb[13].mxu0  ;;  %v5295_v45 = vadd.f32 %v1535_v34, %v1357_v23  ;;  %v5297_v46 = vpop.f32.mrb[13].mxu1  ;;  %v5299_v47 = vadd.f32 %v1703_v39, %v1441_v32 }
 0x110   :  { %9687 = vst [vmem:[#allocation28_spill] sm:$0xff] %v5293_v40  ;;  %9688 = vst [vmem:[#allocation29_spill] sm:$0xff] %v5297_v46  ;;  %v1359_v48 = vmul.f32 %v5287_v33, %v5287_v33  ;;  %v1360_v49 = vmul.f32 %v5293_v40, %v5293_v40  ;;  %v1444_v52 = vmul.f32 %v5297_v46, %v5297_v46  ;;  %v1035_v35 = vsel %vm1010_vm1, %v5293_v40, 0.0 }
 0x111   :  { %v1203_v50 = vsel %vm1010_vm1, %v5297_v46, 0.0  ;;  %v5312_v54 = vadd.f32 %v1035_v35, %v5287_v33  ;;  %v1443_v0 = vmul.f32 %v5290_v36, %v5290_v36 }
 0x112   :  { %v5315_v56 = vadd.f32 %v1203_v50, %v5290_v36  ;;  %v5319_v1 = vpop.f32.mrb[14].mxu0  ;;  %v5321_v2 = vpop.f32.mrb[14].mxu1  ;;  %v1539_v4 = vsel %vm1010_vm1, %v1360_v49, 0.0  ;;  %v1707_v7 = vsel %vm1010_vm1, %v1444_v52, 0.0 }
 0x113   :  { %9689 = vst [vmem:[#allocation30_spill] sm:$0xff] %v5319_v1  ;;  %9690 = vst [vmem:[#allocation31_spill] sm:$0xff] %v5321_v2  ;;  %1525 = vadd.xlane.f32.xlu0 %v5205_v43  ;;  %1193 = vadd.xlane.f32.xlu1 %v1192_v51  ;;  %v5326_v12 = vpop.f32.mrb[15].mxu0  ;;  %v5328_v15 = vpop.f32.mrb[15].mxu1  ;;  %v5330_v16 = vadd.f32 %v1539_v4, %v1359_v48  ;;  %v5332_v23 = vadd.f32 %v1707_v7, %v1443_v0 }
 0x114   :  { %9691 = vst [vmem:[#allocation32_spill] sm:$0xff] %v5326_v12  ;;  %9692 = vst [vmem:[#allocation33_spill] sm:$0xff] %v5328_v15  ;;  %v1361_v25 = vmul.f32 %v5319_v1, %v5319_v1  ;;  %v1362_v27 = vmul.f32 %v5326_v12, %v5326_v12  ;;  %v1446_v20 = vmul.f32 %v5328_v15, %v5328_v15  ;;  %v1039_v43 = vsel %vm1010_vm1, %v5326_v12, 0.0 }
 0x115   :  { %v1207_v51 = vsel %vm1010_vm1, %v5328_v15, 0.0  ;;  %v5345_v29 = vadd.f32 %v1039_v43, %v5319_v1  ;;  %v1445_v34 = vmul.f32 %v5321_v2, %v5321_v2 }
 0x116   :  { %v5348_v32 = vadd.f32 %v1207_v51, %v5321_v2  ;;  %v5352_v39 = vpop.f32.mrb[16].mxu0  ;;  %v1543_v48 = vsel %vm1010_vm1, %v1362_v27, 0.0  ;;  %v5355_v49 = vpop.f32.mrb[16].mxu1  ;;  %v1711_v52 = vsel %vm1010_vm1, %v1446_v20, 0.0 }
 0x117   :  { %9693 = vst [vmem:[#allocation34_spill] sm:$0xff] %v5352_v39  ;;  %9694 = vst [vmem:[#allocation35_spill] sm:$0xff] %v5355_v49  ;;  %1693 = vadd.xlane.f32.xlu0 %v5207_v44  ;;  %1529 = vadd.xlane.f32.xlu1 %v5231_v3  ;;  %v5360_v35 = vpop.f32.mrb[17].mxu0  ;;  %v5362_v50 = vadd.f32 %v1543_v48, %v1361_v25  ;;  %v5364_v0 = vpop.f32.mrb[17].mxu1  ;;  %v5366_v4 = vadd.f32 %v1711_v52, %v1445_v34 }
 0x118   :  { %9695 = vst [vmem:[#allocation36_spill] sm:$0xff] %v5360_v35  ;;  %9696 = vst [vmem:[#allocation37_spill] sm:$0xff] %v5364_v0  ;;  %v1363_v7 = vmul.f32 %v5352_v39, %v5352_v39  ;;  %v1364_v27 = vmul.f32 %v5360_v35, %v5360_v35  ;;  %v1448_v20 = vmul.f32 %v5364_v0, %v5364_v0  ;;  %v1043_v44 = vsel %vm1010_vm1, %v5360_v35, 0.0 }
 0x119   :  { %v1211_v3 = vsel %vm1010_vm1, %v5364_v0, 0.0  ;;  %v5379_v25 = vadd.f32 %v1043_v44, %v5352_v39  ;;  %v1447_v51 = vmul.f32 %v5355_v49, %v5355_v49 }
 0x11a   :  { %v5382_v43 = vadd.f32 %v1211_v3, %v5355_v49  ;;  %v5386_v34 = vpop.f32.mrb[18].mxu0  ;;  %v5388_v48 = vpop.f32.mrb[18].mxu1  ;;  %v1547_v52 = vsel %vm1010_vm1, %v1364_v27, 0.0  ;;  %v1715_v46 = vsel %vm1010_vm1, %v1448_v20, 0.0 }
 0x11b   :  { %9697 = vst [vmem:[#allocation38_spill] sm:$0xff] %v5386_v34  ;;  %9698 = vst [vmem:[#allocation39_spill] sm:$0xff] %v5388_v48  ;;  %1697 = vadd.xlane.f32.xlu1 %v5235_v63  ;;  %1029 = vadd.xlane.f32.xlu0 %v5248_v8  ;;  %v5394_v44 = vpop.f32.mrb[19].mxu0  ;;  %v5396_v0 = vpop.f32.mrb[19].mxu1  ;;  %v5398_v3 = vadd.f32 %v1547_v52, %v1363_v7  ;;  %v5400_v36 = vadd.f32 %v1715_v46, %v1447_v51 }
 0x11c   :  { %9699 = vst [vmem:[#allocation40_spill] sm:$0xff] %v5394_v44  ;;  %9700 = vst [vmem:[#allocation41_spill] sm:$0xff] %v5396_v0  ;;  %v1365_v49 = vmul.f32 %v5386_v34, %v5386_v34  ;;  %v1366_v27 = vmul.f32 %v5394_v44, %v5394_v44  ;;  %v1450_v20 = vmul.f32 %v5396_v0, %v5396_v0  ;;  %v1047_v63 = vsel %vm1010_vm1, %v5394_v44, 0.0 }
 0x11d   :  { %v1215_v8 = vsel %vm1010_vm1, %v5396_v0, 0.0  ;;  %v5413_v7 = vadd.f32 %v1047_v63, %v5386_v34  ;;  %v1449_v51 = vmul.f32 %v5388_v48, %v5388_v48 }
 0x11e   :  { %v5416_v46 = vadd.f32 %v1215_v8, %v5388_v48  ;;  %v5420_v52 = vpop.f32.mrb[20].mxu0  ;;  %v1551_v62 = vsel %vm1010_vm1, %v1366_v27, 0.0  ;;  %v5423_v55 = vpop.f32.mrb[20].mxu1  ;;  %v1719_v28 = vsel %vm1010_vm1, %v1450_v20, 0.0 }
 0x11f   :  { %9701 = vst [vmem:[#allocation42_spill] sm:$0xff] %v5420_v52  ;;  %9702 = vst [vmem:[#allocation43_spill] sm:$0xff] %v5423_v55  ;;  %1197 = vadd.xlane.f32.xlu0 %v5251_v11  ;;  %1033 = vadd.xlane.f32.xlu1 %v5280_v30  ;;  %v5428_v63 = vpop.f32.mrb[21].mxu0  ;;  %v5430_v24 = vadd.f32 %v1551_v62, %v1365_v49  ;;  %v5432_v8 = vpop.f32.mrb[21].mxu1  ;;  %v5434_v60 = vadd.f32 %v1719_v28, %v1449_v51 }
 0x120   :  { %9703 = vst [vmem:[#allocation44_spill] sm:$0xff] %v5428_v63  ;;  %9704 = vst [vmem:[#allocation45_spill] sm:$0xff] %v5432_v8  ;;  %v1367_v58 = vmul.f32 %v5420_v52, %v5420_v52  ;;  %v1368_v27 = vmul.f32 %v5428_v63, %v5428_v63  ;;  %v1452_v20 = vmul.f32 %v5432_v8, %v5432_v8  ;;  %v1051_v11 = vsel %vm1010_vm1, %v5428_v63, 0.0 }
 0x121   :  { %v1219_v62 = vsel %vm1010_vm1, %v5432_v8, 0.0  ;;  %v5447_v30 = vadd.f32 %v1051_v11, %v5420_v52  ;;  %v1451_v49 = vmul.f32 %v5423_v55, %v5423_v55 }
 0x122   :  { %v5450_v28 = vadd.f32 %v1219_v62, %v5423_v55  ;;  %v5454_v51 = vpop.f32.mrb[22].mxu0  ;;  %v5456_v0 = vpop.f32.mrb[22].mxu1  ;;  %v1555_v48 = vsel %vm1010_vm1, %v1368_v27, 0.0  ;;  %v1723_v15 = vsel %vm1010_vm1, %v1452_v20, 0.0 }
 0x123   :  { %9705 = vst [vmem:[#allocation46_spill] sm:$0xff] %v5454_v51  ;;  %9706 = vst [vmem:[#allocation47_spill] sm:$0xff] %v5456_v0  ;;  %1533 = vadd.xlane.f32.xlu0 %v5265_v19  ;;  %1201 = vadd.xlane.f32.xlu1 %v5283_v31  ;;  %v5462_v11 = vpop.f32.mrb[23].mxu0  ;;  %v5464_v8 = vpop.f32.mrb[23].mxu1  ;;  %v5466_v62 = vadd.f32 %v1555_v48, %v1367_v58  ;;  %v5468_v2 = vadd.f32 %v1723_v15, %v1451_v49 }
 0x124   :  { %9707 = vst [vmem:[#allocation48_spill] sm:$0xff] %v5462_v11  ;;  %9708 = vst [vmem:[#allocation49_spill] sm:$0xff] %v5464_v8  ;;  %v1369_v55 = vmul.f32 %v5454_v51, %v5454_v51  ;;  %v1370_v27 = vmul.f32 %v5462_v11, %v5462_v11  ;;  %v1454_v20 = vmul.f32 %v5464_v8, %v5464_v8  ;;  %v1055_v19 = vsel %vm1010_vm1, %v5462_v11, 0.0 }
 0x125   :  { %v1223_v31 = vsel %vm1010_vm1, %v5464_v8, 0.0  ;;  %v5481_v58 = vadd.f32 %v1055_v19, %v5454_v51  ;;  %v1453_v48 = vmul.f32 %v5456_v0, %v5456_v0 }
 0x126   :  { %v5484_v15 = vadd.f32 %v1223_v31, %v5456_v0  ;;  %v5488_v49 = vpop.f32.mrb[24].mxu0  ;;  %v1559_v18 = vsel %vm1010_vm1, %v1370_v27, 0.0  ;;  %v5491_v14 = vpop.f32.mrb[24].mxu1  ;;  %v1727_v42 = vsel %vm1010_vm1, %v1454_v20, 0.0 }
 0x127   :  { %9709 = vst [vmem:[#allocation50_spill] sm:$0xff] %v5488_v49  ;;  %9710 = vst [vmem:[#allocation51_spill] sm:$0xff] %v5491_v14  ;;  %1701 = vadd.xlane.f32.xlu0 %v5267_v21  ;;  %1537 = vadd.xlane.f32.xlu1 %v5295_v45  ;;  %v5496_v19 = vpop.f32.mrb[25].mxu0  ;;  %v5498_v8 = vadd.f32 %v1559_v18, %v1369_v55  ;;  %v5500_v31 = vpop.f32.mrb[25].mxu1  ;;  %v5502_v38 = vadd.f32 %v1727_v42, %v1453_v48 }
 0x128   :  { %9711 = vst [vmem:[#allocation52_spill] sm:$0xff] %v5496_v19  ;;  %9712 = vst [vmem:[#allocation53_spill] sm:$0xff] %v5500_v31  ;;  %v1371_v0 = vmul.f32 %v5488_v49, %v5488_v49  ;;  %v1372_v27 = vmul.f32 %v5496_v19, %v5496_v19  ;;  %v1456_v20 = vmul.f32 %v5500_v31, %v5500_v31  ;;  %v1059_v21 = vsel %vm1010_vm1, %v5496_v19, 0.0 }
 0x129   :  { %v1227_v55 = vsel %vm1010_vm1, %v5500_v31, 0.0  ;;  %v5515_v18 = vadd.f32 %v1059_v21, %v5488_v49  ;;  %v1455_v45 = vmul.f32 %v5491_v14, %v5491_v14 }
 0x12a   :  { %v5518_v42 = vadd.f32 %v1227_v55, %v5491_v14  ;;  %v5522_v48 = vpop.f32.mrb[26].mxu0  ;;  %v5524_v9 = vpop.f32.mrb[26].mxu1  ;;  %v1563_v6 = vsel %vm1010_vm1, %v1372_v27, 0.0  ;;  %v1731_v19 = vsel %vm1010_vm1, %v1456_v20, 0.0 }
 0x12b   :  { %9713 = vst [vmem:[#allocation54_spill] sm:$0xff] %v5522_v48  ;;  %9714 = vst [vmem:[#allocation55_spill] sm:$0xff] %v5524_v9  ;;  %1705 = vadd.xlane.f32.xlu1 %v5299_v47  ;;  %1037 = vadd.xlane.f32.xlu0 %v5312_v54  ;;  %v5530_v21 = vpop.f32.mrb[27].mxu0  ;;  %v5532_v31 = vpop.f32.mrb[27].mxu1  ;;  %v5534_v55 = vadd.f32 %v1563_v6, %v1371_v0  ;;  %v5536_v49 = vadd.f32 %v1731_v19, %v1455_v45 }
 0x12c   :  { %9715 = vst [vmem:[#allocation56_spill] sm:$0xff] %v5530_v21  ;;  %9716 = vst [vmem:[#allocation57_spill] sm:$0xff] %v5532_v31  ;;  %v1373_v14 = vmul.f32 %v5522_v48, %v5522_v48  ;;  %v1374_v27 = vmul.f32 %v5530_v21, %v5530_v21  ;;  %v1458_v20 = vmul.f32 %v5532_v31, %v5532_v31  ;;  %v1063_v47 = vsel %vm1010_vm1, %v5530_v21, 0.0 }
 0x12d   :  { %v1231_v54 = vsel %vm1010_vm1, %v5532_v31, 0.0  ;;  %v5549_v6 = vadd.f32 %v1063_v47, %v5522_v48  ;;  %v1457_v19 = vmul.f32 %v5524_v9, %v5524_v9 }
 0x12e   :  { %v5552_v0 = vadd.f32 %v1231_v54, %v5524_v9  ;;  %v5556_v45 = vpop.f32.mrb[28].mxu0  ;;  %v1567_v63 = vsel %vm1010_vm1, %v1374_v27, 0.0  ;;  %v5559_v52 = vpop.f32.mrb[28].mxu1  ;;  %v1735_v35 = vsel %vm1010_vm1, %v1458_v20, 0.0 }
 0x12f   :  { %9717 = vst [vmem:[#allocation58_spill] sm:$0xff] %v5556_v45  ;;  %9718 = vst [vmem:[#allocation59_spill] sm:$0xff] %v5559_v52  ;;  %1205 = vadd.xlane.f32.xlu0 %v5315_v56  ;;  %1041 = vadd.xlane.f32.xlu1 %v5345_v29  ;;  %v5564_v47 = vpop.f32.mrb[29].mxu0  ;;  %v5566_v31 = vadd.f32 %v1567_v63, %v1373_v14  ;;  %v5568_v54 = vpop.f32.mrb[29].mxu1  ;;  %v5570_v39 = vadd.f32 %v1735_v35, %v1457_v19 }
 0x130   :  { %9719 = vst [vmem:[#allocation60_spill] sm:$0xff] %v5564_v47  ;;  %9720 = vst [vmem:[#allocation61_spill] sm:$0xff] %v5568_v54  ;;  %v1375_v9 = vmul.f32 %v5556_v45, %v5556_v45  ;;  %v1376_v27 = vmul.f32 %v5564_v47, %v5564_v47  ;;  %v1460_v20 = vmul.f32 %v5568_v54, %v5568_v54  ;;  %v1067_v56 = vsel %vm1010_vm1, %v5564_v47, 0.0 }
 0x131   :  { %v1235_v14 = vsel %vm1010_vm1, %v5568_v54, 0.0  ;;  %v5583_v29 = vadd.f32 %v1067_v56, %v5556_v45  ;;  %v1459_v63 = vmul.f32 %v5559_v52, %v5559_v52 }
 0x132   :  { %v5586_v35 = vadd.f32 %v1235_v14, %v5559_v52  ;;  %v5590_v19 = vpop.f32.mrb[30].mxu0  ;;  %v5592_v40 = vpop.f32.mrb[30].mxu1  ;;  %v1571_v33 = vsel %vm1010_vm1, %v1376_v27, 0.0  ;;  %v1739_v47 = vsel %vm1010_vm1, %v1460_v20, 0.0 }
 0x133   :  { %9721 = vst [vmem:[#allocation62_spill] sm:$0xff] %v5590_v19  ;;  %9722 = vst [vmem:[#allocation63_spill] sm:$0xff] %v5592_v40  ;;  %1541 = vadd.xlane.f32.xlu0 %v5330_v16  ;;  %1209 = vadd.xlane.f32.xlu1 %v5348_v32  ;;  %v5598_v56 = vpop.f32.mrb[31].mxu0  ;;  %v5600_v54 = vpop.f32.mrb[31].mxu1  ;;  %v5602_v14 = vadd.f32 %v1571_v33, %v1375_v9  ;;  %v5604_v45 = vadd.f32 %v1739_v47, %v1459_v63 }
 0x134   :  { %9723 = vst [vmem:[#allocation64_spill] sm:$0xff] %v5598_v56  ;;  %9724 = vst [vmem:[#allocation65_spill] sm:$0xff] %v5600_v54  ;;  %v1377_v52 = vmul.f32 %v5590_v19, %v5590_v19  ;;  %v1378_v27 = vmul.f32 %v5598_v56, %v5598_v56  ;;  %v1462_v20 = vmul.f32 %v5600_v54, %v5600_v54  ;;  %v1071_v16 = vsel %vm1010_vm1, %v5598_v56, 0.0 }
 0x135   :  { %v1239_v32 = vsel %vm1010_vm1, %v5600_v54, 0.0  ;;  %v5617_v9 = vadd.f32 %v1071_v16, %v5590_v19  ;;  %v1461_v47 = vmul.f32 %v5592_v40, %v5592_v40 }
 0x136   :  { %v5620_v33 = vadd.f32 %v1239_v32, %v5592_v40  ;;  %v5624_v63 = vpop.f32.mrb[32].mxu0  ;;  %v1575_v12 = vsel %vm1010_vm1, %v1378_v27, 0.0  ;;  %v5627_v1 = vpop.f32.mrb[32].mxu1  ;;  %v1743_v61 = vsel %vm1010_vm1, %v1462_v20, 0.0 }
 0x137   :  { %9725 = vst [vmem:[#allocation66_spill] sm:$0xff] %v5624_v63  ;;  %9726 = vst [vmem:[#allocation67_spill] sm:$0xff] %v5627_v1  ;;  %1709 = vadd.xlane.f32.xlu0 %v5332_v23  ;;  %1545 = vadd.xlane.f32.xlu1 %v5362_v50  ;;  %v5632_v16 = vpop.f32.mrb[33].mxu0  ;;  %v5634_v54 = vadd.f32 %v1575_v12, %v1377_v52  ;;  %v5636_v32 = vpop.f32.mrb[33].mxu1  ;;  %v5638_v53 = vadd.f32 %v1743_v61, %v1461_v47 }
 0x138   :  { %9727 = vst [vmem:[#allocation68_spill] sm:$0xff] %v5632_v16  ;;  %9728 = vst [vmem:[#allocation69_spill] sm:$0xff] %v5636_v32  ;;  %v1379_v40 = vmul.f32 %v5624_v63, %v5624_v63  ;;  %v1380_v27 = vmul.f32 %v5632_v16, %v5632_v16  ;;  %v1464_v20 = vmul.f32 %v5636_v32, %v5636_v32  ;;  %v1075_v23 = vsel %vm1010_vm1, %v5632_v16, 0.0 }
 0x139   :  { %v1243_v12 = vsel %vm1010_vm1, %v5636_v32, 0.0  ;;  %v5651_v50 = vadd.f32 %v1075_v23, %v5624_v63  ;;  %v1463_v52 = vmul.f32 %v5627_v1, %v5627_v1 }
 0x13a   :  { %v5654_v61 = vadd.f32 %v1243_v12, %v5627_v1  ;;  %v5658_v47 = vpop.f32.mrb[34].mxu0  ;;  %v5660_v17 = vpop.f32.mrb[34].mxu1  ;;  %v1579_v13 = vsel %vm1010_vm1, %v1380_v27, 0.0  ;;  %v1747_v16 = vsel %vm1010_vm1, %v1464_v20, 0.0 }
 0x13b   :  { %9729 = vst [vmem:[#allocation70_spill] sm:$0xff] %v5658_v47  ;;  %9730 = vst [vmem:[#allocation71_spill] sm:$0xff] %v5660_v17  ;;  %1713 = vadd.xlane.f32.xlu1 %v5366_v4  ;;  %1045 = vadd.xlane.f32.xlu0 %v5379_v25  ;;  %v5666_v23 = vpop.f32.mrb[35].mxu0  ;;  %v5668_v32 = vpop.f32.mrb[35].mxu1  ;;  %v5670_v12 = vadd.f32 %v1579_v13, %v1379_v40  ;;  %v5672_v63 = vadd.f32 %v1747_v16, %v1463_v52 }
 0x13c   :  { %9731 = vst [vmem:[#allocation72_spill] sm:$0xff] %v5666_v23  ;;  %9732 = vst [vmem:[#allocation73_spill] sm:$0xff] %v5668_v32  ;;  %v1381_v1 = vmul.f32 %v5658_v47, %v5658_v47  ;;  %v1382_v27 = vmul.f32 %v5666_v23, %v5666_v23  ;;  %v1466_v20 = vmul.f32 %v5668_v32, %v5668_v32  ;;  %v1079_v4 = vsel %vm1010_vm1, %v5666_v23, 0.0 }
 0x13d   :  { %v1247_v25 = vsel %vm1010_vm1, %v5668_v32, 0.0  ;;  %v5685_v13 = vadd.f32 %v1079_v4, %v5658_v47  ;;  %v1465_v16 = vmul.f32 %v5660_v17, %v5660_v17 }
 0x13e   :  { %v5688_v40 = vadd.f32 %v1247_v25, %v5660_v17  ;;  %v5692_v52 = vpop.f32.mrb[36].mxu0  ;;  %v1583_v56 = vsel %vm1010_vm1, %v1382_v27, 0.0  ;;  %v5695_v19 = vpop.f32.mrb[36].mxu1  ;;  %v1751_v23 = vsel %vm1010_vm1, %v1466_v20, 0.0 }
 0x13f   :  { %9733 = vst [vmem:[#allocation74_spill] sm:$0xff] %v5692_v52  ;;  %9734 = vst [vmem:[#allocation75_spill] sm:$0xff] %v5695_v19  ;;  %1213 = vadd.xlane.f32.xlu0 %v5382_v43  ;;  %1049 = vadd.xlane.f32.xlu1 %v5413_v7  ;;  %v5700_v4 = vpop.f32.mrb[37].mxu0  ;;  %v5702_v32 = vadd.f32 %v1583_v56, %v1381_v1  ;;  %v5704_v25 = vpop.f32.mrb[37].mxu1  ;;  %v5706_v47 = vadd.f32 %v1751_v23, %v1465_v16 }
 0x140   :  { %9735 = vst [vmem:[#allocation76_spill] sm:$0xff] %v5700_v4  ;;  %9736 = vst [vmem:[#allocation77_spill] sm:$0xff] %v5704_v25  ;;  %v1383_v17 = vmul.f32 %v5692_v52, %v5692_v52  ;;  %v1384_v27 = vmul.f32 %v5700_v4, %v5700_v4  ;;  %v1468_v20 = vmul.f32 %v5704_v25, %v5704_v25  ;;  %v1083_v43 = vsel %vm1010_vm1, %v5700_v4, 0.0 }
 0x141   :  { %v1251_v1 = vsel %vm1010_vm1, %v5704_v25, 0.0  ;;  %v5719_v7 = vadd.f32 %v1083_v43, %v5692_v52  ;;  %v1467_v23 = vmul.f32 %v5695_v19, %v5695_v19 }
 0x142   :  { %v5722_v56 = vadd.f32 %v1251_v1, %v5695_v19  ;;  %v5726_v16 = vpop.f32.mrb[38].mxu0  ;;  %v5728_v26 = vpop.f32.mrb[38].mxu1  ;;  %v1587_v22 = vsel %vm1010_vm1, %v1384_v27, 0.0  ;;  %v1755_v4 = vsel %vm1010_vm1, %v1468_v20, 0.0 }
 0x143   :  { %9737 = vst [vmem:[#allocation78_spill] sm:$0xff] %v5726_v16  ;;  %9738 = vst [vmem:[#allocation79_spill] sm:$0xff] %v5728_v26  ;;  %1549 = vadd.xlane.f32.xlu0 %v5398_v3  ;;  %1217 = vadd.xlane.f32.xlu1 %v5416_v46  ;;  %v5734_v43 = vpop.f32.mrb[39].mxu0  ;;  %v5736_v25 = vpop.f32.mrb[39].mxu1  ;;  %v5738_v1 = vadd.f32 %v1587_v22, %v1383_v17  ;;  %v5740_v52 = vadd.f32 %v1755_v4, %v1467_v23 }
 0x144   :  { %9739 = vst [vmem:[#allocation80_spill] sm:$0xff] %v5734_v43  ;;  %9740 = vst [vmem:[#allocation81_spill] sm:$0xff] %v5736_v25  ;;  %v1385_v19 = vmul.f32 %v5726_v16, %v5726_v16  ;;  %v1386_v27 = vmul.f32 %v5734_v43, %v5734_v43  ;;  %v1470_v20 = vmul.f32 %v5736_v25, %v5736_v25  ;;  %v1087_v3 = vsel %vm1010_vm1, %v5734_v43, 0.0 }
 0x145   :  { %v1255_v46 = vsel %vm1010_vm1, %v5736_v25, 0.0  ;;  %v5753_v22 = vadd.f32 %v1087_v3, %v5726_v16  ;;  %v1469_v4 = vmul.f32 %v5728_v26, %v5728_v26 }
 0x146   :  { %v5756_v17 = vadd.f32 %v1255_v46, %v5728_v26  ;;  %v5760_v23 = vpop.f32.mrb[40].mxu0  ;;  %v1591_v21 = vsel %vm1010_vm1, %v1386_v27, 0.0  ;;  %v5763_v48 = vpop.f32.mrb[40].mxu1  ;;  %v1759_v43 = vsel %vm1010_vm1, %v1470_v20, 0.0 }
 0x147   :  { %9741 = vst [vmem:[#allocation82_spill] sm:$0xff] %v5760_v23  ;;  %9742 = vst [vmem:[#allocation83_spill] sm:$0xff] %v5763_v48  ;;  %1717 = vadd.xlane.f32.xlu0 %v5400_v36  ;;  %1553 = vadd.xlane.f32.xlu1 %v5430_v24  ;;  %v5768_v3 = vpop.f32.mrb[41].mxu0  ;;  %v5770_v25 = vadd.f32 %v1591_v21, %v1385_v19  ;;  %v5772_v46 = vpop.f32.mrb[41].mxu1  ;;  %v5774_v16 = vadd.f32 %v1759_v43, %v1469_v4 }
 0x148   :  { %9743 = vst [vmem:[#allocation84_spill] sm:$0xff] %v5768_v3  ;;  %9744 = vst [vmem:[#allocation85_spill] sm:$0xff] %v5772_v46  ;;  %v1387_v26 = vmul.f32 %v5760_v23, %v5760_v23  ;;  %v1388_v27 = vmul.f32 %v5768_v3, %v5768_v3  ;;  %v1472_v20 = vmul.f32 %v5772_v46, %v5772_v46  ;;  %v1091_v24 = vsel %vm1010_vm1, %v5768_v3, 0.0 }
 0x149   :  { %v1259_v36 = vsel %vm1010_vm1, %v5772_v46, 0.0  ;;  %v5787_v21 = vadd.f32 %v1091_v24, %v5760_v23  ;;  %v1471_v43 = vmul.f32 %v5763_v48, %v5763_v48 }
 0x14a   :  { %v5790_v19 = vadd.f32 %v1259_v36, %v5763_v48  ;;  %v5794_v4 = vpop.f32.mrb[42].mxu0  ;;  %v5796_v41 = vpop.f32.mrb[42].mxu1  ;;  %v1595_v37 = vsel %vm1010_vm1, %v1388_v27, 0.0  ;;  %v1763_v3 = vsel %vm1010_vm1, %v1472_v20, 0.0 }
 0x14b   :  { %9745 = vst [vmem:[#allocation86_spill] sm:$0xff] %v5794_v4  ;;  %9746 = vst [vmem:[#allocation87_spill] sm:$0xff] %v5796_v41  ;;  %1721 = vadd.xlane.f32.xlu1 %v5434_v60  ;;  %1053 = vadd.xlane.f32.xlu0 %v5447_v30  ;;  %v5802_v24 = vpop.f32.mrb[43].mxu0  ;;  %v5804_v46 = vpop.f32.mrb[43].mxu1  ;;  %v5806_v36 = vadd.f32 %v1595_v37, %v1387_v26  ;;  %v5808_v23 = vadd.f32 %v1763_v3, %v1471_v43 }
 0x14c   :  { %9747 = vst [vmem:[#allocation88_spill] sm:$0xff] %v5802_v24  ;;  %9748 = vst [vmem:[#allocation89_spill] sm:$0xff] %v5804_v46  ;;  %v1389_v48 = vmul.f32 %v5794_v4, %v5794_v4  ;;  %v1390_v27 = vmul.f32 %v5802_v24, %v5802_v24  ;;  %v1474_v20 = vmul.f32 %v5804_v46, %v5804_v46  ;;  %v1095_v60 = vsel %vm1010_vm1, %v5802_v24, 0.0 }
 0x14d   :  { %v1263_v30 = vsel %vm1010_vm1, %v5804_v46, 0.0  ;;  %v5821_v26 = vadd.f32 %v1095_v60, %v5794_v4  ;;  %v1473_v3 = vmul.f32 %v5796_v41, %v5796_v41 }
 0x14e   :  { %v5824_v37 = vadd.f32 %v1263_v30, %v5796_v41  ;;  %v5828_v43 = vpop.f32.mrb[44].mxu0  ;;  %v1599_v11 = vsel %vm1010_vm1, %v1390_v27, 0.0  ;;  %v5831_v51 = vpop.f32.mrb[44].mxu1  ;;  %v1767_v24 = vsel %vm1010_vm1, %v1474_v20, 0.0 }
 0x14f   :  { %9749 = vst [vmem:[#allocation90_spill] sm:$0xff] %v5828_v43  ;;  %9750 = vst [vmem:[#allocation91_spill] sm:$0xff] %v5831_v51  ;;  %1221 = vadd.xlane.f32.xlu0 %v5450_v28  ;;  %1057 = vadd.xlane.f32.xlu1 %v5481_v58  ;;  %v5836_v60 = vpop.f32.mrb[45].mxu0  ;;  %v5838_v46 = vadd.f32 %v1599_v11, %v1389_v48  ;;  %v5840_v30 = vpop.f32.mrb[45].mxu1  ;;  %v5842_v4 = vadd.f32 %v1767_v24, %v1473_v3 }
 0x150   :  { %9751 = vst [vmem:[#allocation92_spill] sm:$0xff] %v5836_v60  ;;  %9752 = vst [vmem:[#allocation93_spill] sm:$0xff] %v5840_v30  ;;  %v1391_v41 = vmul.f32 %v5828_v43, %v5828_v43  ;;  %v1392_v27 = vmul.f32 %v5836_v60, %v5836_v60  ;;  %v1476_v20 = vmul.f32 %v5840_v30, %v5840_v30  ;;  %v1099_v28 = vsel %vm1010_vm1, %v5836_v60, 0.0 }
 0x151   :  { %v1267_v11 = vsel %vm1010_vm1, %v5840_v30, 0.0  ;;  %v5855_v58 = vadd.f32 %v1099_v28, %v5828_v43  ;;  %v1475_v24 = vmul.f32 %v5831_v51, %v5831_v51 }
 0x152   :  { %v5858_v48 = vadd.f32 %v1267_v11, %v5831_v51  ;;  %v5862_v3 = vpop.f32.mrb[46].mxu0  ;;  %v5864_v59 = vpop.f32.mrb[46].mxu1  ;;  %v1603_v57 = vsel %vm1010_vm1, %v1392_v27, 0.0  ;;  %v1771_v60 = vsel %vm1010_vm1, %v1476_v20, 0.0 }
 0x153   :  { %9753 = vst [vmem:[#allocation94_spill] sm:$0xff] %v5862_v3  ;;  %9754 = vst [vmem:[#allocation95_spill] sm:$0xff] %v5864_v59  ;;  %1557 = vadd.xlane.f32.xlu0 %v5466_v62  ;;  %1225 = vadd.xlane.f32.xlu1 %v5484_v15  ;;  %v5870_v28 = vpop.f32.mrb[47].mxu0  ;;  %v5872_v30 = vpop.f32.mrb[47].mxu1  ;;  %v5874_v11 = vadd.f32 %v1603_v57, %v1391_v41  ;;  %v5876_v43 = vadd.f32 %v1771_v60, %v1475_v24 }
 0x154   :  { %9755 = vst [vmem:[#allocation96_spill] sm:$0xff] %v5870_v28  ;;  %9756 = vst [vmem:[#allocation97_spill] sm:$0xff] %v5872_v30  ;;  %v1393_v51 = vmul.f32 %v5862_v3, %v5862_v3  ;;  %v1394_v27 = vmul.f32 %v5870_v28, %v5870_v28  ;;  %v1478_v20 = vmul.f32 %v5872_v30, %v5872_v30  ;;  %v1103_v62 = vsel %vm1010_vm1, %v5870_v28, 0.0 }
 0x155   :  { %v1271_v15 = vsel %vm1010_vm1, %v5872_v30, 0.0  ;;  %v5889_v57 = vadd.f32 %v1103_v62, %v5862_v3  ;;  %v1477_v60 = vmul.f32 %v5864_v59, %v5864_v59 }
 0x156   :  { %v5892_v41 = vadd.f32 %v1271_v15, %v5864_v59  ;;  %v5896_v24 = vpop.f32.mrb[48].mxu0  ;;  %v1607_v10 = vsel %vm1010_vm1, %v1394_v27, 0.0  ;;  %v5899_v5 = vpop.f32.mrb[48].mxu1  ;;  %v1775_v28 = vsel %vm1010_vm1, %v1478_v20, 0.0 }
 0x157   :  { %9757 = vst [vmem:[#allocation98_spill] sm:$0xff] %v5896_v24  ;;  %9758 = vst [vmem:[#allocation99_spill] sm:$0xff] %v5899_v5  ;;  %1725 = vadd.xlane.f32.xlu0 %v5468_v2  ;;  %1561 = vadd.xlane.f32.xlu1 %v5498_v8  ;;  %v1395_v62 = vmul.f32 %v5896_v24, %v5896_v24  ;;  %v5906_v15 = vpop.f32.mrb[49].mxu0  ;;  %v5908_v30 = vadd.f32 %v1607_v10, %v1393_v51  ;;  %v5910_v59 = vpop.f32.mrb[49].mxu1 }
 0x158   :  { %9759 = vst [vmem:[#allocation100_spill] sm:$0xff] %v5906_v15  ;;  %9761 = vst [vmem:[#allocation102_spill] sm:$0xff] %v5910_v59  ;;  %v1396_v27 = vmul.f32 %v5906_v15, %v5906_v15  ;;  %v1275_v3 = vsel %vm1010_vm1, %v5910_v59, 0.0  ;;  %v1480_v2 = vmul.f32 %v5910_v59, %v5910_v59  ;;  %v5918_v20 = vadd.f32 %v1775_v28, %v1477_v60 }
 0x159   :  { %9760 = vst [vmem:[#allocation101_spill] sm:$0xff] %v5908_v30  ;;  %v1479_v8 = vmul.f32 %v5899_v5, %v5899_v5  ;;  %v1107_v10 = vsel %vm1010_vm1, %v5906_v15, 0.0  ;;  %v5925_v51 = vadd.f32 %v1275_v3, %v5899_v5 }
 0x15a   :  { %v5927_v44 = vpop.f32.mrb[50].mxu0  ;;  %v5930_v34 = vadd.f32 %v1107_v10, %v5896_v24  ;;  %v5932_v30 = vpop.f32.mrb[50].mxu1  ;;  %v1611_v59 = vsel %vm1010_vm1, %v1396_v27, 0.0  ;;  %v1779_v28 = vsel %vm1010_vm1, %v1480_v2, 0.0 }
 0x15b   :  { %9762 = vst [vmem:[#allocation103_spill] sm:$0xff] %v5925_v51  ;;  %9763 = vst [vmem:[#allocation104_spill] sm:$0xff] %v5927_v44  ;;  %1729 = vadd.xlane.f32.xlu1 %v5502_v38  ;;  %1061 = vadd.xlane.f32.xlu0 %v5515_v18  ;;  %v1397_v60 = vmul.f32 %v5927_v44, %v5927_v44  ;;  %v5940_v3 = vpop.f32.mrb[51].mxu0  ;;  %v5942_v5 = vpop.f32.mrb[51].mxu1  ;;  %v5944_v15 = vadd.f32 %v1611_v59, %v1395_v62 }
 0x15c   :  { %9764 = vst [vmem:[#allocation105_spill] sm:$0xff] %v5930_v34  ;;  %9765 = vst [vmem:[#allocation106_spill] sm:$0xff] %v5932_v30  ;;  %v1398_v10 = vmul.f32 %v5940_v3, %v5940_v3  ;;  %v1279_v27 = vsel %vm1010_vm1, %v5942_v5, 0.0  ;;  %v1482_v38 = vmul.f32 %v5942_v5, %v5942_v5  ;;  %v1111_v18 = vsel %vm1010_vm1, %v5940_v3, 0.0 }
 0x15d   :  { %9766 = vst [vmem:[#allocation107_spill] sm:$0xff] %v5940_v3  ;;  %9767 = vst [vmem:[#allocation108_spill] sm:$0xff] %v5942_v5  ;;  %v1481_v2 = vmul.f32 %v5932_v30, %v5932_v30  ;;  %v5957_v24 = vadd.f32 %v1111_v18, %v5927_v44  ;;  %v5960_v59 = vadd.f32 %v1279_v27, %v5932_v30 }
 0x15e   :  { %9768 = vst [vmem:[#allocation109_spill] sm:$0xff] %v5944_v15  ;;  %v5962_v62 = vadd.f32 %v1779_v28, %v1479_v8  ;;  %v5964_v15 = vpop.f32.mrb[52].mxu0  ;;  %v1615_v51 = vsel %vm1010_vm1, %v1398_v10, 0.0  ;;  %v5967_v34 = vpop.f32.mrb[52].mxu1  ;;  %v1783_v5 = vsel %vm1010_vm1, %v1482_v38, 0.0 }
 0x15f   :  { %9770 = vst [vmem:[#allocation111_spill] sm:$0xff] %v5964_v15  ;;  %9771 = vst [vmem:[#allocation112_spill] sm:$0xff] %v5967_v34  ;;  %1229 = vadd.xlane.f32.xlu0 %v5518_v42  ;;  %1065 = vadd.xlane.f32.xlu1 %v5549_v6  ;;  %v1399_v18 = vmul.f32 %v5964_v15, %v5964_v15  ;;  %v5974_v3 = vpop.f32.mrb[53].mxu0  ;;  %v5976_v27 = vadd.f32 %v1615_v51, %v1397_v60  ;;  %v5978_v8 = vpop.f32.mrb[53].mxu1 }
 0x160   :  { %9769 = vst [vmem:[#allocation110_spill] sm:$0xff] %v5962_v62  ;;  %9772 = vst [vmem:[#allocation113_spill] sm:$0xff] %v5974_v3  ;;  %v1115_v28 = vsel %vm1010_vm1, %v5974_v3, 0.0  ;;  %v1400_v10 = vmul.f32 %v5974_v3, %v5974_v3  ;;  %v1283_v42 = vsel %vm1010_vm1, %v5978_v8, 0.0  ;;  %v1484_v6 = vmul.f32 %v5978_v8, %v5978_v8 }
 0x161   :  { %9773 = vst [vmem:[#allocation114_spill] sm:$0xff] %v5976_v27  ;;  %9774 = vst [vmem:[#allocation115_spill] sm:$0xff] %v5978_v8  ;;  %v1483_v38 = vmul.f32 %v5967_v34, %v5967_v34  ;;  %v5990_v30 = vadd.f32 %v1783_v5, %v1481_v2  ;;  %v5993_v51 = vadd.f32 %v1115_v28, %v5964_v15 }
 0x162   :  { %v5996_v60 = vadd.f32 %v1283_v42, %v5967_v34  ;;  %v5998_v44 = vpop.f32.mrb[54].mxu0  ;;  %v6000_v3 = vpop.f32.mrb[54].mxu1  ;;  %v1619_v27 = vsel %vm1010_vm1, %v1400_v10, 0.0  ;;  %v1787_v62 = vsel %vm1010_vm1, %v1484_v6, 0.0 }
 0x163   :  { %9776 = vst [vmem:[#allocation117_spill] sm:$0xff] %v5998_v44  ;;  %9777 = vst [vmem:[#allocation118_spill] sm:$0xff] %v6000_v3  ;;  %1565 = vadd.xlane.f32.xlu0 %v5534_v55  ;;  %1233 = vadd.xlane.f32.xlu1 %v5552_v0  ;;  %v1401_v5 = vmul.f32 %v5998_v44, %v5998_v44  ;;  %v6008_v2 = vpop.f32.mrb[55].mxu0  ;;  %v6010_v28 = vpop.f32.mrb[55].mxu1  ;;  %v6012_v42 = vadd.f32 %v1619_v27, %v1399_v18 }
 0x164   :  { %9775 = vst [vmem:[#allocation116_spill] sm:$0xff] %v5996_v60  ;;  %9778 = vst [vmem:[#allocation119_spill] sm:$0xff] %v6008_v2  ;;  %v1119_v8 = vsel %vm1010_vm1, %v6008_v2, 0.0  ;;  %v1402_v10 = vmul.f32 %v6008_v2, %v6008_v2  ;;  %v1287_v55 = vsel %vm1010_vm1, %v6010_v28, 0.0  ;;  %v1486_v0 = vmul.f32 %v6010_v28, %v6010_v28 }
 0x165   :  { %9779 = vst [vmem:[#allocation120_spill] sm:$0xff] %v6010_v28  ;;  %9780 = vst [vmem:[#allocation121_spill] sm:$0xff] %v6012_v42  ;;  %v1485_v6 = vmul.f32 %v6000_v3, %v6000_v3  ;;  %v6025_v34 = vadd.f32 %v1119_v8, %v5998_v44  ;;  %v6028_v18 = vadd.f32 %v1287_v55, %v6000_v3 }
 0x166   :  { %v6030_v27 = vadd.f32 %v1787_v62, %v1483_v38  ;;  %v6032_v15 = vpop.f32.mrb[56].mxu0  ;;  %v1623_v2 = vsel %vm1010_vm1, %v1402_v10, 0.0  ;;  %v6035_v42 = vpop.f32.mrb[56].mxu1  ;;  %v1791_v60 = vsel %vm1010_vm1, %v1486_v0, 0.0 }
 0x167   :  { %9782 = vst [vmem:[#allocation123_spill] sm:$0xff] %v6032_v15  ;;  %9783 = vst [vmem:[#allocation124_spill] sm:$0xff] %v6035_v42  ;;  %1733 = vadd.xlane.f32.xlu0 %v5536_v49  ;;  %1569 = vadd.xlane.f32.xlu1 %v5566_v31  ;;  %v1403_v8 = vmul.f32 %v6032_v15, %v6032_v15  ;;  %v6042_v28 = vpop.f32.mrb[57].mxu0  ;;  %v6044_v55 = vadd.f32 %v1623_v2, %v1401_v5  ;;  %v6046_v62 = vpop.f32.mrb[57].mxu1 }
 0x168   :  { %9781 = vst [vmem:[#allocation122_spill] sm:$0xff] %v6030_v27  ;;  %9784 = vst [vmem:[#allocation125_spill] sm:$0xff] %v6042_v28  ;;  %v1123_v38 = vsel %vm1010_vm1, %v6042_v28, 0.0  ;;  %v1404_v10 = vmul.f32 %v6042_v28, %v6042_v28  ;;  %v1291_v49 = vsel %vm1010_vm1, %v6046_v62, 0.0  ;;  %v1488_v31 = vmul.f32 %v6046_v62, %v6046_v62 }
 0x169   :  { %9785 = vst [vmem:[#allocation126_spill] sm:$0xff] %v6044_v55  ;;  %9786 = vst [vmem:[#allocation127_spill] sm:$0xff] %v6046_v62  ;;  %v1487_v0 = vmul.f32 %v6035_v42, %v6035_v42  ;;  %v6058_v3 = vadd.f32 %v1791_v60, %v1485_v6  ;;  %v6061_v5 = vadd.f32 %v1123_v38, %v6032_v15 }
 0x16a   :  { %v6064_v2 = vadd.f32 %v1291_v49, %v6035_v42  ;;  %v6066_v44 = vpop.f32.mrb[58].mxu0  ;;  %v6068_v28 = vpop.f32.mrb[58].mxu1  ;;  %v1627_v55 = vsel %vm1010_vm1, %v1404_v10, 0.0  ;;  %v1795_v27 = vsel %vm1010_vm1, %v1488_v31, 0.0 }
 0x16b   :  { %9788 = vst [vmem:[#allocation129_spill] sm:$0xff] %v6066_v44  ;;  %9789 = vst [vmem:[#allocation130_spill] sm:$0xff] %v6068_v28  ;;  %1737 = vadd.xlane.f32.xlu1 %v5570_v39  ;;  %1069 = vadd.xlane.f32.xlu0 %v5583_v29  ;;  %v1405_v60 = vmul.f32 %v6066_v44, %v6066_v44  ;;  %v6076_v6 = vpop.f32.mrb[59].mxu0  ;;  %v6078_v38 = vpop.f32.mrb[59].mxu1  ;;  %v6080_v49 = vadd.f32 %v1627_v55, %v1403_v8 }
 0x16c   :  { %9787 = vst [vmem:[#allocation128_spill] sm:$0xff] %v6064_v2  ;;  %9790 = vst [vmem:[#allocation131_spill] sm:$0xff] %v6076_v6  ;;  %v1127_v15 = vsel %vm1010_vm1, %v6076_v6, 0.0  ;;  %v1406_v10 = vmul.f32 %v6076_v6, %v6076_v6  ;;  %v1295_v39 = vsel %vm1010_vm1, %v6078_v38, 0.0  ;;  %v1490_v29 = vmul.f32 %v6078_v38, %v6078_v38 }
 0x16d   :  { %9791 = vst [vmem:[#allocation132_spill] sm:$0xff] %v6078_v38  ;;  %9792 = vst [vmem:[#allocation133_spill] sm:$0xff] %v6080_v49  ;;  %v1489_v31 = vmul.f32 %v6068_v28, %v6068_v28  ;;  %v6093_v62 = vadd.f32 %v1127_v15, %v6066_v44  ;;  %v6096_v8 = vadd.f32 %v1295_v39, %v6068_v28 }
 0x16e   :  { %v6098_v55 = vadd.f32 %v1795_v27, %v1487_v0  ;;  %v6100_v42 = vpop.f32.mrb[60].mxu0  ;;  %v1631_v6 = vsel %vm1010_vm1, %v1406_v10, 0.0  ;;  %v6103_v49 = vpop.f32.mrb[60].mxu1  ;;  %v1799_v2 = vsel %vm1010_vm1, %v1490_v29, 0.0 }
 0x16f   :  { %9794 = vst [vmem:[#allocation135_spill] sm:$0xff] %v6100_v42  ;;  %9795 = vst [vmem:[#allocation136_spill] sm:$0xff] %v6103_v49  ;;  %1237 = vadd.xlane.f32.xlu0 %v5586_v35  ;;  %1073 = vadd.xlane.f32.xlu1 %v5617_v9  ;;  %v1407_v15 = vmul.f32 %v6100_v42, %v6100_v42  ;;  %v6110_v44 = vpop.f32.mrb[61].mxu0  ;;  %v6112_v39 = vadd.f32 %v1631_v6, %v1405_v60  ;;  %v6114_v27 = vpop.f32.mrb[61].mxu1 }
 0x170   :  { %9793 = vst [vmem:[#allocation134_spill] sm:$0xff] %v6098_v55  ;;  %9796 = vst [vmem:[#allocation137_spill] sm:$0xff] %v6110_v44  ;;  %v1131_v0 = vsel %vm1010_vm1, %v6110_v44, 0.0  ;;  %v1408_v10 = vmul.f32 %v6110_v44, %v6110_v44  ;;  %v1299_v35 = vsel %vm1010_vm1, %v6114_v27, 0.0  ;;  %v1492_v9 = vmul.f32 %v6114_v27, %v6114_v27 }
 0x171   :  { %9797 = vst [vmem:[#allocation138_spill] sm:$0xff] %v6112_v39  ;;  %9798 = vst [vmem:[#allocation139_spill] sm:$0xff] %v6114_v27  ;;  %v1491_v29 = vmul.f32 %v6103_v49, %v6103_v49  ;;  %v6126_v38 = vadd.f32 %v1799_v2, %v1489_v31  ;;  %v6129_v60 = vadd.f32 %v1131_v0, %v6100_v42 }
 0x172   :  { %v6132_v6 = vadd.f32 %v1299_v35, %v6103_v49  ;;  %v6134_v28 = vpop.f32.mrb[62].mxu0  ;;  %v6136_v44 = vpop.f32.mrb[62].mxu1  ;;  %v1635_v39 = vsel %vm1010_vm1, %v1408_v10, 0.0  ;;  %v1803_v55 = vsel %vm1010_vm1, %v1492_v9, 0.0 }
 0x173   :  { %9800 = vst [vmem:[#allocation141_spill] sm:$0xff] %v6134_v28  ;;  %9801 = vst [vmem:[#allocation142_spill] sm:$0xff] %v6136_v44  ;;  %1573 = vadd.xlane.f32.xlu0 %v5602_v14  ;;  %1241 = vadd.xlane.f32.xlu1 %v5620_v33  ;;  %v1409_v2 = vmul.f32 %v6134_v28, %v6134_v28  ;;  %v6144_v31 = vpop.f32.mrb[63].mxu0  ;;  %v1493_v0 = vmul.f32 %v6136_v44, %v6136_v44  ;;  %v6148_v35 = vpop.f32.mrb[63].mxu1 }
 0x174   :  { %9799 = vst [vmem:[#allocation140_spill] sm:$0xff] %v6132_v6  ;;  %9802 = vst [vmem:[#allocation143_spill] sm:$0xff] %v6144_v31  ;;  %v6150_v42 = vadd.f32 %v1635_v39, %v1407_v15  ;;  %v1135_v10 = vsel %vm1010_vm1, %v6144_v31, 0.0  ;;  %v1410_v14 = vmul.f32 %v6144_v31, %v6144_v31  ;;  %v1303_v33 = vsel %vm1010_vm1, %v6148_v35, 0.0 }
 0x175   :  { %9803 = vst [vmem:[#allocation144_spill] sm:$0xff] %v6148_v35  ;;  %v1494_v9 = vmul.f32 %v6148_v35, %v6148_v35  ;;  %v6161_v27 = vadd.f32 %v1135_v10, %v6134_v28  ;;  %v6164_v49 = vadd.f32 %v1303_v33, %v6136_v44  ;;  %v6166_v15 = vadd.f32 %v1803_v55, %v1491_v29 }
 0x176   :  { %9804 = vst [vmem:[#allocation145_spill] sm:$0xff] %v6150_v42  ;;  %v6168_v39 = vpop.f32.mrb[64].mxu0  ;;  %v1639_v42 = vsel %vm1010_vm1, %v1410_v14, 0.0  ;;  %v6186_v33 = vpop.f32.mrb[64].mxu1 }
 0x177   :  { %9805 = vst [vmem:[#allocation146_spill] sm:$0xff] %v6168_v39  ;;  %v1807_v31 = vsel %vm1010_vm1, %v1494_v9, 0.0  ;;  %1741 = vadd.xlane.f32.xlu0 %v5604_v45  ;;  %1577 = vadd.xlane.f32.xlu1 %v5634_v54  ;;  %v6174_v6 = vpop.f32.mrb[65].mxu0  ;;  %v6176_v35 = vadd.f32 %v1639_v42, %v1409_v2  ;;  %v1411_v55 = vmul.f32 %v6168_v39, %v6168_v39  ;;  %9807 = vst [vmem:[#allocation148_spill] sm:$0xff] %v6186_v33  ;;  %v6193_v42 = vpop.f32.mrb[65].mxu1 }
 0x178   :  { %9806 = vst [vmem:[#allocation147_spill] sm:$0xff] %v6174_v6  ;;  %v6178_v10 = vadd.f32 %v1807_v31, %v1493_v0  ;;  %v1139_v29 = vsel %vm1010_vm1, %v6174_v6, 0.0  ;;  %v1412_v14 = vmul.f32 %v6174_v6, %v6174_v6  ;;  %9809 = vst [vmem:[#allocation150_spill] sm:$0xff] %v6193_v42  ;;  %v1307_v0 = vsel %vm1010_vm1, %v6193_v42, 0.0 }
 0x179   :  { %v6189_v45 = vadd.f32 %v1139_v29, %v6168_v39  ;;  %v1496_v9 = vmul.f32 %v6193_v42, %v6193_v42  ;;  %v1495_v6 = vmul.f32 %v6186_v33, %v6186_v33  ;;  %v6217_v28 = vadd.f32 %v1307_v0, %v6186_v33 }
 0x17a   :  { %v6191_v54 = vpop.f32.mrb[66].mxu0  ;;  %v1643_v2 = vsel %vm1010_vm1, %v1412_v14, 0.0  ;;  %v6214_v39 = vpop.f32.mrb[66].mxu1 }
 0x17b   :  { %9808 = vst [vmem:[#allocation149_spill] sm:$0xff] %v6191_v54  ;;  %1745 = vadd.xlane.f32.xlu1 %v5638_v53  ;;  %1077 = vadd.xlane.f32.xlu0 %v5651_v50  ;;  %v6198_v31 = vpop.f32.mrb[67].mxu0  ;;  %v6204_v29 = vadd.f32 %v1643_v2, %v1411_v55  ;;  %v1413_v14 = vmul.f32 %v6191_v54, %v6191_v54  ;;  %9812 = vst [vmem:[#allocation153_spill] sm:$0xff] %v6214_v39  ;;  %v1811_v2 = vsel %vm1010_vm1, %v1496_v9, 0.0  ;;  %v6223_v42 = vpop.f32.mrb[67].mxu1 }
 0x17c   :  { %9810 = vst [vmem:[#allocation151_spill] sm:$0xff] %v6198_v31  ;;  %v1143_v53 = vsel %vm1010_vm1, %v6198_v31, 0.0  ;;  %v1414_v50 = vmul.f32 %v6198_v31, %v6198_v31  ;;  %9813 = vst [vmem:[#allocation154_spill] sm:$0xff] %v6223_v42  ;;  %v6225_v44 = vadd.f32 %v1811_v2, %v1495_v6  ;;  %v1311_v31 = vsel %vm1010_vm1, %v6223_v42, 0.0 }
 0x17d   :  { %9811 = vst [vmem:[#allocation152_spill] sm:$0xff] %v6204_v29  ;;  %v6220_v55 = vadd.f32 %v1143_v53, %v6191_v54  ;;  %v1498_v0 = vmul.f32 %v6223_v42, %v6223_v42  ;;  %v1497_v9 = vmul.f32 %v6214_v39, %v6214_v39  ;;  %v6239_v6 = vadd.f32 %v1311_v31, %v6214_v39 }
 0x17e   :  { %v1647_v29 = vsel %vm1010_vm1, %v1414_v50, 0.0 }
 0x17f   :  { %1245 = vadd.xlane.f32.xlu0 %v5654_v61  ;;  %1081 = vadd.xlane.f32.xlu1 %v5685_v13  ;;  %v6234_v53 = vadd.f32 %v1647_v29, %v1413_v14  ;;  %v1815_v50 = vsel %vm1010_vm1, %v1498_v0, 0.0  ;;  %v6246_v61 = vpop.f32.mrb[68].mxu0  ;;  %v6261_v0 = vpop.f32.mrb[68].mxu1 }
 0x180   :  { %v6242_v2 = vadd.f32 %v1815_v50, %v1497_v9  ;;  %9816 = vst [vmem:[#allocation157_spill] sm:$0xff] %v6246_v61  ;;  %v6248_v13 = vpop.f32.mrb[69].mxu0  ;;  %9819 = vst [vmem:[#allocation160_spill] sm:$0xff] %v6261_v0  ;;  %v6268_v50 = vpop.f32.mrb[69].mxu1  ;;  %v1499_v42 = vmul.f32 %v6261_v0, %v6261_v0 }
 0x181   :  { %9814 = vst [vmem:[#allocation155_spill] sm:$0xff] %v6234_v53  ;;  %9817 = vst [vmem:[#allocation158_spill] sm:$0xff] %v6248_v13  ;;  %v1147_v31 = vsel %vm1010_vm1, %v6248_v13, 0.0  ;;  %v1416_v29 = vmul.f32 %v6248_v13, %v6248_v13 }
 0x182   :  { %9815 = vst [vmem:[#allocation156_spill] sm:$0xff] %v6242_v2  ;;  %v6263_v9 = vpop.f32.mrb[70].mxu0  ;;  %9822 = vst [vmem:[#allocation163_spill] sm:$0xff] %v6268_v50 }
 0x183   :  { %1581 = vadd.xlane.f32.xlu0 %v5670_v12  ;;  %1249 = vadd.xlane.f32.xlu1 %v5688_v40  ;;  %v1415_v12 = vmul.f32 %v6246_v61, %v6246_v61  ;;  %v6259_v40 = vadd.f32 %v1147_v31, %v6246_v61  ;;  %9820 = vst [vmem:[#allocation161_spill] sm:$0xff] %v6263_v9  ;;  %v1315_v61 = vsel %vm1010_vm1, %v6268_v50, 0.0 }
 0x185   :  { %9818 = vst [vmem:[#allocation159_spill] sm:$0xff] %v6259_v40 }
 0x187   :  { %1749 = vadd.xlane.f32.xlu0 %v5672_v63  ;;  %1585 = vadd.xlane.f32.xlu1 %v5702_v32  ;;  %v1651_v63 = vsel %vm1010_vm1, %v1416_v29, 0.0  ;;  %v6266_v32 = vpop.f32.mrb[71].mxu0 }
 0x188   :  { %v1014_v14 = vpop.xlane.xlu0 %1013  ;;  %9821 = vst [vmem:[#allocation162_spill] sm:$0xff] %v6266_v32  ;;  %v6270_v33 = vadd.f32 %v1651_v63, %v1415_v12  ;;  %v1151_v31 = vsel %vm1010_vm1, %v6266_v32, 0.0  ;;  %v1418_v13 = vmul.f32 %v6266_v32, %v6266_v32  ;;  %v1417_v12 = vmul.f32 %v6263_v9, %v6263_v9  ;;  %v6291_v32 = vpop.f32.mrb[70].mxu1 }
 0x189   :  { %v6289_v63 = vmul.f32 0.0051020407, %v1014_v14  ;;  %9825 = vst [vmem:[#allocation166_spill] sm:$0xff] %v6291_v32  ;;  %v6294_v39 = vadd.f32 %v1151_v31, %v6263_v9  ;;  %v6297_v40 = vpop.f32.mrb[71].mxu1 }
 0x18a   :  { %9823 = vst [vmem:[#allocation164_spill] sm:$0xff] %v6270_v33  ;;  %v1655_v33 = vsel %vm1010_vm1, %v1418_v13, 0.0  ;;  %9827 = vst [vmem:[#allocation168_spill] sm:$0xff] %v6297_v40  ;;  %v1502_v14 = vmul.f32 %v6297_v40, %v6297_v40 }
 0x18b   :  { %1753 = vadd.xlane.f32.xlu1 %v5706_v47  ;;  %1085 = vadd.xlane.f32.xlu0 %v5719_v7  ;;  %v1500_v47 = vmul.f32 %v6268_v50, %v6268_v50  ;;  %v6287_v7 = vadd.f32 %v1315_v61, %v6261_v0  ;;  %9826 = vst [vmem:[#allocation167_spill] sm:$0xff] %v6294_v39  ;;  %v1319_v61 = vsel %vm1010_vm1, %v6297_v40, 0.0 }
 0x18c   :  { %v1186_v29 = vpop.xlane.xlu1 %1185  ;;  %v1182_v54 = vpop.xlane.xlu0 %1181  ;;  %v6300_v53 = vadd.f32 %v1655_v33, %v1417_v12  ;;  %v1501_v0 = vmul.f32 %v6291_v32, %v6291_v32  ;;  %v6313_v33 = vadd.f32 %v1319_v61, %v6291_v32  ;;  %v1823_v9 = vsel %vm1010_vm1, %v1502_v14, 0.0 }
 0x18d   :  { %9824 = vst [vmem:[#allocation165_spill] sm:$0xff] %v6287_v7  ;;  %v1819_v2 = vsel %vm1010_vm1, %v1500_v47, 0.0  ;;  %v6308_v31 = vmul.f32 0.0051020407, %v1186_v29 }
 0x18e   :  { %9828 = vst [vmem:[#allocation169_spill] sm:$0xff] %v6300_v53  ;;  %9830 = vst [vmem:[#allocation171_spill] sm:$0xff] %v6313_v33  ;;  %v6315_v12 = vadd.f32 %v1819_v2, %v1499_v42  ;;  %v6322_v29 = vadd.f32 %v1823_v9, %v1501_v0  ;;  %v6338_v9 = vpop.f32.mrb[72].mxu0 }
 0x18f   :  { %1253 = vadd.xlane.f32.xlu0 %v5722_v56  ;;  %1089 = vadd.xlane.f32.xlu1 %v5753_v22  ;;  %9829 = vst [vmem:[#allocation170_spill] sm:$0xff] %v6308_v31  ;;  %v2019_v56 = vmul.f32 %v6289_v63, %v6289_v63  ;;  %v6319_v22 = vmul.f32 0.0051020407, %v1182_v54  ;;  %v6328_v61 = vmul.f32 %v6308_v31, %v6308_v31  ;;  %9838 = vst [vmem:[#allocation179_spill] sm:$0xff] %v6338_v9 }
 0x190   :  { %v1518_v50 = vpop.xlane.xlu0 %1517  ;;  %v1522_v13 = vpop.xlane.xlu1 %1521  ;;  %9831 = vst [vmem:[#allocation172_spill] sm:$0xff] %v6315_v12  ;;  %9833 = vst [vmem:[#allocation174_spill] sm:$0xff] %v6322_v29 }
 0x191   :  { %9832 = vst [vmem:[#allocation173_spill] sm:$0xff] %v6319_v22  ;;  %v1935_v47 = vmul.f32 0.0051020407, %v1518_v50  ;;  %9834 = vst [vmem:[#allocation175_spill] sm:$0xff] %v6328_v61  ;;  %v6332_v54 = vmul.f32 %v6319_v22, %v6319_v22  ;;  %v6357_v22 = vpop.f32.mrb[72].mxu1 }
 0x192   :  { %9841 = vst [vmem:[#allocation182_spill] sm:$0xff] %v6357_v22  ;;  %v6365_v31 = vpop.f32.mrb[73].mxu1  ;;  %v1936_v61 = vmul.f32 0.0051020407, %v1522_v13  ;;  %v1503_v13 = vmul.f32 %v6357_v22, %v6357_v22 }
 0x193   :  { %v2103_v40 = vsub.f32 %v1935_v47, %v2019_v56  ;;  %1589 = vadd.xlane.f32.xlu0 %v5738_v1  ;;  %1257 = vadd.xlane.f32.xlu1 %v5756_v17  ;;  %9835 = vst [vmem:[#allocation176_spill] sm:$0xff] %v6332_v54  ;;  %v6340_v1 = vpop.f32.mrb[73].mxu0  ;;  %9844 = vst [vmem:[#allocation185_spill] sm:$0xff] %v6365_v31 }
 0x194   :  { %v1686_v42 = vpop.xlane.xlu0 %1685  ;;  %v1690_v2 = vpop.xlane.xlu1 %1689  ;;  %9839 = vst [vmem:[#allocation180_spill] sm:$0xff] %v6340_v1  ;;  %v1420_v14 = vmul.f32 %v6340_v1, %v6340_v1 }
 0x195   :  { %v2187_v50 = vmax.f32 %v2103_v40, 0.0  ;;  %v6334_v32 = vmul.f32 0.0051020407, %v1686_v42  ;;  %v6336_v0 = vmul.f32 0.0051020407, %v1690_v2  ;;  %v1155_v40 = vsel %vm1010_vm1, %v6340_v1, 0.0 }
 0x196   :  { %v6351_v2 = vadd.f32 %v1155_v40, %v6338_v9  ;;  %v6359_v56 = vpop.f32.mrb[74].mxu0 }
 0x197   :  { %9836 = vst [vmem:[#allocation177_spill] sm:$0xff] %v6334_v32  ;;  %9837 = vst [vmem:[#allocation178_spill] sm:$0xff] %v6336_v0  ;;  %v2271_v17 = vadd.f32 1e-05, %v2187_v50  ;;  %1757 = vadd.xlane.f32.xlu0 %v5740_v52  ;;  %1593 = vadd.xlane.f32.xlu1 %v5770_v25  ;;  %v6363_v25 = vpop.f32.mrb[75].mxu0  ;;  %v6379_v32 = vpop.f32.mrb[74].mxu1 }
 0x198   :  { %v1018_v47 = vpop.xlane.xlu0 %1017  ;;  %v1022_v42 = vpop.xlane.xlu1 %1021  ;;  %9840 = vst [vmem:[#allocation181_spill] sm:$0xff] %v6351_v2  ;;  %9842 = vst [vmem:[#allocation183_spill] sm:$0xff] %v6359_v56  ;;  %v1323_v2 = vsel %vm1010_vm1, %v6365_v31, 0.0  ;;  %v1505_v33 = vmul.f32 %v6379_v32, %v6379_v32 }
 0x199   :  { %4337 = vrsqrt.f32 %v2271_v17  ;;  %v6353_v50 = vmul.f32 0.0051020407, %v1018_v47  ;;  %v6361_v52 = vmul.f32 0.0051020407, %v1022_v42  ;;  %9843 = vst [vmem:[#allocation184_spill] sm:$0xff] %v6363_v25  ;;  %v1159_v17 = vsel %vm1010_vm1, %v6363_v25, 0.0 }
 0x19a   :  { %v1419_v42 = vmul.f32 %v6338_v9, %v6338_v9  ;;  %9845 = vst [vmem:[#allocation186_spill] sm:$0xff] %v6379_v32  ;;  %v1504_v9 = vmul.f32 %v6365_v31, %v6365_v31 }
 0x19b   :  { %v2020_v40 = vmul.f32 %v6353_v50, %v6353_v50  ;;  %1761 = vadd.xlane.f32.xlu1 %v5774_v16  ;;  %1093 = vadd.xlane.f32.xlu0 %v5787_v21  ;;  %v2021_v54 = vmul.f32 %v6361_v52, %v6361_v52  ;;  %v1659_v16 = vsel %vm1010_vm1, %v1420_v14, 0.0  ;;  %v1422_v21 = vmul.f32 %v6363_v25, %v6363_v25 }
 0x19c   :  { %v1190_v47 = vpop.xlane.xlu0 %1189  ;;  %v1026_v1 = vpop.xlane.xlu1 %1025  ;;  %v1421_v14 = vmul.f32 %v6359_v56, %v6359_v56  ;;  %v1827_v7 = vsel %vm1010_vm1, %v1504_v9, 0.0 }
 0x19d   :  { %v2104_v0 = vsub.f32 %v1936_v61, %v2020_v40  ;;  %v6388_v61 = vpop.f32.mrb[75].mxu1  ;;  %v6391_v40 = vadd.f32 %v1159_v17, %v6359_v56  ;;  %v6393_v53 = vmul.f32 0.0051020407, %v1190_v47  ;;  %v6406_v17 = vadd.f32 %v1323_v2, %v6357_v22 }
 0x19e   :  { %9846 = vst [vmem:[#allocation187_spill] sm:$0xff] %v6388_v61  ;;  %v1327_v25 = vsel %vm1010_vm1, %v6388_v61, 0.0  ;;  %v6413_v56 = vmul.f32 0.0051020407, %v1026_v1 }
 0x19f   :  { %9847 = vst [vmem:[#allocation188_spill] sm:$0xff] %v6391_v40  ;;  %v2188_v29 = vmax.f32 %v2104_v0, 0.0  ;;  %9848 = vst [vmem:[#allocation189_spill] sm:$0xff] %v6393_v53  ;;  %1261 = vadd.xlane.f32.xlu0 %v5790_v19  ;;  %1097 = vadd.xlane.f32.xlu1 %v5821_v26  ;;  %v1506_v0 = vmul.f32 %v6388_v61, %v6388_v61  ;;  %v6408_v19 = vadd.f32 %v1659_v16, %v1419_v42  ;;  %v2439_v26 = vld [vmem:[%s9377_s3] sm:$0xff] }
 0x1a0   :  { %v1526_v12 = vpop.xlane.xlu0 %1525  ;;  %v1194_v31 = vpop.xlane.xlu1 %1193  ;;  %v6416_v39 = vadd.f32 %v1327_v25, %v6379_v32  ;;  %v1663_v61 = vsel %vm1010_vm1, %v1422_v21, 0.0  ;;  %v6423_v42 = vmul.f32 %v6393_v53, %v6393_v53 }
 0x1a1   :  { %v2272_v47 = vadd.f32 1e-05, %v2188_v29  ;;  %v1937_v40 = vmul.f32 0.0051020407, %v1526_v12  ;;  %v1831_v2 = vsel %vm1010_vm1, %v1506_v0, 0.0  ;;  %v6427_v12 = vadd.f32 %v1827_v7, %v1503_v13 }
 0x1a2   :  { %9849 = vst [vmem:[#allocation190_spill] sm:$0xff] %v6423_v42  ;;  %v6429_v29 = vmul.f32 0.0051020407, %v1194_v31  ;;  %v6431_v25 = vadd.f32 %v1663_v61, %v1421_v14  ;;  %v6433_v21 = vadd.f32 %v1831_v2, %v1505_v33 }
 0x1a3   :  { %v4338_v22 = vpop.eup %4337  ;;  %4339 = vrsqrt.f32 %v2272_v47  ;;  %v2105_v16 = vsub.f32 %v1937_v40, %v2021_v54  ;;  %1597 = vadd.xlane.f32.xlu0 %v5806_v36  ;;  %1265 = vadd.xlane.f32.xlu1 %v5824_v37  ;;  %v2022_v47 = vmul.f32 %v6413_v56, %v6413_v56  ;;  %v6441_v37 = vpop.f32.mrb[76].mxu0 }
 0x1a4   :  { %9850 = vst [vmem:[#allocation191_spill] sm:$0xff] %v6429_v29  ;;  %v1694_v9 = vpop.xlane.xlu0 %1693  ;;  %v1530_v1 = vpop.xlane.xlu1 %1529  ;;  %v6435_v0 = vmul.f32 %v4338_v22, %v2439_v26  ;;  %9853 = vst [vmem:[#allocation194_spill] sm:$0xff] %v6441_v37  ;;  %v6457_v14 = vmul.f32 %v6429_v29, %v6429_v29 }
 0x1a5   :  { %v2189_v54 = vmax.f32 %v2105_v16, 0.0  ;;  %v6439_v40 = vmul.f32 0.0051020407, %v1694_v9  ;;  %v1938_v36 = vmul.f32 0.0051020407, %v1530_v1  ;;  %v6443_v7 = vpop.f32.mrb[77].mxu0 }
 0x1a6   :  { %9851 = vst [vmem:[#allocation192_spill] sm:$0xff] %v6435_v0  ;;  %9854 = vst [vmem:[#allocation195_spill] sm:$0xff] %v6443_v7  ;;  %v6447_v31 = vmul.f32 %v6435_v0, %v6289_v63  ;;  %v1163_v61 = vsel %vm1010_vm1, %v6443_v7, 0.0  ;;  %v6468_v1 = vpop.f32.mrb[78].mxu0 }
 0x1a7   :  { %9852 = vst [vmem:[#allocation193_spill] sm:$0xff] %v6439_v40  ;;  %v2273_v13 = vadd.f32 1e-05, %v2189_v54  ;;  %v2106_v22 = vsub.f32 %v1938_v36, %v2022_v47  ;;  %1765 = vadd.xlane.f32.xlu0 %v5808_v23  ;;  %1601 = vadd.xlane.f32.xlu1 %v5838_v46  ;;  %9856 = vst [vmem:[#allocation197_spill] sm:$0xff] %v6457_v14  ;;  %v6460_v63 = vadd.f32 %v1163_v61, %v6441_v37  ;;  %v6466_v46 = vpop.f32.mrb[76].mxu1  ;;  %v6472_v54 = vpop.f32.mrb[79].mxu0 }
 0x1a8   :  { %9855 = vst [vmem:[#allocation196_spill] sm:$0xff] %v6447_v31  ;;  %v1698_v26 = vpop.xlane.xlu1 %1697  ;;  %v1030_v2 = vpop.xlane.xlu0 %1029  ;;  %v1424_v23 = vmul.f32 %v6443_v7, %v6443_v7  ;;  %9858 = vst [vmem:[#allocation199_spill] sm:$0xff] %v6466_v46  ;;  %v1167_v53 = vsel %vm1010_vm1, %v6472_v54, 0.0 }
 0x1a9   :  { %4341 = vrsqrt.f32 %v2273_v13  ;;  %v2190_v16 = vmax.f32 %v2106_v22, 0.0  ;;  %v6462_v9 = vmul.f32 0.0051020407, %v1698_v26  ;;  %9859 = vst [vmem:[#allocation200_spill] sm:$0xff] %v6468_v1  ;;  %v6470_v47 = vmul.f32 0.0051020407, %v1030_v2 }
 0x1aa   :  { %9860 = vst [vmem:[#allocation201_spill] sm:$0xff] %v6472_v54  ;;  %v6474_v36 = vpop.f32.mrb[77].mxu1  ;;  %v2440_v13 = vld [vmem:[%s9377_s3 + $0x8] sm:$0xff]  ;;  %v1423_v2 = vmul.f32 %v6441_v37, %v6441_v37  ;;  %v1667_v22 = vsel %vm1010_vm1, %v1424_v23, 0.0  ;;  %v1426_v23 = vmul.f32 %v6472_v54, %v6472_v54  ;;  %v6526_v14 = vadd.f32 %v1167_v53, %v6468_v1 }
 0x1ab   :  { %9857 = vst [vmem:[#allocation198_spill] sm:$0xff] %v6462_v9  ;;  %9861 = vst [vmem:[#allocation202_spill] sm:$0xff] %v6474_v36  ;;  %1769 = vadd.xlane.f32.xlu1 %v5842_v4  ;;  %1101 = vadd.xlane.f32.xlu0 %v5855_v58  ;;  %v2274_v7 = vadd.f32 1e-05, %v2190_v16  ;;  %v2023_v32 = vmul.f32 %v6470_v47, %v6470_v47  ;;  %v6489_v29 = vpop.f32.mrb[78].mxu1  ;;  %v1331_v31 = vsel %vm1010_vm1, %v6474_v36, 0.0 }
 0x1ac   :  { %v1198_v61 = vpop.xlane.xlu0 %1197  ;;  %v1034_v26 = vpop.xlane.xlu1 %1033  ;;  %9862 = vst [vmem:[#allocation203_spill] sm:$0xff] %v6489_v29  ;;  %v1508_v16 = vmul.f32 %v6474_v36, %v6474_v36  ;;  %v6521_v40 = vadd.f32 %v1331_v31, %v6466_v46  ;;  %v1509_v0 = vmul.f32 %v6489_v29, %v6489_v29 }
 0x1ad   :  { %v4340_v33 = vpop.eup %4339  ;;  %v6494_v58 = vmul.f32 0.0051020407, %v1198_v61  ;;  %v6500_v37 = vpop.f32.mrb[79].mxu1  ;;  %v6502_v42 = vmul.f32 0.0051020407, %v1034_v26  ;;  %4343 = vrsqrt.f32 %v2274_v7 }
 0x1ae   :  { %v6492_v4 = vmul.f32 %v4340_v33, %v2440_v13  ;;  %9865 = vst [vmem:[#allocation206_spill] sm:$0xff] %v6500_v37  ;;  %v1507_v33 = vmul.f32 %v6466_v46, %v6466_v46  ;;  %v1335_v13 = vsel %vm1010_vm1, %v6500_v37, 0.0  ;;  %v1835_v7 = vsel %vm1010_vm1, %v1508_v16, 0.0 }
 0x1af   :  { %9864 = vst [vmem:[#allocation205_spill] sm:$0xff] %v6494_v58  ;;  %1269 = vadd.xlane.f32.xlu0 %v5858_v48  ;;  %1105 = vadd.xlane.f32.xlu1 %v5889_v57  ;;  %v1425_v48 = vmul.f32 %v6468_v1, %v6468_v1  ;;  %v1510_v57 = vmul.f32 %v6500_v37, %v6500_v37 }
 0x1b0   :  { %9863 = vst [vmem:[#allocation204_spill] sm:$0xff] %v6492_v4  ;;  %v6514_v61 = vmul.f32 %v6492_v4, %v6353_v50  ;;  %v1534_v36 = vpop.xlane.xlu0 %1533  ;;  %v1202_v26 = vpop.xlane.xlu1 %1201  ;;  %v2441_v50 = vld [vmem:[%s9377_s3 + $0x10] sm:$0xff]  ;;  %v6533_v4 = vmul.f32 %v6494_v58, %v6494_v58  ;;  %v6535_v37 = vadd.f32 %v1667_v22, %v1423_v2  ;;  %v6538_v31 = vadd.f32 %v1335_v13, %v6489_v29 }
 0x1b1   :  { %v1939_v54 = vmul.f32 0.0051020407, %v1534_v36  ;;  %v2024_v53 = vmul.f32 %v6502_v42, %v6502_v42  ;;  %v6545_v1 = vadd.f32 %v1835_v7, %v1507_v33  ;;  %v1671_v58 = vsel %vm1010_vm1, %v1426_v23, 0.0 }
 0x1b2   :  { %9866 = vst [vmem:[#allocation207_spill] sm:$0xff] %v6514_v61  ;;  %9867 = vst [vmem:[#allocation208_spill] sm:$0xff] %v6533_v4  ;;  %v6548_v22 = vmul.f32 0.0051020407, %v1202_v26  ;;  %v6550_v29 = vadd.f32 %v1671_v58, %v1425_v48  ;;  %v1839_v16 = vsel %vm1010_vm1, %v1510_v57, 0.0 }
 0x1b3   :  { %v4342_v36 = vpop.eup %4341  ;;  %v2107_v46 = vsub.f32 %v1939_v54, %v2023_v32  ;;  %1605 = vadd.xlane.f32.xlu0 %v5874_v11  ;;  %1273 = vadd.xlane.f32.xlu1 %v5892_v41  ;;  %v6557_v54 = vpop.f32.mrb[80].mxu0  ;;  %v6559_v41 = vadd.f32 %v1839_v16, %v1509_v0 }
 0x1b4   :  { %9868 = vst [vmem:[#allocation209_spill] sm:$0xff] %v6548_v22  ;;  %v1702_v2 = vpop.xlane.xlu0 %1701  ;;  %v1538_v13 = vpop.xlane.xlu1 %1537  ;;  %v6553_v61 = vmul.f32 %v4342_v36, %v2441_v50  ;;  %9871 = vst [vmem:[#allocation212_spill] sm:$0xff] %v6557_v54 }
 0x1b5   :  { %v2191_v9 = vmax.f32 %v2107_v46, 0.0  ;;  %v6555_v32 = vmul.f32 0.0051020407, %v1702_v2  ;;  %v1940_v11 = vmul.f32 0.0051020407, %v1538_v13  ;;  %v6561_v33 = vpop.f32.mrb[81].mxu0 }
 0x1b6   :  { %9869 = vst [vmem:[#allocation210_spill] sm:$0xff] %v6553_v61  ;;  %9872 = vst [vmem:[#allocation213_spill] sm:$0xff] %v6561_v33  ;;  %v6565_v23 = vmul.f32 %v6553_v61, %v6361_v52  ;;  %v9874_v46 = vld [vmem:[#allocation101_spill] sm:$0xff]  ;;  %v1171_v57 = vsel %vm1010_vm1, %v6561_v33, 0.0  ;;  %v6578_v52 = vmul.f32 %v6548_v22, %v6548_v22  ;;  %v1428_v2 = vmul.f32 %v6561_v33, %v6561_v33 }
 0x1b7   :  { %9870 = vst [vmem:[#allocation211_spill] sm:$0xff] %v6555_v32  ;;  %v2275_v58 = vadd.f32 1e-05, %v2191_v9  ;;  %v2108_v48 = vsub.f32 %v1940_v11, %v2024_v53  ;;  %1773 = vadd.xlane.f32.xlu0 %v5876_v43  ;;  %1609 = vadd.xlane.f32.xlu1 %v9874_v46  ;;  %v6574_v7 = vadd.f32 %v1171_v57, %v6557_v54  ;;  %v6582_v53 = vpop.f32.mrb[80].mxu1  ;;  %v6584_v43 = vpop.f32.mrb[82].mxu0 }
 0x1b8   :  { %9873 = vst [vmem:[#allocation214_spill] sm:$0xff] %v6565_v23  ;;  %v1706_v0 = vpop.xlane.xlu1 %1705  ;;  %v1038_v50 = vpop.xlane.xlu0 %1037  ;;  %9876 = vst [vmem:[#allocation215_spill] sm:$0xff] %v6578_v52  ;;  %v1511_v4 = vmul.f32 %v6582_v53, %v6582_v53 }
 0x1b9   :  { %9875 = vst [vmem:[#allocation101_spill] sm:$0xff] %v6574_v7  ;;  %4345 = vrsqrt.f32 %v2275_v58  ;;  %v2192_v9 = vmax.f32 %v2108_v48, 0.0  ;;  %v6580_v36 = vmul.f32 0.0051020407, %v1706_v0  ;;  %9878 = vst [vmem:[#allocation217_spill] sm:$0xff] %v6582_v53  ;;  %v6588_v13 = vpop.f32.mrb[83].mxu0  ;;  %v4344_v11 = vpop.eup %4343  ;;  %v1429_v7 = vmul.f32 %v6584_v43, %v6584_v43 }
 0x1ba   :  { %9879 = vst [vmem:[#allocation218_spill] sm:$0xff] %v6584_v43  ;;  %9880 = vst [vmem:[#allocation219_spill] sm:$0xff] %v6588_v13  ;;  %v6590_v16 = vpop.f32.mrb[81].mxu1  ;;  %v9882_v48 = vld [vmem:[#allocation105_spill] sm:$0xff]  ;;  %v1175_v57 = vsel %vm1010_vm1, %v6588_v13, 0.0 }
 0x1bb   :  { %9877 = vst [vmem:[#allocation216_spill] sm:$0xff] %v6580_v36  ;;  %9881 = vst [vmem:[#allocation220_spill] sm:$0xff] %v6590_v16  ;;  %v2276_v58 = vadd.f32 1e-05, %v2192_v9  ;;  %1777 = vadd.xlane.f32.xlu1 %v5918_v20  ;;  %1109 = vadd.xlane.f32.xlu0 %v9882_v48  ;;  %v6599_v33 = vadd.f32 %v1175_v57, %v6584_v43  ;;  %v6601_v22 = vmul.f32 0.0051020407, %v1038_v50 }
 0x1bc   :  { %v1206_v0 = vpop.xlane.xlu0 %1205  ;;  %v1042_v26 = vpop.xlane.xlu1 %1041  ;;  %v1427_v9 = vmul.f32 %v6557_v54, %v6557_v54  ;;  %v2442_v20 = vld [vmem:[%s9377_s3 + $0x18] sm:$0xff]  ;;  %v1339_v48 = vsel %vm1010_vm1, %v6590_v16, 0.0  ;;  %v1512_v46 = vmul.f32 %v6590_v16, %v6590_v16  ;;  %v1675_v50 = vsel %vm1010_vm1, %v1428_v2, 0.0  ;;  %v9887_v54 = vld [vmem:[#allocation103_spill] sm:$0xff] }
 0x1bd   :  { %9883 = vst [vmem:[#allocation105_spill] sm:$0xff] %v6599_v33  ;;  %v6605_v23 = vpop.f32.mrb[82].mxu1  ;;  %4347 = vrsqrt.f32 %v2276_v58  ;;  %v6617_v61 = vmul.f32 0.0051020407, %v1206_v0  ;;  %v1430_v58 = vmul.f32 %v6588_v13, %v6588_v13  ;;  %v6630_v2 = vmul.f32 %v4344_v11, %v2442_v20  ;;  %v2443_v13 = vld [vmem:[%s9377_s3 + $0x20] sm:$0xff] }
 0x1be   :  { %9884 = vst [vmem:[#allocation221_spill] sm:$0xff] %v6605_v23  ;;  %v6614_v57 = vpop.f32.mrb[83].mxu1  ;;  %v6637_v33 = vadd.f32 %v1339_v48, %v6582_v53  ;;  %v1843_v11 = vsel %vm1010_vm1, %v1512_v46, 0.0 }
 0x1bf   :  { %9885 = vst [vmem:[#allocation222_spill] sm:$0xff] %v6614_v57  ;;  %9886 = vst [vmem:[#allocation223_spill] sm:$0xff] %v6617_v61  ;;  %1277 = vadd.xlane.f32.xlu0 %v9887_v54  ;;  %1113 = vadd.xlane.f32.xlu1 %v5957_v24  ;;  %v1343_v32 = vsel %vm1010_vm1, %v6614_v57, 0.0  ;;  %v2025_v54 = vmul.f32 %v6601_v22, %v6601_v22  ;;  %v6634_v24 = vmul.f32 0.0051020407, %v1042_v26  ;;  %v1679_v48 = vsel %vm1010_vm1, %v1430_v58, 0.0 }
 0x1c0   :  { %v1542_v16 = vpop.xlane.xlu0 %1541  ;;  %v1210_v52 = vpop.xlane.xlu1 %1209  ;;  %v6628_v36 = vadd.f32 %v1343_v32, %v6605_v23  ;;  %9889 = vst [vmem:[#allocation224_spill] sm:$0xff] %v6637_v33  ;;  %v6644_v32 = vadd.f32 %v1675_v50, %v1427_v9  ;;  %v6649_v26 = vmul.f32 %v6617_v61, %v6617_v61  ;;  %v6654_v53 = vadd.f32 %v1843_v11, %v1511_v4 }
 0x1c1   :  { %v1941_v0 = vmul.f32 0.0051020407, %v1542_v16  ;;  %v6656_v33 = vmul.f32 0.0051020407, %v1210_v52  ;;  %v1514_v46 = vmul.f32 %v6614_v57, %v6614_v57  ;;  %v6662_v43 = vmul.f32 %v6630_v2, %v6413_v56 }
 0x1c2   :  { %9888 = vst [vmem:[#allocation103_spill] sm:$0xff] %v6628_v36  ;;  %9890 = vst [vmem:[#allocation225_spill] sm:$0xff] %v6649_v26  ;;  %v9891_v36 = vld [vmem:[#allocation109_spill] sm:$0xff]  ;;  %v1513_v58 = vmul.f32 %v6605_v23, %v6605_v23  ;;  %v9904_v26 = vld [vmem:[#allocation122_spill] sm:$0xff] }
 0x1c3   :  { %v4346_v20 = vpop.eup %4345  ;;  %v2109_v16 = vsub.f32 %v1941_v0, %v2025_v54  ;;  %1613 = vadd.xlane.f32.xlu0 %v9891_v36  ;;  %1281 = vadd.xlane.f32.xlu1 %v5960_v59  ;;  %9892 = vst [vmem:[#allocation109_spill] sm:$0xff] %v6656_v33  ;;  %v6668_v59 = vmul.f32 %v6634_v24, %v6634_v24 }
 0x1c4   :  { %v1710_v9 = vpop.xlane.xlu0 %1709  ;;  %v1546_v50 = vpop.xlane.xlu1 %1545  ;;  %v6664_v54 = vmul.f32 %v4346_v20, %v2443_v13  ;;  %v9895_v20 = vld [vmem:[#allocation110_spill] sm:$0xff]  ;;  %v6694_v13 = vmul.f32 %v6656_v33, %v6656_v33  ;;  %v9900_v33 = vld [vmem:[#allocation121_spill] sm:$0xff] }
 0x1c5   :  { %v2193_v36 = vmax.f32 %v2109_v16, 0.0  ;;  %v6670_v4 = vmul.f32 0.0051020407, %v1710_v9  ;;  %v6672_v52 = vmul.f32 0.0051020407, %v1546_v50  ;;  %v9896_v16 = vld [vmem:[#allocation114_spill] sm:$0xff]  ;;  %v6689_v50 = vadd.f32 %v1679_v48, %v1429_v7 }
 0x1c6   :  { %9893 = vst [vmem:[#allocation226_spill] sm:$0xff] %v6664_v54  ;;  %v6678_v0 = vmul.f32 %v6664_v54, %v6470_v47  ;;  %v2444_v9 = vld [vmem:[%s9377_s3 + $0x28] sm:$0xff] }
 0x1c7   :  { %v2277_v56 = vadd.f32 1e-05, %v2193_v36  ;;  %1781 = vadd.xlane.f32.xlu0 %v9895_v20  ;;  %1617 = vadd.xlane.f32.xlu1 %v9896_v16  ;;  %v4348_v57 = vpop.eup %4347  ;;  %v1847_v36 = vsel %vm1010_vm1, %v1514_v46, 0.0 }
 0x1c8   :  { %9894 = vst [vmem:[#allocation227_spill] sm:$0xff] %v6678_v0  ;;  %v1714_v47 = vpop.xlane.xlu1 %1713  ;;  %v1046_v23 = vpop.xlane.xlu0 %1045  ;;  %v6698_v20 = vmul.f32 %v4348_v57, %v2444_v9  ;;  %v6704_v7 = vadd.f32 %v1847_v36, %v1513_v58  ;;  %v4506_v0 = vmov 0  }
 0x1c9   :  { %4349 = vrsqrt.f32 %v2277_v56  ;;  %v6696_v11 = vmul.f32 0.0051020407, %v1714_v47  ;;  %v6710_v61 = vmul.f32 0.0051020407, %v1046_v23  ;;  %v9898_v47 = vld [vmem:[#allocation116_spill] sm:$0xff]  ;;  %4336 = vset.pattern.permute.xlu1 %v4506_v0  ;;  %4335 = vset.pattern.permute.xlu0 %v4506_v0  ;;  %v9905_v0 = vld [vmem:[#allocation126_spill] sm:$0xff] }
 0x1ca   :  { %9897 = vst [vmem:[#allocation110_spill] sm:$0xff] %v6698_v20  ;;  %v6708_v56 = vmul.f32 %v6698_v20, %v6502_v42  ;;  %v2445_v42 = vld [vmem:[%s9377_s3 + $0x30] sm:$0xff] }
 0x1cb   :  { %1785 = vadd.xlane.f32.xlu1 %v5990_v30  ;;  %1117 = vadd.xlane.f32.xlu0 %v5993_v51  ;;  %v2027_v51 = vmul.f32 %v6710_v61, %v6710_v61 }
 0x1cc   :  { %v1214_v48 = vpop.xlane.xlu0 %1213  ;;  %v1050_v46 = vpop.xlane.xlu1 %1049 }
 0x1cd   :  { %v6714_v57 = vmul.f32 0.0051020407, %v1214_v48  ;;  %v6718_v58 = vmul.f32 0.0051020407, %v1050_v46 }
 0x1cf   :  { %1285 = vadd.xlane.f32.xlu0 %v9898_v47  ;;  %1121 = vadd.xlane.f32.xlu1 %v6025_v34  ;;  %9899 = vst [vmem:[#allocation114_spill] sm:$0xff] %v6714_v57  ;;  %v6727_v34 = vmul.f32 %v6714_v57, %v6714_v57 }
 0x1d0   :  { %v1550_v9 = vpop.xlane.xlu0 %1549  ;;  %v1218_v30 = vpop.xlane.xlu1 %1217 }
 0x1d1   :  { %v1943_v36 = vmul.f32 0.0051020407, %v1550_v9  ;;  %v6729_v48 = vmul.f32 0.0051020407, %v1218_v30 }
 0x1d3   :  { %v4350_v23 = vpop.eup %4349  ;;  %v2111_v16 = vsub.f32 %v1943_v36, %v2027_v51  ;;  %1621 = vadd.xlane.f32.xlu0 %v9900_v33  ;;  %1289 = vadd.xlane.f32.xlu1 %v6028_v18  ;;  %9901 = vst [vmem:[#allocation116_spill] sm:$0xff] %v6729_v48  ;;  %v2028_v51 = vmul.f32 %v6718_v58, %v6718_v58 }
 0x1d4   :  { %v1718_v47 = vpop.xlane.xlu0 %1717  ;;  %v1554_v46 = vpop.xlane.xlu1 %1553  ;;  %v6731_v9 = vmul.f32 %v4350_v23, %v2445_v42 }
 0x1d5   :  { %v2195_v36 = vmax.f32 %v2111_v16, 0.0  ;;  %v6735_v33 = vmul.f32 0.0051020407, %v1718_v47  ;;  %v1944_v18 = vmul.f32 0.0051020407, %v1554_v46  ;;  %v6747_v16 = vmul.f32 %v6729_v48, %v6729_v48 }
 0x1d6   :  { %9902 = vst [vmem:[#allocation121_spill] sm:$0xff] %v6731_v9  ;;  %v6739_v57 = vmul.f32 %v6731_v9, %v6601_v22 }
 0x1d7   :  { %v2279_v30 = vadd.f32 1e-05, %v2195_v36  ;;  %v2112_v54 = vsub.f32 %v1944_v18, %v2028_v51  ;;  %1789 = vadd.xlane.f32.xlu0 %v9904_v26  ;;  %1625 = vadd.xlane.f32.xlu1 %v9905_v0  ;;  %v9908_v36 = vld [vmem:[#allocation133_spill] sm:$0xff] }
 0x1d8   :  { %9903 = vst [vmem:[#allocation228_spill] sm:$0xff] %v6739_v57  ;;  %v1722_v42 = vpop.xlane.xlu1 %1721  ;;  %v1054_v23 = vpop.xlane.xlu0 %1053 }
 0x1d9   :  { %4351 = vrsqrt.f32 %v2279_v30  ;;  %v2196_v47 = vmax.f32 %v2112_v54, 0.0  ;;  %v6749_v46 = vmul.f32 0.0051020407, %v1722_v42  ;;  %v6755_v18 = vmul.f32 0.0051020407, %v1054_v23  ;;  %v9906_v30 = vld [vmem:[#allocation128_spill] sm:$0xff] }
 0x1db   :  { %v2280_v22 = vadd.f32 1e-05, %v2196_v47  ;;  %1793 = vadd.xlane.f32.xlu1 %v6058_v3  ;;  %1125 = vadd.xlane.f32.xlu0 %v6061_v5  ;;  %v2029_v47 = vmul.f32 %v6755_v18, %v6755_v18  ;;  %v2447_v5 = vld [vmem:[%s9377_s3 + $0x40] sm:$0xff] }
 0x1dc   :  { %v1222_v26 = vpop.xlane.xlu0 %1221  ;;  %v1058_v51 = vpop.xlane.xlu1 %1057 }
 0x1dd   :  { %4353 = vrsqrt.f32 %v2280_v22  ;;  %v6759_v54 = vmul.f32 0.0051020407, %v1222_v26  ;;  %v6763_v20 = vmul.f32 0.0051020407, %v1058_v51 }
 0x1df   :  { %1293 = vadd.xlane.f32.xlu0 %v9906_v30  ;;  %1129 = vadd.xlane.f32.xlu1 %v6093_v62  ;;  %9907 = vst [vmem:[#allocation122_spill] sm:$0xff] %v6759_v54  ;;  %v6772_v62 = vmul.f32 %v6759_v54, %v6759_v54  ;;  %v9914_v54 = vld [vmem:[#allocation134_spill] sm:$0xff] }
 0x1e0   :  { %v1558_v0 = vpop.xlane.xlu0 %1557  ;;  %v1226_v42 = vpop.xlane.xlu1 %1225 }
 0x1e1   :  { %v1945_v3 = vmul.f32 0.0051020407, %v1558_v0  ;;  %9909 = vst [vmem:[#allocation126_spill] sm:$0xff] %v6772_v62  ;;  %v6774_v26 = vmul.f32 0.0051020407, %v1226_v42  ;;  %v2030_v0 = vmul.f32 %v6763_v20, %v6763_v20 }
 0x1e3   :  { %v4352_v23 = vpop.eup %4351  ;;  %v2113_v22 = vsub.f32 %v1945_v3, %v2029_v47  ;;  %1629 = vadd.xlane.f32.xlu0 %v9908_v36  ;;  %1297 = vadd.xlane.f32.xlu1 %v6096_v8  ;;  %9910 = vst [vmem:[#allocation128_spill] sm:$0xff] %v6774_v26 }
 0x1e4   :  { %v1726_v30 = vpop.xlane.xlu0 %1725  ;;  %v1562_v51 = vpop.xlane.xlu1 %1561  ;;  %v6776_v48 = vmul.f32 %v4352_v23, %v2447_v5  ;;  %v9915_v5 = vld [vmem:[#allocation138_spill] sm:$0xff]  ;;  %v2448_v23 = vld [vmem:[%s9377_s3 + $0x48] sm:$0xff] }
 0x1e5   :  { %v2197_v57 = vmax.f32 %v2113_v22, 0.0  ;;  %v6780_v9 = vmul.f32 0.0051020407, %v1726_v30  ;;  %v1946_v47 = vmul.f32 0.0051020407, %v1562_v51 }
 0x1e6   :  { %9911 = vst [vmem:[#allocation133_spill] sm:$0xff] %v6776_v48  ;;  %v6784_v8 = vmul.f32 %v6776_v48, %v6710_v61  ;;  %v6795_v61 = vmul.f32 %v6774_v26, %v6774_v26 }
 0x1e7   :  { %9912 = vst [vmem:[#allocation229_spill] sm:$0xff] %v6780_v9  ;;  %v2281_v36 = vadd.f32 1e-05, %v2197_v57  ;;  %v2114_v3 = vsub.f32 %v1946_v47, %v2030_v0  ;;  %1797 = vadd.xlane.f32.xlu0 %v9914_v54  ;;  %1633 = vadd.xlane.f32.xlu1 %v9915_v5  ;;  %v4354_v22 = vpop.eup %4353  ;;  %v9918_v47 = vld [vmem:[#allocation145_spill] sm:$0xff] }
 0x1e8   :  { %9913 = vst [vmem:[#allocation230_spill] sm:$0xff] %v6784_v8  ;;  %v1730_v30 = vpop.xlane.xlu1 %1729  ;;  %v1062_v51 = vpop.xlane.xlu0 %1061  ;;  %v6799_v0 = vmul.f32 %v4354_v22, %v2448_v23 }
 0x1e9   :  { %4355 = vrsqrt.f32 %v2281_v36  ;;  %v2198_v57 = vmax.f32 %v2114_v3, 0.0  ;;  %v6797_v8 = vmul.f32 0.0051020407, %v1730_v30  ;;  %v6809_v26 = vmul.f32 0.0051020407, %v1062_v51  ;;  %v9916_v3 = vld [vmem:[#allocation140_spill] sm:$0xff] }
 0x1ea   :  { %v6807_v36 = vmul.f32 %v6799_v0, %v6718_v58  ;;  %v2449_v58 = vld [vmem:[%s9377_s3 + $0x50] sm:$0xff] }
 0x1eb   :  { %v2282_v54 = vadd.f32 1e-05, %v2198_v57  ;;  %1801 = vadd.xlane.f32.xlu1 %v6126_v38  ;;  %1133 = vadd.xlane.f32.xlu0 %v6129_v60  ;;  %v2031_v38 = vmul.f32 %v6809_v26, %v6809_v26 }
 0x1ec   :  { %v1230_v5 = vpop.xlane.xlu0 %1229  ;;  %v1066_v42 = vpop.xlane.xlu1 %1065 }
 0x1ed   :  { %4357 = vrsqrt.f32 %v2282_v54  ;;  %v6813_v23 = vmul.f32 0.0051020407, %v1230_v5  ;;  %v6817_v60 = vmul.f32 0.0051020407, %v1066_v42 }
 0x1ef   :  { %1301 = vadd.xlane.f32.xlu0 %v9916_v3  ;;  %1137 = vadd.xlane.f32.xlu1 %v6161_v27  ;;  %9917 = vst [vmem:[#allocation134_spill] sm:$0xff] %v6813_v23  ;;  %v6826_v27 = vmul.f32 %v6813_v23, %v6813_v23 }
 0x1f0   :  { %v1566_v22 = vpop.xlane.xlu0 %1565  ;;  %v1234_v30 = vpop.xlane.xlu1 %1233 }
 0x1f1   :  { %v1947_v57 = vmul.f32 0.0051020407, %v1566_v22  ;;  %9919 = vst [vmem:[#allocation138_spill] sm:$0xff] %v6826_v27  ;;  %v6828_v5 = vmul.f32 0.0051020407, %v1234_v30  ;;  %v2032_v22 = vmul.f32 %v6817_v60, %v6817_v60  ;;  %v9943_v27 = vld [vmem:[#allocation169_spill] sm:$0xff] }
 0x1f3   :  { %v4356_v51 = vpop.eup %4355  ;;  %v2115_v54 = vsub.f32 %v1947_v57, %v2031_v38  ;;  %1637 = vadd.xlane.f32.xlu0 %v9918_v47  ;;  %1305 = vadd.xlane.f32.xlu1 %v6164_v49  ;;  %9920 = vst [vmem:[#allocation140_spill] sm:$0xff] %v6828_v5 }
 0x1f4   :  { %v1734_v3 = vpop.xlane.xlu0 %1733  ;;  %v1570_v42 = vpop.xlane.xlu1 %1569  ;;  %v6830_v48 = vmul.f32 %v4356_v51, %v2449_v58  ;;  %v2450_v58 = vld [vmem:[%s9377_s3 + $0x58] sm:$0xff] }
 0x1f5   :  { %v2199_v62 = vmax.f32 %v2115_v54, 0.0  ;;  %v6834_v9 = vmul.f32 0.0051020407, %v1734_v3  ;;  %v1948_v38 = vmul.f32 0.0051020407, %v1570_v42 }
 0x1f6   :  { %9921 = vst [vmem:[#allocation145_spill] sm:$0xff] %v6830_v48  ;;  %v6838_v49 = vmul.f32 %v6830_v48, %v6755_v18  ;;  %v6849_v18 = vmul.f32 %v6828_v5, %v6828_v5  ;;  %v9942_v48 = vld [vmem:[#allocation172_spill] sm:$0xff] }
 0x1f7   :  { %9922 = vst [vmem:[#allocation231_spill] sm:$0xff] %v6834_v9  ;;  %v2283_v47 = vadd.f32 1e-05, %v2199_v62  ;;  %v2116_v57 = vsub.f32 %v1948_v38, %v2032_v22  ;;  %1805 = vadd.xlane.f32.xlu0 %v6166_v15  ;;  %1641 = vadd.xlane.f32.xlu1 %v6176_v35  ;;  %v4358_v51 = vpop.eup %4357 }
 0x1f8   :  { %9923 = vst [vmem:[#allocation232_spill] sm:$0xff] %v6838_v49  ;;  %v1738_v54 = vpop.xlane.xlu1 %1737  ;;  %v1070_v3 = vpop.xlane.xlu0 %1069  ;;  %v6853_v22 = vmul.f32 %v4358_v51, %v2450_v58 }
 0x1f9   :  { %4359 = vrsqrt.f32 %v2283_v47  ;;  %v2200_v62 = vmax.f32 %v2116_v57, 0.0  ;;  %v6851_v42 = vmul.f32 0.0051020407, %v1738_v54  ;;  %v6863_v23 = vmul.f32 0.0051020407, %v1070_v3 }
 0x1fa   :  { %v6861_v47 = vmul.f32 %v6853_v22, %v6763_v20  ;;  %v2451_v20 = vld [vmem:[%s9377_s3 + $0x60] sm:$0xff] }
 0x1fb   :  { %v2284_v15 = vadd.f32 1e-05, %v2200_v62  ;;  %1809 = vadd.xlane.f32.xlu1 %v6178_v10  ;;  %1141 = vadd.xlane.f32.xlu0 %v6189_v45  ;;  %v2033_v10 = vmul.f32 %v6863_v23, %v6863_v23 }
 0x1fc   :  { %v1238_v38 = vpop.xlane.xlu0 %1237  ;;  %v1074_v30 = vpop.xlane.xlu1 %1073 }
 0x1fd   :  { %4361 = vrsqrt.f32 %v2284_v15  ;;  %v6867_v57 = vmul.f32 0.0051020407, %v1238_v38  ;;  %v6871_v45 = vmul.f32 0.0051020407, %v1074_v30  ;;  %v9925_v15 = vld [vmem:[#allocation152_spill] sm:$0xff] }
 0x1ff   :  { %1309 = vadd.xlane.f32.xlu0 %v6217_v28  ;;  %1145 = vadd.xlane.f32.xlu1 %v6220_v55  ;;  %9924 = vst [vmem:[#allocation233_spill] sm:$0xff] %v6867_v57  ;;  %v6880_v28 = vmul.f32 %v6867_v57, %v6867_v57 }
 0x200   :  { %v1574_v58 = vpop.xlane.xlu0 %1573  ;;  %v1242_v51 = vpop.xlane.xlu1 %1241 }
 0x201   :  { %v1949_v54 = vmul.f32 0.0051020407, %v1574_v58  ;;  %9926 = vst [vmem:[#allocation152_spill] sm:$0xff] %v6880_v28  ;;  %v6882_v55 = vmul.f32 0.0051020407, %v1242_v51  ;;  %v2034_v58 = vmul.f32 %v6871_v45, %v6871_v45  ;;  %v9933_v51 = vld [vmem:[#allocation159_spill] sm:$0xff] }
 0x202   :  { %v9937_v28 = vld [vmem:[#allocation164_spill] sm:$0xff] }
 0x203   :  { %v4360_v3 = vpop.eup %4359  ;;  %v2117_v62 = vsub.f32 %v1949_v54, %v2033_v10  ;;  %1645 = vadd.xlane.f32.xlu0 %v9925_v15  ;;  %1313 = vadd.xlane.f32.xlu1 %v6239_v6  ;;  %9927 = vst [vmem:[#allocation234_spill] sm:$0xff] %v6882_v55 }
 0x204   :  { %v1742_v38 = vpop.xlane.xlu0 %1741  ;;  %v1578_v30 = vpop.xlane.xlu1 %1577  ;;  %v6884_v35 = vmul.f32 %v4360_v3, %v2451_v20  ;;  %v9931_v20 = vld [vmem:[#allocation155_spill] sm:$0xff] }
 0x205   :  { %v2201_v5 = vmax.f32 %v2117_v62, 0.0  ;;  %v6888_v49 = vmul.f32 0.0051020407, %v1742_v38  ;;  %v1950_v10 = vmul.f32 0.0051020407, %v1578_v30  ;;  %v2452_v3 = vld [vmem:[%s9377_s3 + $0x68] sm:$0xff] }
 0x206   :  { %9928 = vst [vmem:[#allocation235_spill] sm:$0xff] %v6884_v35  ;;  %v6892_v6 = vmul.f32 %v6884_v35, %v6809_v26  ;;  %v6903_v26 = vmul.f32 %v6882_v55, %v6882_v55 }
 0x207   :  { %9929 = vst [vmem:[#allocation236_spill] sm:$0xff] %v6888_v49  ;;  %v2285_v54 = vadd.f32 1e-05, %v2201_v5  ;;  %v2118_v15 = vsub.f32 %v1950_v10, %v2034_v58  ;;  %1813 = vadd.xlane.f32.xlu0 %v6225_v44  ;;  %1649 = vadd.xlane.f32.xlu1 %v9931_v20  ;;  %v4362_v62 = vpop.eup %4361  ;;  %v9932_v20 = vld [vmem:[#allocation156_spill] sm:$0xff] }
 0x208   :  { %9930 = vst [vmem:[#allocation237_spill] sm:$0xff] %v6892_v6  ;;  %v1746_v38 = vpop.xlane.xlu1 %1745  ;;  %v1078_v30 = vpop.xlane.xlu0 %1077  ;;  %v6907_v58 = vmul.f32 %v4362_v62, %v2452_v3  ;;  %v9935_v3 = vld [vmem:[#allocation165_spill] sm:$0xff]  ;;  %v9936_v62 = vld [vmem:[#allocation167_spill] sm:$0xff] }
 0x209   :  { %4363 = vrsqrt.f32 %v2285_v54  ;;  %v2202_v5 = vmax.f32 %v2118_v15, 0.0  ;;  %v6905_v57 = vmul.f32 0.0051020407, %v1746_v38  ;;  %v1867_v15 = vmul.f32 0.0051020407, %v1078_v30 }
 0x20a   :  { %v6919_v55 = vmul.f32 %v6907_v58, %v6817_v60  ;;  %v9938_v60 = vld [vmem:[#allocation171_spill] sm:$0xff] }
 0x20b   :  { %v2286_v44 = vadd.f32 1e-05, %v2202_v5  ;;  %1817 = vadd.xlane.f32.xlu1 %v9932_v20  ;;  %1149 = vadd.xlane.f32.xlu0 %v9933_v51  ;;  %v2035_v20 = vmul.f32 %v1867_v15, %v1867_v15  ;;  %v2453_v51 = vld [vmem:[%s9377_s3 + $0x70] sm:$0xff] }
 0x20c   :  { %v6913_v6 = vpop.xlane.xlu0 %1245  ;;  %v6915_v54 = vpop.xlane.xlu1 %1081 }
 0x20d   :  { %9934 = vst [vmem:[#allocation155_spill] sm:$0xff] %v6913_v6  ;;  %4365 = vrsqrt.f32 %v2286_v44 }
 0x20f   :  { %1317 = vadd.xlane.f32.xlu0 %v9935_v3  ;;  %1153 = vadd.xlane.f32.xlu1 %v9936_v62 }
 0x210   :  { %v1582_v38 = vpop.xlane.xlu0 %1581  ;;  %v6923_v5 = vpop.xlane.xlu1 %1249 }
 0x211   :  { %v1951_v10 = vmul.f32 0.0051020407, %v1582_v38 }
 0x213   :  { %v4364_v35 = vpop.eup %4363  ;;  %v2119_v6 = vsub.f32 %v1951_v10, %v2035_v20  ;;  %1653 = vadd.xlane.f32.xlu0 %v9937_v28  ;;  %1321 = vadd.xlane.f32.xlu1 %v9938_v60  ;;  %v2454_v28 = vld [vmem:[%s9377_s3 + $0x78] sm:$0xff] }
 0x214   :  { %v6930_v30 = vpop.xlane.xlu0 %1749  ;;  %v6932_v44 = vpop.xlane.xlu1 %1585  ;;  %v6934_v3 = vmul.f32 %v4364_v35, %v2453_v51 }
 0x215   :  { %9939 = vst [vmem:[#allocation156_spill] sm:$0xff] %v6930_v30  ;;  %v2203_v62 = vmax.f32 %v2119_v6, 0.0  ;;  %v9945_v6 = vld [vmem:[#allocation174_spill] sm:$0xff] }
 0x216   :  { %9940 = vst [vmem:[#allocation159_spill] sm:$0xff] %v6934_v3  ;;  %v6938_v38 = vmul.f32 %v6934_v3, %v6863_v23  ;;  %v9946_v23 = vld [vmem:[#allocation181_spill] sm:$0xff] }
 0x217   :  { %v2287_v49 = vadd.f32 1e-05, %v2203_v62  ;;  %1821 = vadd.xlane.f32.xlu0 %v9942_v48  ;;  %1657 = vadd.xlane.f32.xlu1 %v9943_v27  ;;  %v4366_v10 = vpop.eup %4365  ;;  %v9948_v62 = vld [vmem:[#allocation188_spill] sm:$0xff] }
 0x218   :  { %9941 = vst [vmem:[#allocation165_spill] sm:$0xff] %v6938_v38  ;;  %v6945_v20 = vpop.xlane.xlu1 %1753  ;;  %v6947_v60 = vpop.xlane.xlu0 %1085  ;;  %v6949_v35 = vmul.f32 %v4366_v10, %v2454_v28  ;;  %v2455_v28 = vld [vmem:[%s9377_s3 + $0x80] sm:$0xff] }
 0x219   :  { %9944 = vst [vmem:[#allocation167_spill] sm:$0xff] %v6947_v60  ;;  %4367 = vrsqrt.f32 %v2287_v49  ;;  %v9982_v60 = vld [vmem:[#allocation215_spill] sm:$0xff] }
 0x21a   :  { %v6959_v27 = vmul.f32 %v6949_v35, %v6871_v45 }
 0x21b   :  { %1825 = vadd.xlane.f32.xlu1 %v9945_v6  ;;  %1157 = vadd.xlane.f32.xlu0 %v9946_v23 }
 0x21c   :  { %v6953_v51 = vpop.xlane.xlu0 %1253  ;;  %v6955_v48 = vpop.xlane.xlu1 %1089 }
 0x21d   :  { %9947 = vst [vmem:[#allocation164_spill] sm:$0xff] %v6953_v51 }
 0x21f   :  { %1325 = vadd.xlane.f32.xlu0 %v6406_v17  ;;  %1161 = vadd.xlane.f32.xlu1 %v9948_v62 }
 0x220   :  { %v6963_v38 = vpop.xlane.xlu0 %1589  ;;  %v6965_v49 = vpop.xlane.xlu1 %1257 }
 0x221   :  { %9949 = vst [vmem:[#allocation171_spill] sm:$0xff] %v6963_v38 }
 0x223   :  { %v4368_v10 = vpop.eup %4367  ;;  %1661 = vadd.xlane.f32.xlu0 %v6408_v19  ;;  %1329 = vadd.xlane.f32.xlu1 %v6416_v39 }
 0x224   :  { %v6972_v6 = vpop.xlane.xlu0 %1757  ;;  %v6974_v45 = vpop.xlane.xlu1 %1593  ;;  %v6976_v17 = vmul.f32 %v4368_v10, %v2455_v28  ;;  %v9961_v10 = vld [vmem:[#allocation176_spill] sm:$0xff] }
 0x225   :  { %9950 = vst [vmem:[#allocation172_spill] sm:$0xff] %v6972_v6 }
 0x226   :  { %9951 = vst [vmem:[#allocation169_spill] sm:$0xff] %v6976_v17  ;;  %v6979_v23 = vmul.f32 %v6976_v17, %v1867_v15 }
 0x227   :  { %1829 = vadd.xlane.f32.xlu0 %v6427_v12  ;;  %1665 = vadd.xlane.f32.xlu1 %v6431_v25 }
 0x228   :  { %9952 = vst [vmem:[#allocation174_spill] sm:$0xff] %v6979_v23  ;;  %v6983_v62 = vpop.xlane.xlu1 %1761  ;;  %v6985_v3 = vpop.xlane.xlu0 %1093 }
 0x229   :  { %9953 = vst [vmem:[#allocation181_spill] sm:$0xff] %v6985_v3  ;;  %v9976_v3 = vld [vmem:[#allocation197_spill] sm:$0xff] }
 0x22b   :  { %1833 = vadd.xlane.f32.xlu1 %v6433_v21  ;;  %1165 = vadd.xlane.f32.xlu0 %v6460_v63 }
 0x22c   :  { %v6989_v39 = vpop.xlane.xlu0 %1261  ;;  %v6991_v19 = vpop.xlane.xlu1 %1097 }
 0x22d   :  { %9954 = vst [vmem:[#allocation188_spill] sm:$0xff] %v6989_v39 }
 0x22f   :  { %1333 = vadd.xlane.f32.xlu0 %v6521_v40  ;;  %1169 = vadd.xlane.f32.xlu1 %v6526_v14  ;;  %v9958_v14 = vld [vmem:[#allocation101_spill] sm:$0xff] }
 0x230   :  { %v6995_v15 = vpop.xlane.xlu0 %1597  ;;  %v6997_v12 = vpop.xlane.xlu1 %1265 }
 0x231   :  { %9955 = vst [vmem:[#allocation238_spill] sm:$0xff] %v6995_v15 }
 0x233   :  { %1669 = vadd.xlane.f32.xlu0 %v6535_v37  ;;  %1337 = vadd.xlane.f32.xlu1 %v6538_v31  ;;  %v9960_v31 = vld [vmem:[#allocation177_spill] sm:$0xff] }
 0x234   :  { %v7001_v25 = vpop.xlane.xlu0 %1765  ;;  %v7003_v21 = vpop.xlane.xlu1 %1601  ;;  %v9962_v23 = vsub.f32 %v9960_v31, %v9961_v10  ;;  %v9969_v31 = vld [vmem:[#allocation178_spill] sm:$0xff]  ;;  %v9970_v10 = vld [vmem:[#allocation175_spill] sm:$0xff] }
 0x235   :  { %9956 = vst [vmem:[#allocation239_spill] sm:$0xff] %v7001_v25  ;;  %v9963_v25 = vld [vmem:[#allocation224_spill] sm:$0xff] }
 0x236   :  { %v2229_v17 = vmax.f32 %v9962_v23, 0.0 }
 0x237   :  { %1837 = vadd.xlane.f32.xlu0 %v6545_v1  ;;  %1673 = vadd.xlane.f32.xlu1 %v6550_v29  ;;  %v9964_v1 = vld [vmem:[#allocation105_spill] sm:$0xff] }
 0x238   :  { %v7007_v63 = vpop.xlane.xlu1 %1769  ;;  %v7009_v40 = vpop.xlane.xlu0 %1101 }
 0x239   :  { %9957 = vst [vmem:[#allocation240_spill] sm:$0xff] %v7009_v40  ;;  %v2313_v40 = vadd.f32 1e-05, %v2229_v17 }
 0x23b   :  { %1841 = vadd.xlane.f32.xlu1 %v6559_v41  ;;  %1173 = vadd.xlane.f32.xlu0 %v9958_v14  ;;  %v9966_v41 = vld [vmem:[#allocation103_spill] sm:$0xff]  ;;  %4369 = vrsqrt.f32 %v2313_v40  ;;  %v2481_v40 = vld [vmem:[%s9377_s3 + $0x150] sm:$0xff] }
 0x23c   :  { %v7013_v28 = vpop.xlane.xlu0 %1269  ;;  %v7015_v37 = vpop.xlane.xlu1 %1105 }
 0x23d   :  { %9959 = vst [vmem:[#allocation101_spill] sm:$0xff] %v7013_v28 }
 0x23f   :  { %1341 = vadd.xlane.f32.xlu0 %v9963_v25  ;;  %1177 = vadd.xlane.f32.xlu1 %v9964_v1  ;;  %v9971_v1 = vsub.f32 %v9969_v31, %v9970_v10 }
 0x240   :  { %v7022_v29 = vpop.xlane.xlu0 %1605  ;;  %v7024_v39 = vpop.xlane.xlu1 %1273 }
 0x241   :  { %9965 = vst [vmem:[#allocation177_spill] sm:$0xff] %v7022_v29  ;;  %v2230_v29 = vmax.f32 %v9971_v1, 0.0 }
 0x243   :  { %1677 = vadd.xlane.f32.xlu0 %v6644_v32  ;;  %1345 = vadd.xlane.f32.xlu1 %v9966_v41  ;;  %v2314_v41 = vadd.f32 1e-05, %v2230_v29 }
 0x244   :  { %v7028_v14 = vpop.xlane.xlu0 %1773  ;;  %v7030_v28 = vpop.xlane.xlu1 %1609 }
 0x245   :  { %9967 = vst [vmem:[#allocation176_spill] sm:$0xff] %v7028_v14  ;;  %v4370_v15 = vpop.eup %4369  ;;  %4371 = vrsqrt.f32 %v2314_v41 }
 0x246   :  { %v7054_v10 = vmul.f32 %v4370_v15, %v2481_v40  ;;  %v2482_v15 = vld [vmem:[%s9377_s3 + $0x158] sm:$0xff]  ;;  %v9985_v40 = vld [vmem:[#allocation192_spill] sm:$0xff] }
 0x247   :  { %1845 = vadd.xlane.f32.xlu0 %v6654_v53 }
 0x248   :  { %v7033_v23 = vpop.xlane.xlu1 %1777  ;;  %v7035_v25 = vpop.xlane.xlu0 %1109  ;;  %9978 = vst [vmem:[#allocation175_spill] sm:$0xff] %v7054_v10 }
 0x249   :  { %9968 = vst [vmem:[#allocation224_spill] sm:$0xff] %v7035_v25  ;;  %v9975_v25 = vld [vmem:[#allocation198_spill] sm:$0xff] }
 0x24a   :  { %v9977_v6 = vsub.f32 %v9975_v25, %v9976_v3 }
 0x24c   :  { %v7040_v17 = vpop.xlane.xlu0 %1277  ;;  %v7042_v32 = vpop.xlane.xlu1 %1113  ;;  %v2232_v31 = vmax.f32 %v9977_v6, 0.0 }
 0x24d   :  { %9972 = vst [vmem:[#allocation105_spill] sm:$0xff] %v7040_v17 }
 0x24e   :  { %v2316_v29 = vadd.f32 1e-05, %v2232_v31 }
 0x24f   :  { %v4372_v9 = vpop.eup %4371 }
 0x250   :  { %v7047_v14 = vpop.xlane.xlu0 %1613  ;;  %v7049_v53 = vpop.xlane.xlu1 %1281  ;;  %4373 = vrsqrt.f32 %v2316_v29  ;;  %v9986_v29 = vsub.f32 %v6672_v52, %v6668_v59  ;;  %v9989_v52 = vsub.f32 %v6696_v11, %v6694_v13 }
 0x251   :  { %9973 = vst [vmem:[#allocation103_spill] sm:$0xff] %v7047_v14  ;;  %9974 = vst [vmem:[#allocation178_spill] sm:$0xff] %v7049_v53  ;;  %v9981_v14 = vld [vmem:[#allocation216_spill] sm:$0xff] }
 0x252   :  { %v9983_v41 = vsub.f32 %v9981_v14, %v9982_v60  ;;  %v2608_v60 = vld [vmem:[%s9378_s4 + $0x8] sm:$0xff] }
 0x254   :  { %v7056_v1 = vpop.xlane.xlu0 %1781  ;;  %v7058_v17 = vpop.xlane.xlu1 %1617  ;;  %3071 = vperm.xlu1 %4336, %v7054_v10   ;;  %v2234_v30 = vmax.f32 %v9983_v41, 0.0  ;;  %v2194_v10 = vmax.f32 %v9986_v29, 0.0 }
 0x255   :  { %9979 = vst [vmem:[#allocation198_spill] sm:$0xff] %v7056_v1  ;;  %v7077_v1 = vmul.f32 %v4372_v9, %v2482_v15  ;;  %v2236_v9 = vmax.f32 %v9989_v52, 0.0 }
 0x256   :  { %v2318_v31 = vadd.f32 1e-05, %v2234_v30  ;;  %v2278_v59 = vadd.f32 1e-05, %v2194_v10  ;;  %v9990_v30 = vld [vmem:[#allocation207_spill] sm:$0xff] }
 0x257   :  { %9987 = vst [vmem:[#allocation215_spill] sm:$0xff] %v7077_v1  ;;  %v2776_v15 = vsub.f32 %v2608_v60, %v9990_v30  ;;  %v2320_v13 = vadd.f32 1e-05, %v2236_v9  ;;  %v2610_v30 = vld [vmem:[%s9378_s4 + $0x18] sm:$0xff] }
 0x258   :  { %v7061_v51 = vpop.xlane.xlu1 %1785  ;;  %v1118_v38 = vpop.xlane.xlu0 %1117  ;;  %4375 = vrsqrt.f32 %v2318_v31 }
 0x259   :  { %9980 = vst [vmem:[#allocation197_spill] sm:$0xff] %v7061_v51  ;;  %v7071_v25 = vmul.f32 0.0051020407, %v1118_v38  ;;  %4377 = vrsqrt.f32 %v2278_v59  ;;  %v2778_v59 = vsub.f32 %v2610_v30, %v6662_v43 }
 0x25a   :  { %v4374_v51 = vpop.eup %4373 }
 0x25b   :  { %v2045_v38 = vmul.f32 %v7071_v25, %v7071_v25 }
 0x25c   :  { %v7066_v3 = vpop.xlane.xlu0 %1285  ;;  %v1122_v6 = vpop.xlane.xlu1 %1121 }
 0x25d   :  { %9984 = vst [vmem:[#allocation216_spill] sm:$0xff] %v7066_v3  ;;  %2861 = vperm.xlu0 %4335, %v9985_v40   ;;  %v7086_v3 = vmul.f32 0.0051020407, %v1122_v6  ;;  %v2484_v6 = vld [vmem:[%s9377_s3 + $0x168] sm:$0xff] }
 0x25e   :  { %v7100_v60 = vmul.f32 %v4374_v51, %v2484_v6  ;;  %v9993_v6 = vsub.f32 %v6749_v46, %v6747_v16  ;;  %v2465_v16 = vld [vmem:[%s9377_s3 + $0xd0] sm:$0xff] }
 0x260   :  { %v1622_v14 = vpop.xlane.xlu0 %1621  ;;  %v7082_v41 = vpop.xlane.xlu1 %1289  ;;  %9991 = vst [vmem:[#allocation207_spill] sm:$0xff] %v7100_v60 }
 0x261   :  { %9988 = vst [vmem:[#allocation192_spill] sm:$0xff] %v7082_v41  ;;  %v1961_v40 = vmul.f32 0.0051020407, %v1622_v14  ;;  %3076 = vperm.xlu0 %4335, %v7077_v1   ;;  %v2046_v14 = vmul.f32 %v7086_v3, %v7086_v3 }
 0x262   :  { %v4376_v9 = vpop.eup %4375 }
 0x263   :  { %v2129_v29 = vsub.f32 %v1961_v40, %v2045_v38 }
 0x264   :  { %v7093_v53 = vpop.xlane.xlu0 %1789  ;;  %v1626_v41 = vpop.xlane.xlu1 %1625 }
 0x265   :  { %v2213_v31 = vmax.f32 %v2129_v29, 0.0  ;;  %v1962_v10 = vmul.f32 0.0051020407, %v1626_v41  ;;  %3454 = vperm.xlu0 %4335, %v2776_v15   ;;  %v2486_v29 = vld [vmem:[%s9377_s3 + $0x178] sm:$0xff] }
 0x267   :  { %v2297_v11 = vadd.f32 1e-05, %v2213_v31  ;;  %v2130_v52 = vsub.f32 %v1962_v10, %v2046_v14  ;;  %v2238_v14 = vmax.f32 %v9993_v6, 0.0  ;;  %v7119_v31 = vmul.f32 %v4376_v9, %v2486_v29  ;;  %v4378_v10 = vpop.eup %4377 }
 0x268   :  { %v7102_v38 = vpop.xlane.xlu1 %1793  ;;  %v7104_v40 = vpop.xlane.xlu0 %1125 }
 0x269   :  { %4379 = vrsqrt.f32 %v2297_v11  ;;  %v2214_v1 = vmax.f32 %v2130_v52, 0.0  ;;  %3086 = vperm.xlu0 %4335, %v7100_v60   ;;  %9994 = vst [vmem:[#allocation242_spill] sm:$0xff] %v7119_v31  ;;  %v2446_v11 = vld [vmem:[%s9377_s3 + $0x38] sm:$0xff]  ;;  %v2322_v46 = vadd.f32 1e-05, %v2238_v14 }
 0x26a   :  { %4381 = vrsqrt.f32 %v2320_v13  ;;  %v2612_v13 = vld [vmem:[%s9378_s4 + $0x28] sm:$0xff] }
 0x26b   :  { %v2298_v41 = vadd.f32 1e-05, %v2214_v1 }
 0x26c   :  { %v7111_v15 = vpop.xlane.xlu0 %1293  ;;  %v1130_v51 = vpop.xlane.xlu1 %1129 }
 0x26d   :  { %9992 = vst [vmem:[#allocation241_spill] sm:$0xff] %v7111_v15  ;;  %3464 = vperm.xlu0 %4335, %v2778_v59   ;;  %4383 = vrsqrt.f32 %v2298_v41  ;;  %v7131_v52 = vmul.f32 0.0051020407, %v1130_v51  ;;  %v2780_v41 = vsub.f32 %v2612_v13, %v6708_v56  ;;  %v7138_v59 = vmul.f32 %v4378_v10, %v2446_v11  ;;  %v2488_v51 = vld [vmem:[%s9377_s3 + $0x188] sm:$0xff]  ;;  %v2466_v11 = vld [vmem:[%s9377_s3 + $0xd8] sm:$0xff] }
 0x26e   :  { %4385 = vrsqrt.f32 %v2322_v46 }
 0x26f   :  { %v2698_v13 = vmul.f32 %v7138_v59, %v6634_v24  ;;  %v9998_v24 = vsub.f32 %v6797_v8, %v6795_v61 }
 0x270   :  { %v7121_v1 = vpop.xlane.xlu0 %1629  ;;  %v7123_v43 = vpop.xlane.xlu1 %1297 }
 0x271   :  { %3096 = vperm.xlu0 %4335, %v7119_v31   ;;  %v2048_v31 = vmul.f32 %v7131_v52, %v7131_v52 }
 0x273   :  { %v4380_v30 = vpop.eup %4379 }
 0x274   :  { %v4382_v9 = vpop.eup %4381  ;;  %v7140_v29 = vpop.xlane.xlu0 %1797  ;;  %v7145_v60 = vmul.f32 %v4380_v30, %v2465_v16 }
 0x275   :  { %v1634_v6 = vpop.xlane.xlu1 %1633  ;;  %3474 = vperm.xlu0 %4335, %v2780_v41   ;;  %v7153_v10 = vmul.f32 %v4382_v9, %v2488_v51 }
 0x276   :  { %9995 = vst [vmem:[#allocation243_spill] sm:$0xff] %v7145_v60  ;;  %v1964_v15 = vmul.f32 0.0051020407, %v1634_v6  ;;  %v7151_v56 = vmul.f32 %v7145_v60, %v7071_v25  ;;  %v2614_v25 = vld [vmem:[%s9378_s4 + $0x38] sm:$0xff] }
 0x277   :  { %9997 = vst [vmem:[#allocation245_spill] sm:$0xff] %v7153_v10  ;;  %v4384_v16 = vpop.eup %4383  ;;  %v2782_v9 = vsub.f32 %v2614_v25, %v2698_v13  ;;  %v2490_v13 = vld [vmem:[%s9377_s3 + $0x198] sm:$0xff] }
 0x278   :  { %9996 = vst [vmem:[#allocation244_spill] sm:$0xff] %v7151_v56  ;;  %v2132_v14 = vsub.f32 %v1964_v15, %v2048_v31  ;;  %v7162_v6 = vpop.xlane.xlu0 %1133  ;;  %1681 = vadd.xlane.f32.xlu1 %v6689_v50  ;;  %v2240_v31 = vmax.f32 %v9998_v24, 0.0  ;;  %v7172_v46 = vmul.f32 %v4384_v16, %v2466_v11  ;;  %v10000_v11 = vld [vmem:[#allocation193_spill] sm:$0xff] }
 0x279   :  { %v7160_v30 = vpop.xlane.xlu1 %1801  ;;  %3106 = vperm.xlu0 %4335, %v7153_v10   ;;  %v4386_v10 = vpop.eup %4385 }
 0x27a   :  { %v2216_v15 = vmax.f32 %v2132_v14, 0.0  ;;  %v7181_v50 = vmul.f32 %v7172_v46, %v7086_v3  ;;  %v2324_v14 = vadd.f32 1e-05, %v2240_v31  ;;  %v7194_v3 = vmul.f32 %v4386_v10, %v2490_v13  ;;  %v2616_v31 = vld [vmem:[%s9378_s4 + $0x48] sm:$0xff] }
 0x27b   :  { %v2468_v10 = vld [vmem:[%s9377_s3 + $0xe8] sm:$0xff] }
 0x27c   :  { %v2300_v41 = vadd.f32 1e-05, %v2216_v15  ;;  %v7174_v51 = vpop.xlane.xlu0 %1301  ;;  %1849 = vadd.xlane.f32.xlu1 %v6704_v7  ;;  %9999 = vst [vmem:[#allocation246_spill] sm:$0xff] %v7181_v50  ;;  %v10001_v7 = vld [vmem:[#allocation190_spill] sm:$0xff]  ;;  %10003 = vst [vmem:[#allocation193_spill] sm:$0xff] %v7194_v3 }
 0x27d   :  { %v7176_v56 = vpop.xlane.xlu1 %1137  ;;  %3484 = vperm.xlu0 %4335, %v2782_v9   ;;  %v10002_v16 = vsub.f32 %v10000_v11, %v10001_v7  ;;  %v2784_v11 = vsub.f32 %v2616_v31, %v6807_v36  ;;  %v2492_v36 = vld [vmem:[%s9377_s3 + $0x1a8] sm:$0xff] }
 0x27e   :  { %4387 = vrsqrt.f32 %v2300_v41 }
 0x27f   :  { %v2231_v25 = vmax.f32 %v10002_v16, 0.0  ;;  %4389 = vrsqrt.f32 %v2324_v14 }
 0x280   :  { %v7183_v8 = vpop.xlane.xlu0 %1637 }
 0x281   :  { %v7185_v61 = vpop.xlane.xlu1 %1305  ;;  %2906 = vperm.xlu0 %4335, %v6799_v0   ;;  %v2315_v41 = vadd.f32 1e-05, %v2231_v25  ;;  %v10004_v0 = vsub.f32 %v6851_v42, %v6849_v18  ;;  %v2607_v42 = vld [vmem:[%s9378_s4] sm:$0xff] }
 0x283   :  { %v2242_v9 = vmax.f32 %v10004_v0, 0.0  ;;  %4391 = vrsqrt.f32 %v2315_v41  ;;  %v10007_v41 = vld [vmem:[#allocation204_spill] sm:$0xff] }
 0x284   :  { %v7196_v15 = vpop.xlane.xlu0 %1805 }
 0x285   :  { %v7198_v24 = vpop.xlane.xlu1 %1641  ;;  %3116 = vperm.xlu0 %4335, %v7194_v3   ;;  %v2326_v16 = vadd.f32 1e-05, %v2242_v9  ;;  %v10009_v9 = vld [vmem:[#allocation196_spill] sm:$0xff] }
 0x287   :  { %4393 = vrsqrt.f32 %v2326_v16  ;;  %v10014_v16 = vsub.f32 %v6905_v57, %v6903_v26  ;;  %v2483_v57 = vld [vmem:[%s9377_s3 + $0x160] sm:$0xff] }
 0x288   :  { %v4388_v14 = vpop.eup %4387  ;;  %v7213_v7 = vpop.xlane.xlu0 %1141 }
 0x289   :  { %v7211_v13 = vpop.xlane.xlu1 %1809  ;;  %3494 = vperm.xlu0 %4335, %v2784_v11   ;;  %v7215_v3 = vmul.f32 %v4388_v14, %v2468_v10  ;;  %v4390_v25 = vpop.eup %4389  ;;  %v2775_v11 = vsub.f32 %v2607_v42, %v10009_v9  ;;  %v7237_v10 = vmul.f32 0.0051020407, %v6915_v54  ;;  %v2244_v54 = vmax.f32 %v10014_v16, 0.0 }
 0x28a   :  { %v7233_v0 = vmul.f32 %v4390_v25, %v2492_v36  ;;  %v1952_v25 = vmul.f32 0.0051020407, %v6932_v44  ;;  %v10017_v44 = vld [vmem:[#allocation210_spill] sm:$0xff] }
 0x28b   :  { %v7229_v31 = vmul.f32 %v7215_v3, %v7131_v52  ;;  %v2618_v52 = vld [vmem:[%s9378_s4 + $0x58] sm:$0xff]  ;;  %v2036_v9 = vmul.f32 %v7237_v10, %v7237_v10 }
 0x28c   :  { %v7217_v60 = vpop.xlane.xlu0 %1309  ;;  %10008 = vst [vmem:[#allocation204_spill] sm:$0xff] %v7233_v0  ;;  %v2786_v36 = vsub.f32 %v2618_v52, %v6861_v47  ;;  %v2328_v47 = vadd.f32 1e-05, %v2244_v54  ;;  %v1994_v52 = vmul.f32 0.0051020407, %v6945_v20 }
 0x28d   :  { %10005 = vst [vmem:[#allocation190_spill] sm:$0xff] %v7217_v60  ;;  %v7219_v18 = vpop.xlane.xlu1 %1145  ;;  %10006 = vst [vmem:[#allocation247_spill] sm:$0xff] %v7229_v31  ;;  %2916 = vperm.xlu0 %4335, %v6853_v22   ;;  %2866 = vperm.xlu1 %4336, %v10007_v41   ;;  %v10011_v31 = vld [vmem:[#allocation211_spill] sm:$0xff]  ;;  %v10012_v22 = vld [vmem:[#allocation208_spill] sm:$0xff]  ;;  %v4392_v42 = vpop.eup %4391 }
 0x28e   :  { %v10013_v60 = vsub.f32 %v10011_v31, %v10012_v22  ;;  %v7269_v22 = vmul.f32 %v4392_v42, %v2483_v57  ;;  %v2620_v57 = vld [vmem:[%s9378_s4 + $0x68] sm:$0xff] }
 0x290   :  { %v7239_v14 = vpop.xlane.xlu0 %1645  ;;  %v2233_v41 = vmax.f32 %v10013_v60, 0.0  ;;  %10018 = vst [vmem:[#allocation210_spill] sm:$0xff] %v7269_v22 }
 0x291   :  { %10010 = vst [vmem:[#allocation196_spill] sm:$0xff] %v7239_v14  ;;  %v7241_v50 = vpop.xlane.xlu1 %1313  ;;  %3126 = vperm.xlu0 %4335, %v7233_v0   ;;  %3449 = vperm.xlu1 %4336, %v2775_v11   ;;  %v7258_v14 = vmul.f32 0.0051020407, %v6923_v5  ;;  %v2120_v11 = vsub.f32 %v1952_v25, %v2036_v9  ;;  %v4394_v5 = vpop.eup %4393 }
 0x292   :  { %v2317_v26 = vadd.f32 1e-05, %v2233_v41  ;;  %v2494_v41 = vld [vmem:[%s9377_s3 + $0x1b8] sm:$0xff] }
 0x293   :  { %10015 = vst [vmem:[#allocation211_spill] sm:$0xff] %v7258_v14  ;;  %v2078_v16 = vmul.f32 %v7258_v14, %v7258_v14  ;;  %v2204_v20 = vmax.f32 %v2120_v11, 0.0  ;;  %v7282_v25 = vmul.f32 %v4394_v5, %v2494_v41  ;;  %v10020_v11 = vld [vmem:[#allocation214_spill] sm:$0xff] }
 0x294   :  { %v7260_v31 = vpop.xlane.xlu0 %1813  ;;  %4395 = vrsqrt.f32 %v2317_v26 }
 0x295   :  { %10016 = vst [vmem:[#allocation208_spill] sm:$0xff] %v7260_v31  ;;  %v7262_v60 = vpop.xlane.xlu1 %1649  ;;  %3504 = vperm.xlu0 %4335, %v2786_v36   ;;  %2871 = vperm.xlu1 %4336, %v10017_v44   ;;  %4397 = vrsqrt.f32 %v2328_v47  ;;  %v2162_v54 = vsub.f32 %v1994_v52, %v2078_v16  ;;  %10019 = vst [vmem:[#allocation248_spill] sm:$0xff] %v7282_v25  ;;  %v7285_v36 = vmul.f32 0.0051020407, %v6955_v48  ;;  %v2288_v26 = vadd.f32 1e-05, %v2204_v20 }
 0x296   :  { %v1954_v48 = vmul.f32 0.0051020407, %v6974_v45  ;;  %v2788_v47 = vsub.f32 %v2620_v57, %v6919_v55  ;;  %v7305_v16 = vmul.f32 0.0051020407, %v6965_v49  ;;  %v1996_v57 = vmul.f32 0.0051020407, %v6983_v62 }
 0x297   :  { %v2246_v44 = vmax.f32 %v2162_v54, 0.0  ;;  %v2038_v5 = vmul.f32 %v7285_v36, %v7285_v36  ;;  %4399 = vrsqrt.f32 %v2288_v26  ;;  %v2485_v26 = vld [vmem:[%s9377_s3 + $0x170] sm:$0xff]  ;;  %v10024_v62 = vld [vmem:[#allocation226_spill] sm:$0xff] }
 0x298   :  { %v7275_v31 = vpop.xlane.xlu0 %1149  ;;  %10021 = vst [vmem:[#allocation214_spill] sm:$0xff] %v7305_v16  ;;  %v2080_v49 = vmul.f32 %v7305_v16, %v7305_v16 }
 0x299   :  { %v7273_v0 = vpop.xlane.xlu1 %1817  ;;  %2926 = vperm.xlu0 %4335, %v6907_v58   ;;  %3081 = vperm.xlu1 %4336, %v7269_v22   ;;  %v2609_v58 = vld [vmem:[%s9378_s4 + $0x10] sm:$0xff]  ;;  %v2330_v55 = vadd.f32 1e-05, %v2246_v44  ;;  %v2122_v45 = vsub.f32 %v1954_v48, %v2038_v5 }
 0x29a   :  { %v2777_v52 = vsub.f32 %v2609_v58, %v10020_v11 }
 0x29b   :  { %4401 = vrsqrt.f32 %v2330_v55  ;;  %v2206_v48 = vmax.f32 %v2122_v45, 0.0  ;;  %v1956_v45 = vmul.f32 0.0051020407, %v7003_v21  ;;  %v2611_v21 = vld [vmem:[%s9378_s4 + $0x20] sm:$0xff] }
 0x29c   :  { %v7287_v42 = vpop.xlane.xlu0 %1317 }
 0x29d   :  { %v7289_v9 = vpop.xlane.xlu1 %1153  ;;  %3136 = vperm.xlu0 %4335, %v7282_v25   ;;  %2876 = vperm.xlu1 %4336, %v6630_v2   ;;  %v10022_v2 = vld [vmem:[#allocation225_spill] sm:$0xff] }
 0x29e   :  { %v10023_v20 = vsub.f32 %v6670_v4, %v10022_v2  ;;  %v4396_v58 = vpop.eup %4395  ;;  %v2496_v4 = vld [vmem:[%s9377_s3 + $0x1c8] sm:$0xff]  ;;  %v7334_v2 = vmul.f32 0.0051020407, %v6991_v19 }
 0x29f   :  { %v4398_v11 = vpop.eup %4397  ;;  %v7331_v5 = vmul.f32 %v4396_v58, %v2485_v26  ;;  %v2456_v26 = vld [vmem:[%s9377_s3 + $0x88] sm:$0xff] }
 0x2a0   :  { %v7307_v41 = vpop.xlane.xlu0 %1653  ;;  %v2235_v54 = vmax.f32 %v10023_v20, 0.0  ;;  %v2040_v58 = vmul.f32 %v7334_v2, %v7334_v2 }
 0x2a1   :  { %v7309_v22 = vpop.xlane.xlu1 %1321  ;;  %3514 = vperm.xlu0 %4335, %v2788_v47   ;;  %3459 = vperm.xlu1 %4336, %v2777_v52   ;;  %v2164_v47 = vsub.f32 %v1996_v57, %v2080_v49  ;;  %v7329_v52 = vmul.f32 %v4398_v11, %v2496_v4  ;;  %10026 = vst [vmem:[#allocation226_spill] sm:$0xff] %v7331_v5  ;;  %v4400_v57 = vpop.eup %4399  ;;  %v7350_v11 = vmul.f32 0.0051020407, %v6997_v12  ;;  %v1998_v12 = vmul.f32 0.0051020407, %v7007_v63 }
 0x2a2   :  { %v2319_v44 = vadd.f32 1e-05, %v2235_v54  ;;  %v2290_v54 = vadd.f32 1e-05, %v2206_v48  ;;  %v2540_v48 = vmul.f32 %v4400_v57, %v2456_v26 }
 0x2a3   :  { %10025 = vst [vmem:[#allocation225_spill] sm:$0xff] %v7329_v52  ;;  %v2248_v55 = vmax.f32 %v2164_v47, 0.0  ;;  %10028 = vst [vmem:[#allocation250_spill] sm:$0xff] %v7350_v11  ;;  %v10031_v47 = vld [vmem:[#allocation227_spill] sm:$0xff] }
 0x2a4   :  { %v7317_v14 = vpop.xlane.xlu0 %1821  ;;  %4403 = vrsqrt.f32 %v2319_v44  ;;  %v2124_v44 = vsub.f32 %v1956_v45, %v2040_v58  ;;  %v2708_v58 = vmul.f32 %v2540_v48, %v7237_v10  ;;  %v10036_v10 = vld [vmem:[#allocation121_spill] sm:$0xff] }
 0x2a5   :  { %v7319_v25 = vpop.xlane.xlu1 %1657  ;;  %2936 = vperm.xlu0 %4335, %v6949_v35   ;;  %2881 = vperm.xlu1 %4336, %v10024_v62   ;;  %v2622_v35 = vld [vmem:[%s9378_s4 + $0x78] sm:$0xff]  ;;  %4405 = vrsqrt.f32 %v2290_v54  ;;  %v2332_v62 = vadd.f32 1e-05, %v2248_v55  ;;  %v10033_v54 = vsub.f32 %v6735_v33, %v6727_v34  ;;  %v2624_v34 = vld [vmem:[%s9378_s4 + $0x88] sm:$0xff]  ;;  %v2487_v33 = vld [vmem:[%s9377_s3 + $0x180] sm:$0xff] }
 0x2a6   :  { %v2790_v19 = vsub.f32 %v2622_v35, %v6959_v27  ;;  %v10030_v27 = vld [vmem:[#allocation110_spill] sm:$0xff]  ;;  %v2779_v35 = vsub.f32 %v2611_v21, %v10031_v47  ;;  %v2208_v63 = vmax.f32 %v2124_v44, 0.0  ;;  %v7381_v21 = vmul.f32 0.0051020407, %v7015_v37 }
 0x2a7   :  { %v2237_v55 = vmax.f32 %v10033_v54, 0.0  ;;  %4407 = vrsqrt.f32 %v2332_v62  ;;  %v1958_v62 = vmul.f32 0.0051020407, %v7030_v28  ;;  %v2792_v44 = vsub.f32 %v2624_v34, %v2708_v58 }
 0x2a8   :  { %v7338_v16 = vpop.xlane.xlu0 %1157  ;;  %v2000_v58 = vmul.f32 0.0051020407, %v7033_v23 }
 0x2a9   :  { %v7336_v20 = vpop.xlane.xlu1 %1825  ;;  %10027 = vst [vmem:[#allocation249_spill] sm:$0xff] %v7338_v16  ;;  %3146 = vperm.xlu0 %4335, %v7329_v52   ;;  %3091 = vperm.xlu1 %4336, %v7331_v5   ;;  %v4402_v5 = vpop.eup %4401  ;;  %v2082_v52 = vmul.f32 %v7350_v11, %v7350_v11 }
 0x2ab   :  { %v2166_v45 = vsub.f32 %v1998_v12, %v2082_v52  ;;  %v2321_v52 = vadd.f32 1e-05, %v2237_v55 }
 0x2ac   :  { %v7352_v49 = vpop.xlane.xlu0 %1325 }
 0x2ad   :  { %10029 = vst [vmem:[#allocation251_spill] sm:$0xff] %v7352_v49  ;;  %v7354_v4 = vpop.xlane.xlu1 %1161  ;;  %3524 = vperm.xlu0 %4335, %v2790_v19   ;;  %2886 = vperm.xlu1 %4336, %v10030_v27   ;;  %v2498_v19 = vld [vmem:[%s9377_s3 + $0x1d8] sm:$0xff]  ;;  %v2250_v37 = vmax.f32 %v2166_v45, 0.0  ;;  %4409 = vrsqrt.f32 %v2321_v52  ;;  %v2500_v52 = vld [vmem:[%s9377_s3 + $0x1e8] sm:$0xff] }
 0x2ae   :  { %v7377_v57 = vmul.f32 %v4402_v5, %v2498_v19  ;;  %v4404_v26 = vpop.eup %4403  ;;  %v2292_v5 = vadd.f32 1e-05, %v2208_v63  ;;  %v7401_v19 = vmul.f32 0.0051020407, %v7024_v39  ;;  %v2458_v63 = vld [vmem:[%s9377_s3 + $0x98] sm:$0xff] }
 0x2af   :  { %v7396_v12 = vmul.f32 %v4404_v26, %v2487_v33  ;;  %v2334_v28 = vadd.f32 1e-05, %v2250_v37  ;;  %v10041_v37 = vld [vmem:[#allocation229_spill] sm:$0xff] }
 0x2b0   :  { %v7367_v49 = vpop.xlane.xlu0 %1661  ;;  %10034 = vst [vmem:[#allocation227_spill] sm:$0xff] %v7377_v57  ;;  %10038 = vst [vmem:[#allocation253_spill] sm:$0xff] %v7401_v19  ;;  %4411 = vrsqrt.f32 %v2292_v5  ;;  %v2084_v34 = vmul.f32 %v7401_v19, %v7401_v19  ;;  %v2613_v5 = vld [vmem:[%s9378_s4 + $0x30] sm:$0xff] }
 0x2b1   :  { %10032 = vst [vmem:[#allocation110_spill] sm:$0xff] %v7367_v49  ;;  %v7369_v16 = vpop.xlane.xlu1 %1329  ;;  %2946 = vperm.xlu0 %4335, %v2540_v48   ;;  %3469 = vperm.xlu1 %4336, %v2779_v35   ;;  %10037 = vst [vmem:[#allocation121_spill] sm:$0xff] %v7396_v12  ;;  %v4406_v48 = vpop.eup %4405  ;;  %v2042_v35 = vmul.f32 %v7381_v21, %v7381_v21  ;;  %4413 = vrsqrt.f32 %v2334_v28 }
 0x2b2   :  { %v2542_v26 = vmul.f32 %v4406_v48, %v2458_v63  ;;  %v4408_v39 = vpop.eup %4407 }
 0x2b3   :  { %v2126_v45 = vsub.f32 %v1958_v62, %v2042_v35  ;;  %v10042_v62 = vld [vmem:[#allocation126_spill] sm:$0xff]  ;;  %v2168_v35 = vsub.f32 %v2000_v58, %v2084_v34  ;;  %v7428_v63 = vmul.f32 %v4408_v39, %v2500_v52 }
 0x2b4   :  { %v7383_v27 = vpop.xlane.xlu0 %1829  ;;  %v10043_v23 = vsub.f32 %v10041_v37, %v10042_v62  ;;  %v2710_v11 = vmul.f32 %v2542_v26, %v7285_v36  ;;  %v2626_v37 = vld [vmem:[%s9378_s4 + $0x98] sm:$0xff]  ;;  %v10047_v39 = vld [vmem:[#allocation178_spill] sm:$0xff] }
 0x2b5   :  { %10035 = vst [vmem:[#allocation252_spill] sm:$0xff] %v7383_v27  ;;  %v7385_v47 = vpop.xlane.xlu1 %1665  ;;  %3156 = vperm.xlu0 %4335, %v7377_v57   ;;  %2891 = vperm.xlu1 %4336, %v10036_v10   ;;  %v2210_v48 = vmax.f32 %v2126_v45, 0.0  ;;  %10044 = vst [vmem:[#allocation229_spill] sm:$0xff] %v7428_v63  ;;  %v7433_v57 = vmul.f32 0.0051020407, %v7042_v32  ;;  %v2252_v45 = vmax.f32 %v2168_v35, 0.0 }
 0x2b6   :  { %v2794_v36 = vsub.f32 %v2626_v37, %v2710_v11  ;;  %v7445_v34 = vmul.f32 0.0051020407, %v10047_v39  ;;  %v10050_v62 = vld [vmem:[#allocation133_spill] sm:$0xff] }
 0x2b7   :  { %v2294_v28 = vadd.f32 1e-05, %v2210_v48  ;;  %v4410_v58 = vpop.eup %4409  ;;  %v2044_v32 = vmul.f32 %v7433_v57, %v7433_v57  ;;  %v10051_v48 = vld [vmem:[#allocation197_spill] sm:$0xff] }
 0x2b8   :  { %v7405_v55 = vpop.xlane.xlu0 %1165  ;;  %v2002_v35 = vmul.f32 0.0051020407, %v10051_v48 }
 0x2b9   :  { %v7403_v54 = vpop.xlane.xlu1 %1833  ;;  %10039 = vst [vmem:[#allocation254_spill] sm:$0xff] %v7405_v55  ;;  %3534 = vperm.xlu0 %4335, %v2792_v44   ;;  %3101 = vperm.xlu1 %4336, %v7396_v12   ;;  %v2239_v44 = vmax.f32 %v10043_v23, 0.0  ;;  %v10045_v12 = vld [vmem:[#allocation228_spill] sm:$0xff]  ;;  %v2336_v23 = vadd.f32 1e-05, %v2252_v45 }
 0x2ba   :  { %v2781_v19 = vsub.f32 %v2613_v5, %v10045_v12  ;;  %v1960_v12 = vmul.f32 0.0051020407, %v7058_v17  ;;  %10048 = vst [vmem:[#allocation228_spill] sm:$0xff] %v7445_v34  ;;  %v2489_v17 = vld [vmem:[%s9377_s3 + $0x190] sm:$0xff] }
 0x2bb   :  { %v7461_v39 = vmul.f32 %v4410_v58, %v2489_v17 }
 0x2bc   :  { %v7414_v33 = vpop.xlane.xlu0 %1333 }
 0x2bd   :  { %10040 = vst [vmem:[#allocation255_spill] sm:$0xff] %v7414_v33  ;;  %v7416_v10 = vpop.xlane.xlu1 %1169  ;;  %2956 = vperm.xlu0 %4335, %v2542_v26   ;;  %2896 = vperm.xlu1 %4336, %v7138_v59   ;;  %v2323_v59 = vadd.f32 1e-05, %v2239_v44  ;;  %v4412_v26 = vpop.eup %4411  ;;  %v2128_v44 = vsub.f32 %v1960_v12, %v2044_v32  ;;  %10052 = vst [vmem:[#allocation133_spill] sm:$0xff] %v7461_v39  ;;  %v2502_v12 = vld [vmem:[%s9377_s3 + $0x1f8] sm:$0xff] }
 0x2bf   :  { %4415 = vrsqrt.f32 %v2323_v59  ;;  %v10054_v59 = vld [vmem:[#allocation138_spill] sm:$0xff] }
 0x2c0   :  { %v7435_v33 = vpop.xlane.xlu0 %1669  ;;  %4417 = vrsqrt.f32 %v2294_v28 }
 0x2c1   :  { %10046 = vst [vmem:[#allocation126_spill] sm:$0xff] %v7435_v33  ;;  %v1338_v55 = vpop.xlane.xlu1 %1337  ;;  %3166 = vperm.xlu0 %4335, %v7428_v63   ;;  %3479 = vperm.xlu1 %4336, %v2781_v19   ;;  %v2460_v19 = vld [vmem:[%s9377_s3 + $0xa8] sm:$0xff]  ;;  %v2615_v63 = vld [vmem:[%s9378_s4 + $0x40] sm:$0xff]  ;;  %4419 = vrsqrt.f32 %v2336_v23  ;;  %v2004_v23 = vmul.f32 0.0051020407, %v7102_v38 }
 0x2c2   :  { %v7457_v11 = vmul.f32 0.0051020407, %v1338_v55  ;;  %v2544_v37 = vmul.f32 %v4412_v26, %v2460_v19  ;;  %v10053_v33 = vld [vmem:[#allocation231_spill] sm:$0xff]  ;;  %v10057_v19 = vld [vmem:[#allocation230_spill] sm:$0xff] }
 0x2c3   :  { %v10055_v55 = vsub.f32 %v10053_v33, %v10054_v59  ;;  %v2212_v33 = vmax.f32 %v2128_v44, 0.0  ;;  %v2783_v17 = vsub.f32 %v2615_v63, %v10057_v19  ;;  %v2491_v38 = vld [vmem:[%s9377_s3 + $0x1a0] sm:$0xff] }
 0x2c4   :  { %v7447_v52 = vpop.xlane.xlu0 %1837  ;;  %v2100_v58 = vmul.f32 %v7457_v11, %v7457_v11 }
 0x2c5   :  { %10049 = vst [vmem:[#allocation178_spill] sm:$0xff] %v7447_v52  ;;  %v7449_v5 = vpop.xlane.xlu1 %1673  ;;  %3544 = vperm.xlu0 %4335, %v2794_v36   ;;  %2901 = vperm.xlu1 %4336, %v10050_v62   ;;  %v4414_v52 = vpop.eup %4413  ;;  %v2241_v27 = vmax.f32 %v10055_v55, 0.0  ;;  %v2086_v36 = vmul.f32 %v7445_v34, %v7445_v34  ;;  %v10058_v62 = vld [vmem:[#allocation192_spill] sm:$0xff]  ;;  %v2712_v34 = vmul.f32 %v2544_v37, %v7334_v2  ;;  %v2296_v63 = vadd.f32 1e-05, %v2212_v33 }
 0x2c6   :  { %v7481_v48 = vmul.f32 0.0051020407, %v10058_v62  ;;  %v7483_v55 = vmul.f32 %v4414_v52, %v2502_v12  ;;  %v2462_v12 = vld [vmem:[%s9377_s3 + $0xb8] sm:$0xff]  ;;  %v10064_v62 = vld [vmem:[#allocation152_spill] sm:$0xff] }
 0x2c7   :  { %v2170_v32 = vsub.f32 %v2002_v35, %v2086_v36 }
 0x2c8   :  { %v7471_v45 = vpop.xlane.xlu0 %1173  ;;  %10059 = vst [vmem:[#allocation231_spill] sm:$0xff] %v7481_v48  ;;  %10060 = vst [vmem:[#allocation138_spill] sm:$0xff] %v7483_v55  ;;  %v2088_v52 = vmul.f32 %v7481_v48, %v7481_v48 }
 0x2c9   :  { %v1842_v28 = vpop.xlane.xlu1 %1841  ;;  %10056 = vst [vmem:[#allocation197_spill] sm:$0xff] %v7471_v45  ;;  %2966 = vperm.xlu0 %4335, %v2544_v37   ;;  %3111 = vperm.xlu1 %4336, %v7461_v39   ;;  %v2325_v45 = vadd.f32 1e-05, %v2241_v27  ;;  %v2254_v35 = vmax.f32 %v2170_v32, 0.0  ;;  %v4416_v36 = vpop.eup %4415 }
 0x2ca   :  { %v2016_v26 = vmul.f32 0.0051020407, %v1842_v28  ;;  %v2628_v28 = vld [vmem:[%s9378_s4 + $0xa8] sm:$0xff]  ;;  %v4418_v37 = vpop.eup %4417  ;;  %v7504_v19 = vmul.f32 %v4416_v36, %v2491_v38  ;;  %v2006_v36 = vmul.f32 0.0051020407, %v7160_v30  ;;  %v2630_v30 = vld [vmem:[%s9378_s4 + $0xb8] sm:$0xff] }
 0x2cb   :  { %v2796_v27 = vsub.f32 %v2628_v28, %v2712_v34  ;;  %4421 = vrsqrt.f32 %v2325_v45  ;;  %v2338_v33 = vadd.f32 1e-05, %v2254_v35  ;;  %v2546_v34 = vmul.f32 %v4418_v37, %v2462_v12  ;;  %v4420_v45 = vpop.eup %4419 }
 0x2cc   :  { %v2184_v59 = vsub.f32 %v2016_v26, %v2100_v58  ;;  %v7486_v49 = vpop.xlane.xlu0 %1341  ;;  %v2172_v58 = vsub.f32 %v2004_v23, %v2088_v52  ;;  %v10061_v26 = vld [vmem:[#allocation145_spill] sm:$0xff]  ;;  %10062 = vst [vmem:[#allocation230_spill] sm:$0xff] %v7504_v19  ;;  %v2504_v23 = vld [vmem:[%s9377_s3 + $0x208] sm:$0xff] }
 0x2cd   :  { %3176 = vperm.xlu0 %4335, %v7483_v55   ;;  %3489 = vperm.xlu1 %4336, %v2783_v17   ;;  %v10063_v17 = vld [vmem:[#allocation236_spill] sm:$0xff]  ;;  %v10067_v52 = vld [vmem:[#allocation155_spill] sm:$0xff]  ;;  %v2714_v12 = vmul.f32 %v2546_v34, %v7381_v21  ;;  %v10119_v55 = vld [vmem:[#allocation198_spill] sm:$0xff] }
 0x2ce   :  { %v2268_v44 = vmax.f32 %v2184_v59, 0.0  ;;  %v10065_v59 = vsub.f32 %v10063_v17, %v10064_v62  ;;  %v2256_v35 = vmax.f32 %v2172_v58, 0.0  ;;  %v7530_v58 = vmul.f32 0.0051020407, %v7176_v56  ;;  %v2520_v21 = vld [vmem:[%s9377_s3 + $0x288] sm:$0xff] }
 0x2cf   :  { %v1966_v56 = vmul.f32 0.0051020407, %v7198_v24  ;;  %v2493_v24 = vld [vmem:[%s9377_s3 + $0x1b0] sm:$0xff] }
 0x2d0   :  { %v2352_v2 = vadd.f32 1e-05, %v2268_v44  ;;  %v7502_v32 = vpop.xlane.xlu0 %1677  ;;  %v2243_v28 = vmax.f32 %v10065_v59, 0.0  ;;  %v7510_v44 = vmul.f32 0.0051020407, %v7123_v43  ;;  %v7523_v43 = vmul.f32 %v4420_v45, %v2504_v23 }
 0x2d1   :  { %3554 = vperm.xlu0 %4335, %v2796_v27   ;;  %2911 = vperm.xlu1 %4336, %v10061_v26   ;;  %v10070_v27 = vld [vmem:[#allocation232_spill] sm:$0xff]  ;;  %v2340_v62 = vadd.f32 1e-05, %v2256_v35  ;;  %v2050_v35 = vmul.f32 %v7530_v58, %v7530_v58 }
 0x2d2   :  { %4423 = vrsqrt.f32 %v2352_v2  ;;  %10066 = vst [vmem:[#allocation192_spill] sm:$0xff] %v7510_v44  ;;  %v7521_v2 = vmul.f32 0.0051020407, %v10067_v52  ;;  %10069 = vst [vmem:[#allocation236_spill] sm:$0xff] %v7523_v43  ;;  %v2327_v38 = vadd.f32 1e-05, %v2243_v28  ;;  %v2090_v26 = vmul.f32 %v7510_v44, %v7510_v44 }
 0x2d3   :  { %4425 = vrsqrt.f32 %v2296_v63  ;;  %v2617_v63 = vld [vmem:[%s9378_s4 + $0x50] sm:$0xff]  ;;  %v10076_v44 = vld [vmem:[#allocation171_spill] sm:$0xff] }
 0x2d4   :  { %4427 = vrsqrt.f32 %v2338_v33  ;;  %10068 = vst [vmem:[#allocation145_spill] sm:$0xff] %v7521_v2  ;;  %v2785_v37 = vsub.f32 %v2617_v63, %v10070_v27  ;;  %v7532_v17 = vpop.xlane.xlu0 %1845  ;;  %v10071_v33 = vld [vmem:[#allocation156_spill] sm:$0xff]  ;;  %v2174_v59 = vsub.f32 %v2006_v36, %v2090_v26  ;;  %v2077_v23 = vmul.f32 %v7521_v2, %v7521_v2  ;;  %v2464_v36 = vld [vmem:[%s9377_s3 + $0xc8] sm:$0xff] }
 0x2d5   :  { %2976 = vperm.xlu0 %4335, %v2546_v34   ;;  %3121 = vperm.xlu1 %4336, %v7504_v19   ;;  %v1993_v45 = vmul.f32 0.0051020407, %v10071_v33  ;;  %v4422_v34 = vpop.eup %4421  ;;  %v2798_v63 = vsub.f32 %v2630_v30, %v2714_v12  ;;  %4429 = vrsqrt.f32 %v2327_v38  ;;  %v7548_v27 = vmul.f32 0.0051020407, %v7185_v61  ;;  %v10073_v38 = vld [vmem:[#allocation167_spill] sm:$0xff] }
 0x2d6   :  { %v7561_v30 = vmul.f32 0.0051020407, %v10073_v38  ;;  %4431 = vrsqrt.f32 %v2340_v62  ;;  %v10074_v61 = vld [vmem:[#allocation235_spill] sm:$0xff]  ;;  %v2258_v33 = vmax.f32 %v2174_v59, 0.0  ;;  %v2134_v2 = vsub.f32 %v1966_v56, %v2050_v35  ;;  %v2619_v62 = vld [vmem:[%s9378_s4 + $0x60] sm:$0xff]  ;;  %v10079_v35 = vld [vmem:[#allocation237_spill] sm:$0xff] }
 0x2d7   :  { %10072 = vst [vmem:[#allocation152_spill] sm:$0xff] %v7548_v27  ;;  %v2161_v12 = vsub.f32 %v1993_v45, %v2077_v23  ;;  %v2008_v19 = vmul.f32 0.0051020407, %v7211_v13  ;;  %v1953_v48 = vmul.f32 0.0051020407, %v10076_v44  ;;  %v2092_v13 = vmul.f32 %v7548_v27, %v7548_v27 }
 0x2d8   :  { %v2037_v44 = vmul.f32 %v7561_v30, %v7561_v30  ;;  %v2342_v23 = vadd.f32 1e-05, %v2258_v33  ;;  %v10084_v33 = vld [vmem:[#allocation172_spill] sm:$0xff] }
 0x2d9   :  { %3186 = vperm.xlu0 %4335, %v7523_v43   ;;  %3499 = vperm.xlu1 %4336, %v2785_v37  }
 0x2da   :  { %4433 = vrsqrt.f32 %v2342_v23  ;;  %v2508_v23 = vld [vmem:[%s9377_s3 + $0x228] sm:$0xff] }
 0x2dc   :  { %v4424_v28 = vpop.eup %4423  ;;  %v7550_v37 = vpop.permute.xlu0 %2861 }
 0x2dd   :  { %v4426_v52 = vpop.eup %4425  ;;  %v7558_v26 = vmul.f32 %v4424_v28, %v2520_v21  ;;  %3564 = vperm.xlu0 %4335, %v2798_v63   ;;  %2921 = vperm.xlu1 %4336, %v10074_v61   ;;  %v7571_v21 = vmul.f32 0.0051020407, %v7219_v18  ;;  %v7575_v28 = vmul.f32 %v4422_v34, %v2493_v24  ;;  %v2245_v18 = vmax.f32 %v2161_v12, 0.0  ;;  %v10080_v24 = vld [vmem:[#allocation164_spill] sm:$0xff] }
 0x2de   :  { %v7573_v45 = vmul.f32 %v4426_v52, %v2464_v36  ;;  %v4428_v59 = vpop.eup %4427  ;;  %v1968_v34 = vmul.f32 0.0051020407, %v7262_v60  ;;  %v2218_v63 = vmax.f32 %v2134_v2, 0.0  ;;  %v2176_v52 = vsub.f32 %v2008_v19, %v2092_v13 }
 0x2df   :  { %v7567_v39 = vmul.f32 %v7558_v26, %v7457_v11  ;;  %10077 = vst [vmem:[#allocation232_spill] sm:$0xff] %v7575_v28  ;;  %v2506_v11 = vld [vmem:[%s9377_s3 + $0x218] sm:$0xff]  ;;  %v2787_v36 = vsub.f32 %v2619_v62, %v10079_v35  ;;  %v7594_v38 = vmul.f32 0.0051020407, %v10080_v24  ;;  %v2121_v61 = vsub.f32 %v1953_v48, %v2037_v44  ;;  %v4430_v62 = vpop.eup %4429 }
 0x2e0   :  { %v7582_v56 = vpop.permute.xlu0 %3076  ;;  %v2052_v12 = vmul.f32 %v7571_v21, %v7571_v21  ;;  %v7601_v60 = vmul.f32 0.0051020407, %v7241_v50  ;;  %v1995_v2 = vmul.f32 0.0051020407, %v10084_v33  ;;  %v2302_v48 = vadd.f32 1e-05, %v2218_v63 }
 0x2e1   :  { %10075 = vst [vmem:[#allocation155_spill] sm:$0xff] %v7567_v39  ;;  %10078 = vst [vmem:[#allocation156_spill] sm:$0xff] %v7582_v56  ;;  %2986 = vperm.xlu0 %4335, %v7573_v45   ;;  %3131 = vperm.xlu1 %4336, %v7575_v28   ;;  %v7598_v56 = vmul.f32 %v4428_v59, %v2506_v11  ;;  %v2329_v28 = vadd.f32 1e-05, %v2245_v18  ;;  %v2260_v13 = vmax.f32 %v2176_v52, 0.0  ;;  %v4432_v59 = vpop.eup %4431  ;;  %v2205_v11 = vmax.f32 %v2121_v61, 0.0 }
 0x2e2   :  { %10081 = vst [vmem:[#allocation167_spill] sm:$0xff] %v7594_v38  ;;  %10083 = vst [vmem:[#allocation171_spill] sm:$0xff] %v7601_v60  ;;  %v2136_v19 = vsub.f32 %v1968_v34, %v2052_v12  ;;  %v2010_v44 = vmul.f32 0.0051020407, %v7273_v0  ;;  %v2079_v50 = vmul.f32 %v7594_v38, %v7594_v38  ;;  %v2094_v18 = vmul.f32 %v7601_v60, %v7601_v60  ;;  %v2495_v0 = vld [vmem:[%s9377_s3 + $0x1c0] sm:$0xff]  ;;  %v10086_v52 = vld [vmem:[#allocation181_spill] sm:$0xff] }
 0x2e3   :  { %10082 = vst [vmem:[#allocation235_spill] sm:$0xff] %v7598_v56  ;;  %v7613_v35 = vmul.f32 0.0051020407, %v7289_v9  ;;  %4435 = vrsqrt.f32 %v2329_v28  ;;  %v10087_v9 = vld [vmem:[#allocation159_spill] sm:$0xff]  ;;  %v2344_v61 = vadd.f32 1e-05, %v2260_v13  ;;  %v7630_v27 = vmul.f32 %v4432_v59, %v2508_v23 }
 0x2e4   :  { %v7603_v39 = vpop.permute.xlu0 %3454  ;;  %v2163_v63 = vsub.f32 %v1995_v2, %v2079_v50  ;;  %v2220_v24 = vmax.f32 %v2136_v19, 0.0  ;;  %4437 = vrsqrt.f32 %v2302_v48  ;;  %v2178_v12 = vsub.f32 %v2010_v44, %v2094_v18  ;;  %v10088_v38 = vld [vmem:[#allocation238_spill] sm:$0xff]  ;;  %v2621_v48 = vld [vmem:[%s9378_s4 + $0x70] sm:$0xff]  ;;  %v10094_v18 = vld [vmem:[#allocation165_spill] sm:$0xff] }
 0x2e5   :  { %3196 = vperm.xlu0 %4335, %v7598_v56   ;;  %3509 = vperm.xlu1 %4336, %v2787_v36   ;;  %v7624_v36 = vmul.f32 0.0051020407, %v10086_v52  ;;  %v1970_v33 = vmul.f32 0.0051020407, %v7319_v25  ;;  %v1955_v60 = vmul.f32 0.0051020407, %v10088_v38  ;;  %v7632_v28 = vmul.f32 %v4430_v62, %v2495_v0  ;;  %v4434_v0 = vpop.eup %4433 }
 0x2e6   :  { %10089 = vst [vmem:[#allocation164_spill] sm:$0xff] %v7630_v27  ;;  %v2054_v2 = vmul.f32 %v7613_v35, %v7613_v35  ;;  %v7637_v19 = vmul.f32 0.0051020407, %v7309_v22  ;;  %v2247_v25 = vmax.f32 %v2163_v63, 0.0  ;;  %v2304_v13 = vadd.f32 1e-05, %v2220_v24 }
 0x2e7   :  { %10090 = vst [vmem:[#allocation172_spill] sm:$0xff] %v7632_v28  ;;  %v2039_v38 = vmul.f32 %v7624_v36, %v7624_v36  ;;  %4439 = vrsqrt.f32 %v2344_v61  ;;  %v2262_v62 = vmax.f32 %v2178_v12, 0.0  ;;  %v2012_v22 = vmul.f32 0.0051020407, %v7336_v20  ;;  %v10092_v59 = vld [vmem:[#allocation188_spill] sm:$0xff]  ;;  %v2510_v20 = vld [vmem:[%s9377_s3 + $0x238] sm:$0xff] }
 0x2e8   :  { %v7615_v34 = vpop.permute.xlu0 %3086  ;;  %10091 = vst [vmem:[#allocation181_spill] sm:$0xff] %v7637_v19  ;;  %v2138_v44 = vsub.f32 %v1970_v33, %v2054_v2  ;;  %v7650_v50 = vmul.f32 0.0051020407, %v10092_v59  ;;  %v2789_v23 = vsub.f32 %v2621_v48, %v10094_v18  ;;  %v2096_v63 = vmul.f32 %v7637_v19, %v7637_v19  ;;  %v10097_v12 = vld [vmem:[#allocation240_spill] sm:$0xff] }
 0x2e9   :  { %10085 = vst [vmem:[#allocation237_spill] sm:$0xff] %v7615_v34  ;;  %2996 = vperm.xlu0 %4335, %v7172_v46   ;;  %2931 = vperm.xlu1 %4336, %v10087_v9   ;;  %v2289_v34 = vadd.f32 1e-05, %v2205_v11  ;;  %v2123_v11 = vsub.f32 %v1955_v60, %v2039_v38  ;;  %v7656_v52 = vmul.f32 0.0051020407, %v7354_v4  ;;  %v10096_v9 = vld [vmem:[#allocation239_spill] sm:$0xff] }
 0x2ea   :  { %10093 = vst [vmem:[#allocation159_spill] sm:$0xff] %v7650_v50  ;;  %v1997_v61 = vmul.f32 0.0051020407, %v10096_v9  ;;  %v7665_v60 = vmul.f32 0.0051020407, %v10097_v12  ;;  %v2222_v2 = vmax.f32 %v2138_v44, 0.0  ;;  %v2180_v4 = vsub.f32 %v2012_v22, %v2096_v63 }
 0x2eb   :  { %4441 = vrsqrt.f32 %v2289_v34  ;;  %v2331_v34 = vadd.f32 1e-05, %v2247_v25  ;;  %v2346_v33 = vadd.f32 1e-05, %v2262_v62  ;;  %v1972_v48 = vmul.f32 0.0051020407, %v7385_v47 }
 0x2ec   :  { %v7639_v46 = vpop.permute.xlu0 %3464  ;;  %4443 = vrsqrt.f32 %v2304_v13  ;;  %v2081_v59 = vmul.f32 %v7650_v50, %v7650_v50  ;;  %v2207_v18 = vmax.f32 %v2123_v11, 0.0  ;;  %v7672_v25 = vmul.f32 0.0051020407, %v7369_v16  ;;  %v10100_v13 = vld [vmem:[#allocation177_spill] sm:$0xff]  ;;  %v2497_v44 = vld [vmem:[%s9377_s3 + $0x1d0] sm:$0xff] }
 0x2ed   :  { %3206 = vperm.xlu0 %4335, %v7630_v27   ;;  %3141 = vperm.xlu1 %4336, %v7632_v28   ;;  %v4436_v38 = vpop.eup %4435  ;;  %v7674_v9 = vmul.f32 %v4434_v0, %v2510_v20  ;;  %v2470_v47 = vld [vmem:[%s9377_s3 + $0xf8] sm:$0xff]  ;;  %4445 = vrsqrt.f32 %v2331_v34  ;;  %v2041_v22 = vmul.f32 %v7665_v60, %v7665_v60  ;;  %v2014_v11 = vmul.f32 0.0051020407, %v7403_v54 }
 0x2ee   :  { %10098 = vst [vmem:[#allocation188_spill] sm:$0xff] %v7672_v25  ;;  %v4438_v12 = vpop.eup %4437  ;;  %v2165_v16 = vsub.f32 %v1997_v61, %v2081_v59  ;;  %v10101_v0 = vld [vmem:[#allocation169_spill] sm:$0xff]  ;;  %4447 = vrsqrt.f32 %v2346_v33  ;;  %v2306_v63 = vadd.f32 1e-05, %v2222_v2  ;;  %v2264_v20 = vmax.f32 %v2180_v4, 0.0  ;;  %v2512_v33 = vld [vmem:[%s9377_s3 + $0x248] sm:$0xff] }
 0x2ef   :  { %10099 = vst [vmem:[#allocation165_spill] sm:$0xff] %v7674_v9  ;;  %v2291_v50 = vadd.f32 1e-05, %v2207_v18  ;;  %v2098_v34 = vmul.f32 %v7672_v25, %v7672_v25  ;;  %v7696_v61 = vmul.f32 %v4438_v12, %v2470_v47  ;;  %v7698_v59 = vmul.f32 %v4436_v38, %v2497_v44  ;;  %v2623_v2 = vld [vmem:[%s9378_s4 + $0x80] sm:$0xff]  ;;  %v10104_v47 = vld [vmem:[#allocation101_spill] sm:$0xff] }
 0x2f0   :  { %v7658_v24 = vpop.permute.xlu0 %3096  ;;  %v7701_v19 = vmul.f32 0.0051020407, %v7416_v10  ;;  %v2457_v10 = vld [vmem:[%s9377_s3 + $0x90] sm:$0xff]  ;;  %4449 = vrsqrt.f32 %v2306_v63  ;;  %v1974_v12 = vmul.f32 0.0051020407, %v7449_v5  ;;  %v2472_v5 = vld [vmem:[%s9377_s3 + $0x108] sm:$0xff] }
 0x2f1   :  { %10095 = vst [vmem:[#allocation238_spill] sm:$0xff] %v7658_v24  ;;  %3006 = vperm.xlu0 %4335, %v7215_v3   ;;  %3519 = vperm.xlu1 %4336, %v2789_v23   ;;  %v1957_v24 = vmul.f32 0.0051020407, %v10100_v13  ;;  %v2056_v3 = vmul.f32 %v7656_v52, %v7656_v52  ;;  %v7690_v23 = vpop.xlane.xlu1 %1177  ;;  %10102 = vst [vmem:[#allocation239_spill] sm:$0xff] %v7698_v59  ;;  %v4440_v28 = vpop.eup %4439  ;;  %v2182_v18 = vsub.f32 %v2014_v11, %v2098_v34  ;;  %v10107_v11 = vld [vmem:[#allocation174_spill] sm:$0xff] }
 0x2f2   :  { %4451 = vrsqrt.f32 %v2291_v50  ;;  %v7718_v44 = vmul.f32 0.0051020407, %v10104_v47 }
 0x2f3   :  { %v2140_v13 = vsub.f32 %v1972_v48, %v2056_v3  ;;  %v2125_v54 = vsub.f32 %v1957_v24, %v2041_v22  ;;  %v2249_v48 = vmax.f32 %v2165_v16, 0.0  ;;  %v2348_v24 = vadd.f32 1e-05, %v2264_v20  ;;  %v10108_v20 = vld [vmem:[#allocation176_spill] sm:$0xff] }
 0x2f4   :  { %v7679_v62 = vpop.permute.xlu0 %3474  ;;  %10105 = vst [vmem:[#allocation177_spill] sm:$0xff] %v7718_v44  ;;  %v7720_v22 = vmul.f32 %v4440_v28, %v2512_v33  ;;  %v2266_v47 = vmax.f32 %v2182_v18, 0.0 }
 0x2f5   :  { %3216 = vperm.xlu0 %4335, %v7674_v9   ;;  %2941 = vperm.xlu1 %4336, %v10101_v0   ;;  %v4442_v4 = vpop.eup %4441  ;;  %v2224_v38 = vmax.f32 %v2140_v13, 0.0  ;;  %v1346_v16 = vpop.xlane.xlu1 %1345  ;;  %v2791_v0 = vsub.f32 %v2623_v2, %v10107_v11  ;;  %v2209_v34 = vmax.f32 %v2125_v54, 0.0  ;;  %v2333_v50 = vadd.f32 1e-05, %v2249_v48  ;;  %v2499_v48 = vld [vmem:[%s9377_s3 + $0x1e0] sm:$0xff] }
 0x2f6   :  { %v4444_v3 = vpop.eup %4443  ;;  %10106 = vst [vmem:[#allocation169_spill] sm:$0xff] %v7720_v22  ;;  %v2541_v63 = vmul.f32 %v4442_v4, %v2457_v10  ;;  %v1999_v13 = vmul.f32 0.0051020407, %v10108_v20  ;;  %4453 = vrsqrt.f32 %v2348_v24  ;;  %v2083_v2 = vmul.f32 %v7718_v44, %v7718_v44  ;;  %v2514_v4 = vld [vmem:[%s9377_s3 + $0x258] sm:$0xff]  ;;  %v10109_v10 = vld [vmem:[#allocation224_spill] sm:$0xff] }
 0x2f7   :  { %v2308_v28 = vadd.f32 1e-05, %v2224_v38  ;;  %v4446_v33 = vpop.eup %4445  ;;  %v7734_v11 = vmul.f32 %v4444_v3, %v2472_v5  ;;  %v2293_v27 = vadd.f32 1e-05, %v2209_v34  ;;  %4455 = vrsqrt.f32 %v2333_v50  ;;  %v2625_v3 = vld [vmem:[%s9378_s4 + $0x90] sm:$0xff] }
 0x2f8   :  { %v7703_v9 = vpop.permute.xlu0 %3106  ;;  %v4448_v25 = vpop.eup %4447  ;;  %v2709_v18 = vmul.f32 %v2541_v63, %v7561_v30  ;;  %v7744_v24 = vmul.f32 0.0051020407, %v10109_v10  ;;  %v2350_v38 = vadd.f32 1e-05, %v2266_v47  ;;  %v7753_v34 = vmul.f32 0.0051020407, %v7690_v23 }
 0x2f9   :  { %10103 = vst [vmem:[#allocation240_spill] sm:$0xff] %v7703_v9  ;;  %3016 = vperm.xlu0 %4335, %v7696_v61   ;;  %3151 = vperm.xlu1 %4336, %v7698_v59   ;;  %v2058_v9 = vmul.f32 %v7701_v19, %v7701_v19  ;;  %4457 = vrsqrt.f32 %v2308_v28  ;;  %v10112_v30 = vld [vmem:[#allocation103_spill] sm:$0xff]  ;;  %v7756_v50 = vmul.f32 %v4448_v25, %v2514_v4  ;;  %v10116_v10 = vld [vmem:[#allocation105_spill] sm:$0xff]  ;;  %v2459_v25 = vld [vmem:[%s9377_s3 + $0xa0] sm:$0xff] }
 0x2fa   :  { %10110 = vst [vmem:[#allocation101_spill] sm:$0xff] %v7744_v24  ;;  %v1959_v5 = vmul.f32 0.0051020407, %v10112_v30  ;;  %v7758_v20 = vmul.f32 %v4446_v33, %v2499_v48  ;;  %4459 = vrsqrt.f32 %v2293_v27  ;;  %v2043_v23 = vmul.f32 %v7744_v24, %v7744_v24 }
 0x2fb   :  { %v2142_v54 = vsub.f32 %v1974_v12, %v2058_v9  ;;  %v2167_v9 = vsub.f32 %v1999_v13, %v2083_v2  ;;  %v7746_v12 = vpop.permute.xlu1 %3071  ;;  %10113 = vst [vmem:[#allocation176_spill] sm:$0xff] %v7756_v50  ;;  %v4450_v13 = vpop.eup %4449  ;;  %v2793_v2 = vsub.f32 %v2625_v3, %v2709_v18  ;;  %v7768_v30 = vmul.f32 0.0051020407, %v10116_v10  ;;  %v10117_v3 = vld [vmem:[#allocation38_spill] sm:$0xff] }
 0x2fc   :  { %v7725_v59 = vpop.permute.xlu0 %3484  ;;  %10111 = vst [vmem:[#allocation174_spill] sm:$0xff] %v7746_v12  ;;  %10114 = vst [vmem:[#allocation224_spill] sm:$0xff] %v7758_v20  ;;  %v4452_v28 = vpop.eup %4451  ;;  %4461 = vrsqrt.f32 %v2350_v38  ;;  %v2060_v4 = vmul.f32 %v7753_v34, %v7753_v34  ;;  %v7777_v48 = vmul.f32 0.0051020407, %v1346_v16  ;;  %v10118_v38 = vld [vmem:[#allocation40_spill] sm:$0xff] }
 0x2fd   :  { %3226 = vperm.xlu0 %4335, %v7720_v22   ;;  %3529 = vperm.xlu1 %4336, %v2791_v0   ;;  %v2226_v0 = vmax.f32 %v2142_v54, 0.0  ;;  %v2251_v54 = vmax.f32 %v2167_v9, 0.0  ;;  %v2127_v9 = vsub.f32 %v1959_v5, %v2043_v23  ;;  %v2543_v22 = vmul.f32 %v4452_v28, %v2459_v25 }
 0x2fe   :  { %v2001_v16 = vmul.f32 0.0051020407, %v10119_v55 }
 0x2ff   :  { %v2310_v33 = vadd.f32 1e-05, %v2226_v0  ;;  %v2516_v0 = vld [vmem:[%s9377_s3 + $0x268] sm:$0xff]  ;;  %v2335_v43 = vadd.f32 1e-05, %v2251_v54  ;;  %v2211_v28 = vmax.f32 %v2127_v9, 0.0  ;;  %v2711_v9 = vmul.f32 %v2543_v22, %v7624_v36 }
 0x300   :  { %v2907_v56 = vpop.permute.xlu0 %2906  ;;  %v4454_v44 = vpop.eup %4453  ;;  %v10120_v54 = vld [vmem:[#allocation216_spill] sm:$0xff]  ;;  %v10123_v36 = vld [vmem:[#allocation2_spill] sm:$0xff] }
 0x301   :  { %3026 = vperm.xlu0 %4335, %v7734_v11   ;;  %2951 = vperm.xlu1 %4336, %v2541_v63   ;;  %v2474_v63 = vld [vmem:[%s9377_s3 + $0x118] sm:$0xff]  ;;  %v3297_v10 = vmul.f32 %v2907_v56, %v10117_v3  ;;  %v3298_v12 = vmul.f32 %v2907_v56, %v10118_v38  ;;  %4463 = vrsqrt.f32 %v2310_v33  ;;  %v2102_v56 = vmul.f32 %v7777_v48, %v7777_v48  ;;  %v4456_v23 = vpop.eup %4455  ;;  %v2501_v33 = vld [vmem:[%s9377_s3 + $0x1f0] sm:$0xff] }
 0x302   :  { %v7793_v25 = vmul.f32 0.0051020407, %v10120_v54  ;;  %v7802_v55 = vmul.f32 %v4454_v44, %v2516_v0  ;;  %4465 = vrsqrt.f32 %v2335_v43  ;;  %v10121_v0 = vld [vmem:[#allocation6_spill] sm:$0xff]  ;;  %v7822_v54 = vmul.f32 %v4456_v23, %v2501_v33 }
 0x303   :  { %v2627_v43 = vld [vmem:[%s9378_s4 + $0xa0] sm:$0xff] }
 0x304   :  { %v7760_v47 = vpop.permute.xlu0 %3116  ;;  %v2795_v33 = vsub.f32 %v2627_v43, %v2711_v9  ;;  %v10126_v9 = vld [vmem:[#allocation46_spill] sm:$0xff]  ;;  %v10127_v43 = vld [vmem:[#allocation48_spill] sm:$0xff] }
 0x305   :  { %10115 = vst [vmem:[#allocation103_spill] sm:$0xff] %v7760_v47  ;;  %3236 = vperm.xlu0 %4335, %v7756_v50   ;;  %3161 = vperm.xlu1 %4336, %v7758_v20   ;;  %v1682_v27 = vpop.xlane.xlu1 %1681  ;;  %v7781_v47 = vmul.f32 %v4450_v13, %v2474_v63 }
 0x306   :  { %v1976_v18 = vmul.f32 0.0051020407, %v1682_v27 }
 0x308   :  { %v2144_v20 = vsub.f32 %v1976_v18, %v2060_v4  ;;  %v3495_v50 = vpop.permute.xlu0 %3494  ;;  %v2085_v4 = vmul.f32 %v7768_v30, %v7768_v30  ;;  %v2003_v18 = vmul.f32 0.0051020407, %v7093_v53  ;;  %v2087_v53 = vmul.f32 %v7793_v25, %v7793_v25 }
 0x309   :  { %v3885_v24 = vadd.f32 %v3495_v50, %v3297_v10  ;;  %v3886_v27 = vadd.f32 %v3495_v50, %v3298_v12  ;;  %3036 = vperm.xlu0 %4335, %v7781_v47   ;;  %3539 = vperm.xlu1 %4336, %v2793_v2   ;;  %v1850_v5 = vpop.xlane.xlu1 %1849  ;;  %v4458_v12 = vpop.eup %4457  ;;  %v2476_v2 = vld [vmem:[%s9377_s3 + $0x128] sm:$0xff] }
 0x30a   :  { %v2228_v13 = vmax.f32 %v2144_v20, 0.0  ;;  %v2018_v63 = vmul.f32 0.0051020407, %v1850_v5  ;;  %v4460_v3 = vpop.eup %4459  ;;  %v10122_v5 = vld [vmem:[#allocation9_spill] sm:$0xff] }
 0x30b   :  { %4053 = vst [vmem:[%s9379_s5 + $0x90] sm:$0xff] %v3885_v24  ;;  %4054 = vst.msk [vmem:[%s9379_s5 + $0x98] sm:$0xff] %vm1010_vm1, %v3886_v27  ;;  %v2169_v24 = vsub.f32 %v2001_v16, %v2085_v4  ;;  %v4462_v16 = vpop.eup %4461  ;;  %v7820_v4 = vmul.f32 %v4458_v12, %v2476_v2  ;;  %v2171_v2 = vsub.f32 %v2003_v18, %v2087_v53 }
 0x30c   :  { %v2186_v50 = vsub.f32 %v2018_v63, %v2102_v56  ;;  %v2917_v20 = vpop.permute.xlu0 %2916  ;;  %v2312_v10 = vadd.f32 1e-05, %v2228_v13  ;;  %v2295_v63 = vadd.f32 1e-05, %v2211_v28  ;;  %v10124_v13 = vld [vmem:[#allocation4_spill] sm:$0xff]  ;;  %v2518_v28 = vld [vmem:[%s9377_s3 + $0x278] sm:$0xff] }
 0x30d   :  { %3246 = vperm.xlu0 %4335, %v7802_v55   ;;  %2961 = vperm.xlu1 %4336, %v2543_v22   ;;  %v2867_v44 = vpop.permute.xlu1 %2866  ;;  %v3279_v22 = vmul.f32 %v7550_v37, %v10123_v36  ;;  %v2253_v12 = vmax.f32 %v2169_v24, 0.0  ;;  %v3302_v53 = vmul.f32 %v2917_v20, %v10127_v43  ;;  %v1965_v43 = vmul.f32 0.0051020407, %v7183_v8 }
 0x30e   :  { %v2270_v38 = vmax.f32 %v2186_v50, 0.0  ;;  %v3281_v27 = vmul.f32 %v2867_v44, %v10121_v0  ;;  %v3282_v56 = vmul.f32 %v2867_v44, %v10122_v5  ;;  %v3280_v50 = vmul.f32 %v7550_v37, %v10124_v13  ;;  %v2461_v37 = vld [vmem:[%s9377_s3 + $0xb0] sm:$0xff] }
 0x30f   :  { %4467 = vrsqrt.f32 %v2312_v10  ;;  %v7852_v10 = vmul.f32 %v4462_v16, %v2518_v28  ;;  %v1963_v16 = vmul.f32 0.0051020407, %v7121_v1 }
 0x310   :  { %v3869_v44 = vadd.f32 %v7603_v39, %v3281_v27  ;;  %v3870_v0 = vadd.f32 %v7603_v39, %v3282_v56  ;;  %v7830_v5 = vpop.permute.xlu0 %3126  ;;  %v2354_v39 = vadd.f32 1e-05, %v2270_v38  ;;  %v7848_v27 = vmul.f32 0.0051020407, %v7104_v40  ;;  %v4464_v38 = vpop.eup %4463  ;;  %v2478_v40 = vld [vmem:[%s9377_s3 + $0x138] sm:$0xff] }
 0x311   :  { %10125 = vst [vmem:[#allocation105_spill] sm:$0xff] %v7830_v5  ;;  %3046 = vperm.xlu0 %4335, %v7820_v4   ;;  %3171 = vperm.xlu1 %4336, %v7822_v54   ;;  %v3450_v23 = vpop.permute.xlu1 %3449  ;;  %v3301_v56 = vmul.f32 %v2917_v20, %v10126_v9  ;;  %4469 = vrsqrt.f32 %v2295_v63  ;;  %v2255_v20 = vmax.f32 %v2171_v2, 0.0  ;;  %v7878_v1 = vmul.f32 %v4464_v38, %v2478_v40  ;;  %v2503_v2 = vld [vmem:[%s9377_s3 + $0x200] sm:$0xff]  ;;  %v2480_v40 = vld [vmem:[%s9377_s3 + $0x148] sm:$0xff]  ;;  %v10136_v5 = vld [vmem:[#allocation12_spill] sm:$0xff] }
 0x312   :  { %4037 = vst [vmem:[%s9379_s5 + $0x10] sm:$0xff] %v3869_v44  ;;  %4038 = vst.msk [vmem:[%s9379_s5 + $0x18] sm:$0xff] %vm1010_vm1, %v3870_v0  ;;  %v3867_v24 = vadd.f32 %v3450_v23, %v3279_v22  ;;  %v3868_v18 = vadd.f32 %v3450_v23, %v3280_v50  ;;  %v2545_v22 = vmul.f32 %v4460_v3, %v2461_v37  ;;  %v2337_v44 = vadd.f32 1e-05, %v2253_v12  ;;  %v4466_v0 = vpop.eup %4465  ;;  %v10128_v23 = vld [vmem:[#allocation241_spill] sm:$0xff] }
 0x313   :  { %4471 = vrsqrt.f32 %v2354_v39  ;;  %v2047_v28 = vmul.f32 %v7848_v27, %v7848_v27  ;;  %v7881_v3 = vmul.f32 0.0051020407, %v7162_v6  ;;  %v2339_v39 = vadd.f32 1e-05, %v2255_v20 }
 0x314   :  { %4035 = vst [vmem:[%s9379_s5] sm:$0xff] %v3867_v24  ;;  %4036 = vst.msk [vmem:[%s9379_s5 + $0x8] sm:$0xff] %vm1010_vm1, %v3868_v18  ;;  %v3505_v36 = vpop.permute.xlu0 %3504  ;;  %v7869_v24 = vmul.f32 0.0051020407, %v10128_v23  ;;  %v2713_v37 = vmul.f32 %v2545_v22, %v7665_v60  ;;  %v2005_v9 = vmul.f32 0.0051020407, %v7140_v29  ;;  %4473 = vrsqrt.f32 %v2337_v44  ;;  %v10132_v23 = vld [vmem:[#allocation16_spill] sm:$0xff] }
 0x315   :  { %v3889_v13 = vadd.f32 %v3505_v36, %v3301_v56  ;;  %v3890_v63 = vadd.f32 %v3505_v36, %v3302_v53  ;;  %3256 = vperm.xlu0 %4335, %v7852_v10   ;;  %3549 = vperm.xlu1 %4336, %v2795_v33   ;;  %v2872_v50 = vpop.permute.xlu1 %2871  ;;  %v2629_v33 = vld [vmem:[%s9378_s4 + $0xb0] sm:$0xff]  ;;  %v2131_v18 = vsub.f32 %v1963_v16, %v2047_v28  ;;  %v7892_v56 = vmul.f32 0.0051020407, %v7174_v51 }
 0x316   :  { %v2089_v53 = vmul.f32 %v7869_v24, %v7869_v24  ;;  %v7900_v38 = vmul.f32 %v4466_v0, %v2503_v2  ;;  %v2049_v29 = vmul.f32 %v7881_v3, %v7881_v3  ;;  %v2797_v51 = vsub.f32 %v2629_v33, %v2713_v37  ;;  %v10131_v0 = vld [vmem:[#allocation14_spill] sm:$0xff] }
 0x317   :  { %4057 = vst [vmem:[%s9379_s5 + $0xb0] sm:$0xff] %v3889_v13  ;;  %4058 = vst.msk [vmem:[%s9379_s5 + $0xb8] sm:$0xff] %vm1010_vm1, %v3890_v63  ;;  %4475 = vrsqrt.f32 %v2339_v39  ;;  %v2091_v8 = vmul.f32 %v7892_v56, %v7892_v56  ;;  %v2007_v44 = vmul.f32 0.0051020407, %v7196_v15  ;;  %v7917_v33 = vmul.f32 0.0051020407, %v7213_v7 }
 0x318   :  { %v2927_v12 = vpop.permute.xlu0 %2926  ;;  %v2173_v20 = vsub.f32 %v2005_v9, %v2089_v53  ;;  %v2133_v63 = vsub.f32 %v1965_v43, %v2049_v29  ;;  %v10133_v37 = vld [vmem:[#allocation54_spill] sm:$0xff]  ;;  %v3284_v43 = vmul.f32 %v2872_v50, %v10136_v5 }
 0x319   :  { %3056 = vperm.xlu0 %4335, %v7878_v1   ;;  %2971 = vperm.xlu1 %4336, %v2545_v22   ;;  %v7895_v6 = vpop.permute.xlu1 %3081  ;;  %v4468_v60 = vpop.eup %4467  ;;  %v2215_v22 = vmax.f32 %v2131_v18, 0.0  ;;  %v3305_v39 = vmul.f32 %v2927_v12, %v10133_v37  ;;  %v10134_v18 = vld [vmem:[#allocation56_spill] sm:$0xff]  ;;  %v2463_v7 = vld [vmem:[%s9377_s3 + $0xc0] sm:$0xff] }
 0x31a   :  { %10129 = vst [vmem:[#allocation38_spill] sm:$0xff] %v7895_v6  ;;  %v3306_v9 = vmul.f32 %v2927_v12, %v10134_v18  ;;  %v7921_v53 = vmul.f32 %v4468_v60, %v2480_v40  ;;  %v10135_v6 = vld [vmem:[#allocation10_spill] sm:$0xff]  ;;  %v2522_v12 = vld [vmem:[%s9377_s3 + $0x298] sm:$0xff]  ;;  %v2257_v60 = vmax.f32 %v2173_v20, 0.0  ;;  %v10137_v40 = vld [vmem:[#allocation196_spill] sm:$0xff] }
 0x31b   :  { %v4470_v13 = vpop.eup %4469 }
 0x31c   :  { %v7904_v36 = vpop.permute.xlu0 %3136 }
 0x31d   :  { %10130 = vst [vmem:[#allocation40_spill] sm:$0xff] %v7904_v36  ;;  %3266 = vperm.xlu0 %4335, %v7558_v26   ;;  %3181 = vperm.xlu1 %4336, %v7900_v38   ;;  %v2877_v16 = vpop.permute.xlu1 %2876  ;;  %v4472_v26 = vpop.eup %4471  ;;  %v3283_v36 = vmul.f32 %v2872_v50, %v10135_v6  ;;  %v2299_v50 = vadd.f32 1e-05, %v2215_v22 }
 0x31e   :  { %v3285_v28 = vmul.f32 %v2877_v16, %v10131_v0  ;;  %v3286_v2 = vmul.f32 %v2877_v16, %v10132_v23  ;;  %v1967_v16 = vmul.f32 0.0051020407, %v10137_v40  ;;  %v7953_v22 = vmul.f32 %v4472_v26, %v2522_v12  ;;  %v2634_v12 = vld [vmem:[%s9378_s4 + $0xd8] sm:$0xff] }
 0x31f   :  { %4477 = vrsqrt.f32 %v2299_v50  ;;  %v7983_v40 = vmul.f32 0.0051020407, %v7275_v31  ;;  %v10144_v31 = vld [vmem:[#allocation246_spill] sm:$0xff] }
 0x320   :  { %v3873_v15 = vadd.f32 %v7639_v46, %v3285_v28  ;;  %v3874_v29 = vadd.f32 %v7639_v46, %v3286_v2  ;;  %v3515_v0 = vpop.permute.xlu0 %3514  ;;  %v2175_v46 = vsub.f32 %v2007_v44, %v2091_v8  ;;  %v2051_v2 = vmul.f32 %v7917_v33, %v7917_v33  ;;  %v4474_v8 = vpop.eup %4473 }
 0x321   :  { %v3893_v23 = vadd.f32 %v3515_v0, %v3305_v39  ;;  %v3894_v6 = vadd.f32 %v3515_v0, %v3306_v9  ;;  %3559 = vperm.xlu1 %4336, %v2797_v51   ;;  %3066 = vperm.xlu0 %4335, %v7921_v53   ;;  %v3460_v5 = vpop.permute.xlu1 %3459  ;;  %v7951_v51 = vmul.f32 %v4470_v13, %v2463_v7  ;;  %v2217_v44 = vmax.f32 %v2133_v63, 0.0  ;;  %v2505_v13 = vld [vmem:[%s9377_s3 + $0x210] sm:$0xff]  ;;  %v4476_v9 = vpop.eup %4475 }
 0x322   :  { %4041 = vst [vmem:[%s9379_s5 + $0x30] sm:$0xff] %v3873_v15  ;;  %4042 = vst.msk [vmem:[%s9379_s5 + $0x38] sm:$0xff] %vm1010_vm1, %v3874_v29  ;;  %v3871_v20 = vadd.f32 %v3460_v5, %v3283_v36  ;;  %v3872_v28 = vadd.f32 %v3460_v5, %v3284_v43  ;;  %v2716_v36 = vmul.f32 %v7573_v45, %v7433_v57  ;;  %v2632_v57 = vld [vmem:[%s9378_s4 + $0xc8] sm:$0xff]  ;;  %v2341_v45 = vadd.f32 1e-05, %v2257_v60  ;;  %v10138_v29 = vld [vmem:[#allocation190_spill] sm:$0xff] }
 0x323   :  { %4061 = vst [vmem:[%s9379_s5 + $0xd0] sm:$0xff] %v3893_v23  ;;  %4062 = vst.msk [vmem:[%s9379_s5 + $0xd8] sm:$0xff] %vm1010_vm1, %v3894_v6  ;;  %v2135_v63 = vsub.f32 %v1967_v16, %v2051_v2  ;;  %v2259_v18 = vmax.f32 %v2175_v46, 0.0  ;;  %v7972_v26 = vmul.f32 %v4474_v8, %v2505_v13  ;;  %v2301_v15 = vadd.f32 1e-05, %v2217_v44  ;;  %v2507_v23 = vld [vmem:[%s9377_s3 + $0x220] sm:$0xff] }
 0x324   :  { %4039 = vst [vmem:[%s9379_s5 + $0x20] sm:$0xff] %v3871_v20  ;;  %4040 = vst.msk [vmem:[%s9379_s5 + $0x28] sm:$0xff] %vm1010_vm1, %v3872_v28  ;;  %v2937_v37 = vpop.permute.xlu0 %2936  ;;  %v2800_v43 = vsub.f32 %v2632_v57, %v2716_v36  ;;  %v7975_v0 = vmul.f32 0.0051020407, %v10138_v29  ;;  %4479 = vrsqrt.f32 %v2341_v45  ;;  %v10141_v5 = vld [vmem:[#allocation208_spill] sm:$0xff]  ;;  %v10142_v20 = vld [vmem:[#allocation62_spill] sm:$0xff]  ;;  %v2802_v8 = vsub.f32 %v2634_v12, %v10144_v31 }
 0x325   :  { %2981 = vperm.xlu1 %4336, %v7951_v51   ;;  %3276 = vperm.xlu0 %4335, %v7953_v22   ;;  %v2882_v39 = vpop.permute.xlu1 %2881  ;;  %v2219_v60 = vmax.f32 %v2135_v63, 0.0  ;;  %v2343_v6 = vadd.f32 1e-05, %v2259_v18  ;;  %v2009_v50 = vmul.f32 0.0051020407, %v10141_v5  ;;  %v3309_v28 = vmul.f32 %v2937_v37, %v10142_v20  ;;  %v10143_v2 = vld [vmem:[#allocation64_spill] sm:$0xff] }
 0x326   :  { %v1969_v46 = vmul.f32 0.0051020407, %v7307_v41  ;;  %v3310_v36 = vmul.f32 %v2937_v37, %v10143_v2  ;;  %4481 = vrsqrt.f32 %v2301_v15  ;;  %v2093_v44 = vmul.f32 %v7975_v0, %v7975_v0  ;;  %v2636_v45 = vld [vmem:[%s9378_s4 + $0xe8] sm:$0xff]  ;;  %v10146_v12 = vld [vmem:[#allocation22_spill] sm:$0xff] }
 0x327   :  { %v7998_v57 = vmul.f32 %v4476_v9, %v2507_v23  ;;  %v2303_v63 = vadd.f32 1e-05, %v2219_v60  ;;  %v2053_v41 = vmul.f32 %v7983_v40, %v7983_v40  ;;  %v10145_v37 = vld [vmem:[#allocation243_spill] sm:$0xff]  ;;  %4483 = vrsqrt.f32 %v2343_v6  ;;  %v10147_v9 = vld [vmem:[#allocation24_spill] sm:$0xff] }
 0x328   :  { %v7977_v7 = vpop.permute.xlu0 %3146  ;;  %v2177_v29 = vsub.f32 %v2009_v50, %v2093_v44  ;;  %v8009_v20 = vmul.f32 0.0051020407, %v7287_v42  ;;  %v10148_v60 = vld [vmem:[#allocation247_spill] sm:$0xff]  ;;  %v2722_v50 = vmul.f32 %v7696_v61, %v7530_v58  ;;  %v10150_v42 = vld [vmem:[#allocation20_spill] sm:$0xff]  ;;  %v2011_v58 = vmul.f32 0.0051020407, %v7317_v14 }
 0x329   :  { %10139 = vst [vmem:[#allocation198_spill] sm:$0xff] %v7977_v7  ;;  %3191 = vperm.xlu1 %4336, %v7972_v26   ;;  %3574 = vperm.xlu0 %4335, %v2800_v43   ;;  %v7986_v16 = vpop.permute.xlu1 %3091  ;;  %v2137_v2 = vsub.f32 %v1969_v46, %v2053_v41  ;;  %v2804_v6 = vsub.f32 %v2636_v45, %v10148_v60  ;;  %v2467_v41 = vld [vmem:[%s9377_s3 + $0xe0] sm:$0xff]  ;;  %v2638_v45 = vld [vmem:[%s9378_s4 + $0xf8] sm:$0xff]  ;;  %4485 = vrsqrt.f32 %v2303_v63  ;;  %v2640_v60 = vld [vmem:[%s9378_s4 + $0x108] sm:$0xff] }
 0x32a   :  { %10140 = vst [vmem:[#allocation216_spill] sm:$0xff] %v7986_v16 }
 0x32c   :  { %v3525_v13 = vpop.permute.xlu0 %3524 }
 0x32d   :  { %v3897_v18 = vadd.f32 %v3525_v13, %v3309_v28  ;;  %v3898_v43 = vadd.f32 %v3525_v13, %v3310_v36  ;;  %2991 = vperm.xlu1 %4336, %v10145_v37   ;;  %3584 = vperm.xlu0 %4335, %v2802_v8   ;;  %v2887_v15 = vpop.permute.xlu1 %2886  ;;  %v4478_v28 = vpop.eup %4477  ;;  %v10149_v36 = vld [vmem:[#allocation18_spill] sm:$0xff]  ;;  %v3288_v8 = vmul.f32 %v2882_v39, %v10150_v42 }
 0x32e   :  { %v3289_v5 = vmul.f32 %v2887_v15, %v10146_v12  ;;  %v3290_v23 = vmul.f32 %v2887_v15, %v10147_v9  ;;  %v3287_v31 = vmul.f32 %v2882_v39, %v10149_v36  ;;  %v2261_v39 = vmax.f32 %v2177_v29, 0.0  ;;  %v4480_v14 = vpop.eup %4479  ;;  %v2509_v12 = vld [vmem:[%s9377_s3 + $0x230] sm:$0xff]  ;;  %v10154_v42 = vld [vmem:[#allocation70_spill] sm:$0xff] }
 0x32f   :  { %4065 = vst [vmem:[%s9379_s5 + $0xf0] sm:$0xff] %v3897_v18  ;;  %4066 = vst.msk [vmem:[%s9379_s5 + $0xf8] sm:$0xff] %vm1010_vm1, %v3898_v43  ;;  %v10151_v18 = vld [vmem:[#allocation249_spill] sm:$0xff]  ;;  %v2095_v37 = vmul.f32 %v8009_v20, %v8009_v20  ;;  %v8045_v15 = vmul.f32 %v4478_v28, %v2467_v41  ;;  %v2806_v29 = vsub.f32 %v2638_v45, %v2722_v50  ;;  %v2221_v9 = vmax.f32 %v2137_v2, 0.0  ;;  %v10153_v50 = vld [vmem:[#allocation110_spill] sm:$0xff] }
 0x330   :  { %v3877_v46 = vadd.f32 %v7679_v62, %v3289_v5  ;;  %v3878_v44 = vadd.f32 %v7679_v62, %v3290_v23  ;;  %v2947_v13 = vpop.permute.xlu0 %2946  ;;  %v8034_v43 = vmul.f32 0.0051020407, %v10151_v18  ;;  %v2724_v5 = vmul.f32 %v7734_v11, %v7571_v21  ;;  %v4482_v11 = vpop.eup %4481  ;;  %v10156_v18 = vld [vmem:[#allocation251_spill] sm:$0xff] }
 0x331   :  { %3201 = vperm.xlu1 %4336, %v7998_v57   ;;  %3594 = vperm.xlu0 %4335, %v2804_v6   ;;  %v3470_v61 = vpop.permute.xlu1 %3469  ;;  %v2179_v6 = vsub.f32 %v2011_v58, %v2095_v37  ;;  %v1971_v28 = vmul.f32 0.0051020407, %v10153_v50  ;;  %v2345_v2 = vadd.f32 1e-05, %v2261_v39  ;;  %v2726_v45 = vmul.f32 %v7781_v47, %v7613_v35  ;;  %v4484_v58 = vpop.eup %4483  ;;  %v2469_v39 = vld [vmem:[%s9377_s3 + $0xf0] sm:$0xff]  ;;  %v2511_v47 = vld [vmem:[%s9377_s3 + $0x240] sm:$0xff] }
 0x332   :  { %4045 = vst [vmem:[%s9379_s5 + $0x50] sm:$0xff] %v3877_v46  ;;  %4046 = vst.msk [vmem:[%s9379_s5 + $0x58] sm:$0xff] %vm1010_vm1, %v3878_v44  ;;  %v3875_v62 = vadd.f32 %v3470_v61, %v3287_v31  ;;  %v3876_v63 = vadd.f32 %v3470_v61, %v3288_v8  ;;  %v2055_v36 = vmul.f32 %v8034_v43, %v8034_v43  ;;  %v10155_v46 = vld [vmem:[#allocation72_spill] sm:$0xff]  ;;  %v2305_v61 = vadd.f32 1e-05, %v2221_v9  ;;  %v10159_v50 = vld [vmem:[#allocation254_spill] sm:$0xff] }
 0x333   :  { %v8068_v31 = vmul.f32 %v4480_v14, %v2509_v12  ;;  %v3313_v8 = vmul.f32 %v2947_v13, %v10154_v42  ;;  %v3314_v44 = vmul.f32 %v2947_v13, %v10155_v46  ;;  %v2808_v41 = vsub.f32 %v2640_v60, %v2724_v5  ;;  %v2642_v14 = vld [vmem:[%s9378_s4 + $0x118] sm:$0xff]  ;;  %v10158_v5 = vld [vmem:[#allocation252_spill] sm:$0xff]  ;;  %v4486_v60 = vpop.eup %4485 }
 0x334   :  { %4043 = vst [vmem:[%s9379_s5 + $0x40] sm:$0xff] %v3875_v62  ;;  %4044 = vst.msk [vmem:[%s9379_s5 + $0x48] sm:$0xff] %vm1010_vm1, %v3876_v63  ;;  %v8059_v23 = vpop.permute.xlu0 %3156  ;;  %v8075_v62 = vmul.f32 0.0051020407, %v10156_v18  ;;  %v2263_v37 = vmax.f32 %v2179_v6, 0.0  ;;  %v2139_v13 = vsub.f32 %v1971_v28, %v2055_v36  ;;  %4487 = vrsqrt.f32 %v2345_v2  ;;  %v10160_v18 = vld [vmem:[#allocation126_spill] sm:$0xff] }
 0x335   :  { %10152 = vst [vmem:[#allocation6_spill] sm:$0xff] %v8059_v23  ;;  %3001 = vperm.xlu1 %4336, %v8045_v15   ;;  %3604 = vperm.xlu0 %4335, %v2806_v29   ;;  %v2892_v21 = vpop.permute.xlu1 %2891  ;;  %v2013_v9 = vmul.f32 0.0051020407, %v10158_v5  ;;  %v8091_v42 = vmul.f32 0.0051020407, %v10159_v50  ;;  %v8100_v6 = vmul.f32 %v4482_v11, %v2469_v39  ;;  %v2810_v28 = vsub.f32 %v2642_v14, %v2726_v45  ;;  %v10162_v14 = vld [vmem:[#allocation30_spill] sm:$0xff] }
 0x336   :  { %v2728_v2 = vmul.f32 %v7820_v4, %v7656_v52  ;;  %v2097_v36 = vmul.f32 %v8075_v62, %v8075_v62  ;;  %v8106_v46 = vmul.f32 %v4484_v58, %v2511_v47  ;;  %4489 = vrsqrt.f32 %v2305_v61  ;;  %v10161_v58 = vld [vmem:[#allocation255_spill] sm:$0xff]  ;;  %v10164_v50 = vld [vmem:[#allocation26_spill] sm:$0xff] }
 0x337   :  { %v2347_v11 = vadd.f32 1e-05, %v2263_v37  ;;  %v2223_v45 = vmax.f32 %v2139_v13, 0.0  ;;  %v8117_v39 = vmul.f32 0.0051020407, %v10161_v58  ;;  %v2057_v5 = vmul.f32 %v8091_v42, %v8091_v42 }
 0x338   :  { %v3535_v63 = vpop.permute.xlu0 %3534  ;;  %v2181_v4 = vsub.f32 %v2013_v9, %v2097_v36  ;;  %v2730_v13 = vmul.f32 %v7878_v1, %v7701_v19 }
 0x339   :  { %v3901_v29 = vadd.f32 %v3535_v63, %v3313_v8  ;;  %v3902_v12 = vadd.f32 %v3535_v63, %v3314_v44  ;;  %3211 = vperm.xlu1 %4336, %v8068_v31   ;;  %3614 = vperm.xlu0 %4335, %v2808_v41   ;;  %v8084_v35 = vpop.permute.xlu1 %3101  ;;  %v2644_v44 = vld [vmem:[%s9378_s4 + $0x128] sm:$0xff]  ;;  %v2471_v41 = vld [vmem:[%s9377_s3 + $0x100] sm:$0xff]  ;;  %v1973_v63 = vmul.f32 0.0051020407, %v10160_v18  ;;  %v10165_v18 = vld [vmem:[#allocation28_spill] sm:$0xff]  ;;  %4491 = vrsqrt.f32 %v2347_v11 }
 0x33a   :  { %10157 = vst [vmem:[#allocation9_spill] sm:$0xff] %v8084_v35  ;;  %v2812_v61 = vsub.f32 %v2644_v44, %v2728_v2  ;;  %v8123_v37 = vmul.f32 %v4486_v60, %v2471_v41  ;;  %v3292_v9 = vmul.f32 %v2892_v21, %v10165_v18  ;;  %v2307_v60 = vadd.f32 1e-05, %v2223_v45  ;;  %v10167_v44 = vld [vmem:[#allocation178_spill] sm:$0xff] }
 0x33b   :  { %4069 = vst [vmem:[%s9379_s5 + $0x110] sm:$0xff] %v3901_v29  ;;  %4070 = vst.msk [vmem:[%s9379_s5 + $0x118] sm:$0xff] %vm1010_vm1, %v3902_v12  ;;  %v10163_v12 = vld [vmem:[#allocation32_spill] sm:$0xff]  ;;  %v2141_v2 = vsub.f32 %v1973_v63, %v2057_v5  ;;  %v2015_v41 = vmul.f32 0.0051020407, %v10167_v44  ;;  %v2265_v1 = vmax.f32 %v2181_v4, 0.0  ;;  %v2732_v4 = vmul.f32 %v7921_v53, %v7753_v34 }
 0x33c   :  { %v2957_v8 = vpop.permute.xlu0 %2956  ;;  %v10168_v45 = vld [vmem:[#allocation78_spill] sm:$0xff]  ;;  %v2648_v34 = vld [vmem:[%s9378_s4 + $0x148] sm:$0xff]  ;;  %4493 = vrsqrt.f32 %v2307_v60 }
 0x33d   :  { %3011 = vperm.xlu1 %4336, %v8100_v6   ;;  %3624 = vperm.xlu0 %4335, %v2810_v28   ;;  %v2897_v52 = vpop.permute.xlu1 %2896  ;;  %v3291_v28 = vmul.f32 %v2892_v21, %v10164_v50  ;;  %v2099_v21 = vmul.f32 %v8117_v39, %v8117_v39  ;;  %v3317_v63 = vmul.f32 %v2957_v8, %v10168_v45  ;;  %v2225_v53 = vmax.f32 %v2141_v2, 0.0  ;;  %v2473_v45 = vld [vmem:[%s9377_s3 + $0x110] sm:$0xff]  ;;  %v10182_v35 = vld [vmem:[#allocation242_spill] sm:$0xff] }
 0x33e   :  { %v3293_v29 = vmul.f32 %v2897_v52, %v10162_v14  ;;  %v3294_v47 = vmul.f32 %v2897_v52, %v10163_v12  ;;  %v2646_v52 = vld [vmem:[%s9378_s4 + $0x138] sm:$0xff]  ;;  %v4488_v5 = vpop.eup %4487 }
 0x340   :  { %v3881_v36 = vadd.f32 %v7725_v59, %v3293_v29  ;;  %v3882_v58 = vadd.f32 %v7725_v59, %v3294_v47  ;;  %v8131_v14 = vpop.permute.xlu0 %3166  ;;  %v10169_v29 = vld [vmem:[#allocation80_spill] sm:$0xff]  ;;  %v2814_v47 = vsub.f32 %v2646_v52, %v2730_v13  ;;  %v2183_v13 = vsub.f32 %v2015_v41, %v2099_v21  ;;  %v4490_v44 = vpop.eup %4489  ;;  %v10172_v21 = vld [vmem:[#allocation215_spill] sm:$0xff] }
 0x341   :  { %10166 = vst [vmem:[#allocation2_spill] sm:$0xff] %v8131_v14  ;;  %3221 = vperm.xlu1 %4336, %v8106_v46   ;;  %3634 = vperm.xlu0 %4335, %v2812_v61   ;;  %v3480_v19 = vpop.permute.xlu1 %3479  ;;  %v3318_v12 = vmul.f32 %v2957_v8, %v10169_v29  ;;  %v10170_v61 = vld [vmem:[#allocation197_spill] sm:$0xff]  ;;  %v2513_v8 = vld [vmem:[%s9377_s3 + $0x250] sm:$0xff]  ;;  %v1975_v52 = vmul.f32 0.0051020407, %v7502_v32  ;;  %v2816_v41 = vsub.f32 %v2648_v34, %v2732_v4  ;;  %v10175_v4 = vld [vmem:[#allocation207_spill] sm:$0xff] }
 0x342   :  { %4049 = vst [vmem:[%s9379_s5 + $0x70] sm:$0xff] %v3881_v36  ;;  %4050 = vst.msk [vmem:[%s9379_s5 + $0x78] sm:$0xff] %vm1010_vm1, %v3882_v58  ;;  %v3879_v59 = vadd.f32 %v3480_v19, %v3291_v28  ;;  %v3880_v11 = vadd.f32 %v3480_v19, %v3292_v9  ;;  %v8152_v50 = vmul.f32 0.0051020407, %v10170_v61  ;;  %v2349_v58 = vadd.f32 1e-05, %v2265_v1 }
 0x343   :  { %v8176_v2 = vmul.f32 %v4488_v5, %v2513_v8  ;;  %v10171_v19 = vld [vmem:[#allocation170_spill] sm:$0xff]  ;;  %v8183_v32 = vmul.f32 0.0051020407, %v7486_v49  ;;  %v2267_v29 = vmax.f32 %v2183_v13, 0.0  ;;  %v2017_v61 = vmul.f32 0.0051020407, %v7532_v17  ;;  %v4492_v8 = vpop.eup %4491 }
 0x344   :  { %4047 = vst [vmem:[%s9379_s5 + $0x60] sm:$0xff] %v3879_v59  ;;  %4048 = vst.msk [vmem:[%s9379_s5 + $0x68] sm:$0xff] %vm1010_vm1, %v3880_v11  ;;  %v3545_v28 = vpop.permute.xlu0 %3544  ;;  %v2734_v59 = vmul.f32 %v10172_v21, %v10171_v19  ;;  %v2059_v60 = vmul.f32 %v8152_v50, %v8152_v50  ;;  %v2650_v11 = vld [vmem:[%s9378_s4 + $0x158] sm:$0xff]  ;;  %4495 = vrsqrt.f32 %v2349_v58  ;;  %v2515_v17 = vld [vmem:[%s9377_s3 + $0x260] sm:$0xff] }
 0x345   :  { %v3905_v18 = vadd.f32 %v3545_v28, %v3317_v63  ;;  %v3906_v9 = vadd.f32 %v3545_v28, %v3318_v12  ;;  %3021 = vperm.xlu1 %4336, %v8123_v37   ;;  %3644 = vperm.xlu0 %4335, %v2814_v47   ;;  %v2902_v36 = vpop.permute.xlu1 %2901  ;;  %v2309_v63 = vadd.f32 1e-05, %v2225_v53  ;;  %v10174_v47 = vld [vmem:[#allocation191_spill] sm:$0xff]  ;;  %v8200_v53 = vmul.f32 %v4490_v44, %v2473_v45 }
 0x346   :  { %v2736_v49 = vmul.f32 %v10175_v4, %v10174_v47  ;;  %v2143_v5 = vsub.f32 %v1975_v52, %v2059_v60  ;;  %v2652_v28 = vld [vmem:[%s9378_s4 + $0x168] sm:$0xff]  ;;  %v2818_v34 = vsub.f32 %v2650_v11, %v2734_v59  ;;  %v2101_v13 = vmul.f32 %v8183_v32, %v8183_v32  ;;  %v10179_v47 = vld [vmem:[#allocation86_spill] sm:$0xff] }
 0x347   :  { %4073 = vst [vmem:[%s9379_s5 + $0x130] sm:$0xff] %v3905_v18  ;;  %4074 = vst.msk [vmem:[%s9379_s5 + $0x138] sm:$0xff] %vm1010_vm1, %v3906_v9  ;;  %v10176_v18 = vld [vmem:[#allocation34_spill] sm:$0xff]  ;;  %4497 = vrsqrt.f32 %v2309_v63  ;;  %v2351_v58 = vadd.f32 1e-05, %v2267_v29  ;;  %v4494_v63 = vpop.eup %4493 }
 0x348   :  { %v2967_v1 = vpop.permute.xlu0 %2966  ;;  %v3295_v9 = vmul.f32 %v2902_v36, %v10176_v18  ;;  %v2820_v44 = vsub.f32 %v2652_v28, %v2736_v49  ;;  %v2227_v59 = vmax.f32 %v2143_v5, 0.0  ;;  %v2185_v60 = vsub.f32 %v2017_v61, %v2101_v13  ;;  %v2475_v49 = vld [vmem:[%s9377_s3 + $0x120] sm:$0xff]  ;;  %v10183_v13 = vld [vmem:[#allocation109_spill] sm:$0xff] }
 0x349   :  { %3231 = vperm.xlu1 %4336, %v8176_v2   ;;  %3654 = vperm.xlu0 %4335, %v2816_v41   ;;  %v8192_v12 = vpop.permute.xlu1 %3111  ;;  %v10177_v41 = vld [vmem:[#allocation36_spill] sm:$0xff]  ;;  %v3321_v4 = vmul.f32 %v2967_v1, %v10179_v47  ;;  %4499 = vrsqrt.f32 %v2351_v58  ;;  %v2656_v58 = vld [vmem:[%s9378_s4 + $0x188] sm:$0xff] }
 0x34a   :  { %10173 = vst [vmem:[#allocation4_spill] sm:$0xff] %v8192_v12  ;;  %v3296_v19 = vmul.f32 %v2902_v36, %v10177_v41  ;;  %v10180_v36 = vld [vmem:[#allocation88_spill] sm:$0xff]  ;;  %v8214_v41 = vmul.f32 %v4492_v8, %v2515_v17  ;;  %v10181_v12 = vld [vmem:[#allocation209_spill] sm:$0xff]  ;;  %v2311_v61 = vadd.f32 1e-05, %v2227_v59  ;;  %v2269_v28 = vmax.f32 %v2185_v60, 0.0 }
 0x34b   :  { %v3322_v18 = vmul.f32 %v2967_v1, %v10180_v36  ;;  %v2738_v16 = vmul.f32 %v10182_v35, %v10181_v12  ;;  %v2654_v1 = vld [vmem:[%s9378_s4 + $0x178] sm:$0xff]  ;;  %v10186_v60 = vld [vmem:[#allocation116_spill] sm:$0xff] }
 0x34c   :  { %v8206_v21 = vpop.permute.xlu0 %3176  ;;  %4501 = vrsqrt.f32 %v2311_v61 }
 0x34d   :  { %10178 = vst [vmem:[#allocation46_spill] sm:$0xff] %v8206_v21  ;;  %3664 = vperm.xlu0 %4335, %v2818_v34   ;;  %3031 = vperm.xlu1 %4336, %v8200_v53   ;;  %v3490_v52 = vpop.permute.xlu1 %3489  ;;  %v2822_v8 = vsub.f32 %v2654_v1, %v2738_v16  ;;  %v8239_v34 = vmul.f32 %v4494_v63, %v2475_v49  ;;  %v2353_v16 = vadd.f32 1e-05, %v2269_v28  ;;  %v10188_v63 = vld [vmem:[#allocation42_spill] sm:$0xff]  ;;  %v10189_v1 = vld [vmem:[#allocation44_spill] sm:$0xff]  ;;  %v10210_v21 = vld [vmem:[#allocation101_spill] sm:$0xff] }
 0x34e   :  { %v3883_v11 = vadd.f32 %v3490_v52, %v3295_v9  ;;  %v3884_v45 = vadd.f32 %v3490_v52, %v3296_v19  ;;  %v10184_v9 = vld [vmem:[#allocation245_spill] sm:$0xff]  ;;  %v4496_v17 = vpop.eup %4495  ;;  %v2715_v14 = vmul.f32 %v7951_v51, %v10210_v21  ;;  %v10212_v21 = vld [vmem:[#allocation119_spill] sm:$0xff] }
 0x34f   :  { %v2740_v19 = vmul.f32 %v10184_v9, %v10183_v13  ;;  %4503 = vrsqrt.f32 %v2353_v16  ;;  %v10191_v9 = vld [vmem:[#allocation94_spill] sm:$0xff] }
 0x350   :  { %4051 = vst [vmem:[%s9379_s5 + $0x80] sm:$0xff] %v3883_v11  ;;  %4052 = vst.msk [vmem:[%s9379_s5 + $0x88] sm:$0xff] %vm1010_vm1, %v3884_v45  ;;  %v3555_v29 = vpop.permute.xlu0 %3554  ;;  %v10187_v11 = vld [vmem:[#allocation193_spill] sm:$0xff] }
 0x351   :  { %v3909_v35 = vadd.f32 %v3555_v29, %v3321_v4  ;;  %v3910_v12 = vadd.f32 %v3555_v29, %v3322_v18  ;;  %3674 = vperm.xlu0 %4335, %v2820_v44   ;;  %3241 = vperm.xlu1 %4336, %v8214_v41   ;;  %v2912_v5 = vpop.permute.xlu1 %2911  ;;  %v2517_v44 = vld [vmem:[%s9377_s3 + $0x270] sm:$0xff]  ;;  %v2742_v45 = vmul.f32 %v10187_v11, %v10186_v60  ;;  %v4498_v47 = vpop.eup %4497  ;;  %v2658_v18 = vld [vmem:[%s9378_s4 + $0x198] sm:$0xff] }
 0x352   :  { %v2824_v4 = vsub.f32 %v2656_v58, %v2740_v19  ;;  %v8254_v36 = vmul.f32 %v4496_v17, %v2517_v44  ;;  %v3299_v29 = vmul.f32 %v2912_v5, %v10188_v63  ;;  %v3300_v49 = vmul.f32 %v2912_v5, %v10189_v1  ;;  %v10192_v17 = vld [vmem:[#allocation96_spill] sm:$0xff] }
 0x353   :  { %4077 = vst [vmem:[%s9379_s5 + $0x150] sm:$0xff] %v3909_v35  ;;  %4078 = vst.msk [vmem:[%s9379_s5 + $0x158] sm:$0xff] %vm1010_vm1, %v3910_v12  ;;  %v2477_v12 = vld [vmem:[%s9377_s3 + $0x130] sm:$0xff]  ;;  %v2826_v13 = vsub.f32 %v2658_v18, %v2742_v45  ;;  %v4500_v63 = vpop.eup %4499  ;;  %v2519_v45 = vld [vmem:[%s9377_s3 + $0x280] sm:$0xff] }
 0x354   :  { %v2977_v52 = vpop.permute.xlu0 %2976  ;;  %v8269_v44 = vmul.f32 %v4498_v47, %v2477_v12  ;;  %v10193_v5 = vld [vmem:[#allocation128_spill] sm:$0xff]  ;;  %v8294_v1 = vmul.f32 %v4500_v63, %v2519_v45 }
 0x355   :  { %3684 = vperm.xlu0 %4335, %v2822_v8   ;;  %3041 = vperm.xlu1 %4336, %v8239_v34   ;;  %v8250_v59 = vpop.permute.xlu1 %3121  ;;  %v3325_v19 = vmul.f32 %v2977_v52, %v10191_v9  ;;  %v3326_v58 = vmul.f32 %v2977_v52, %v10192_v17  ;;  %v10194_v60 = vld [vmem:[#allocation204_spill] sm:$0xff]  ;;  %v2660_v52 = vld [vmem:[%s9378_s4 + $0x1a8] sm:$0xff]  ;;  %v2479_v9 = vld [vmem:[%s9377_s3 + $0x140] sm:$0xff] }
 0x356   :  { %10185 = vst [vmem:[#allocation48_spill] sm:$0xff] %v8250_v59  ;;  %v2744_v11 = vmul.f32 %v10194_v60, %v10193_v5  ;;  %v10196_v12 = vld [vmem:[#allocation248_spill] sm:$0xff] }
 0x358   :  { %v8261_v35 = vpop.permute.xlu0 %3186 }
 0x359   :  { %10190 = vst [vmem:[#allocation241_spill] sm:$0xff] %v8261_v35  ;;  %3694 = vperm.xlu0 %4335, %v2824_v4   ;;  %3251 = vperm.xlu1 %4336, %v8254_v36   ;;  %v3500_v61 = vpop.permute.xlu1 %3499 }
 0x35a   :  { %v3887_v28 = vadd.f32 %v3500_v61, %v3299_v29  ;;  %v3888_v8 = vadd.f32 %v3500_v61, %v3300_v49  ;;  %v2828_v29 = vsub.f32 %v2660_v52, %v2744_v11  ;;  %v10195_v49 = vld [vmem:[#allocation140_spill] sm:$0xff]  ;;  %v10201_v52 = vld [vmem:[#allocation225_spill] sm:$0xff] }
 0x35b   :  { %v2746_v61 = vmul.f32 %v10196_v12, %v10195_v49  ;;  %v10203_v12 = vld [vmem:[#allocation52_spill] sm:$0xff] }
 0x35c   :  { %4055 = vst [vmem:[%s9379_s5 + $0xa0] sm:$0xff] %v3887_v28  ;;  %4056 = vst.msk [vmem:[%s9379_s5 + $0xa8] sm:$0xff] %vm1010_vm1, %v3888_v8  ;;  %v3565_v16 = vpop.permute.xlu0 %3564  ;;  %v4502_v28 = vpop.eup %4501 }
 0x35d   :  { %v3913_v47 = vadd.f32 %v3565_v16, %v3325_v19  ;;  %v3914_v4 = vadd.f32 %v3565_v16, %v3326_v58  ;;  %3704 = vperm.xlu0 %4335, %v2826_v13   ;;  %3051 = vperm.xlu1 %4336, %v8269_v44   ;;  %v2922_v18 = vpop.permute.xlu1 %2921  ;;  %v2662_v13 = vld [vmem:[%s9378_s4 + $0x1b8] sm:$0xff]  ;;  %v10197_v19 = vld [vmem:[#allocation104_spill] sm:$0xff]  ;;  %v10198_v58 = vld [vmem:[#allocation107_spill] sm:$0xff]  ;;  %v8313_v63 = vmul.f32 %v4502_v28, %v2479_v9 }
 0x35e   :  { %v2830_v11 = vsub.f32 %v2662_v13, %v2746_v61  ;;  %v10200_v16 = vld [vmem:[#allocation234_spill] sm:$0xff]  ;;  %v10206_v13 = vld [vmem:[#allocation108_spill] sm:$0xff] }
 0x35f   :  { %4081 = vst [vmem:[%s9379_s5 + $0x170] sm:$0xff] %v3913_v47  ;;  %4082 = vst.msk [vmem:[%s9379_s5 + $0x178] sm:$0xff] %vm1010_vm1, %v3914_v4  ;;  %v2748_v45 = vmul.f32 %v10201_v52, %v10200_v16  ;;  %v4504_v47 = vpop.eup %4503  ;;  %v10202_v4 = vld [vmem:[#allocation50_spill] sm:$0xff] }
 0x360   :  { %v2987_v8 = vpop.permute.xlu0 %2986  ;;  %v3303_v49 = vmul.f32 %v2922_v18, %v10202_v4  ;;  %v10204_v61 = vld [vmem:[#allocation106_spill] sm:$0xff] }
 0x361   :  { %v8305_v17 = vmul.f32 %v2987_v8, %v10197_v19  ;;  %v8308_v5 = vmul.f32 %v2987_v8, %v10198_v58  ;;  %3714 = vperm.xlu0 %4335, %v2828_v29   ;;  %3261 = vperm.xlu1 %4336, %v8294_v1   ;;  %v8311_v60 = vpop.permute.xlu1 %3131  ;;  %v3304_v19 = vmul.f32 %v2922_v18, %v10203_v12  ;;  %v2664_v29 = vld [vmem:[%s9378_s4 + $0x1c8] sm:$0xff]  ;;  %v2521_v8 = vld [vmem:[%s9377_s3 + $0x290] sm:$0xff] }
 0x362   :  { %10199 = vst [vmem:[#allocation14_spill] sm:$0xff] %v8311_v60  ;;  %v2832_v52 = vsub.f32 %v2664_v29, %v2748_v45  ;;  %v8332_v4 = vmul.f32 %v4504_v47, %v2521_v8  ;;  %v10208_v12 = vld [vmem:[#allocation211_spill] sm:$0xff]  ;;  %v10211_v45 = vld [vmem:[#allocation117_spill] sm:$0xff]  ;;  %v10213_v8 = vld [vmem:[#allocation214_spill] sm:$0xff] }
 0x363   :  { %v10209_v60 = vld [vmem:[#allocation227_spill] sm:$0xff] }
 0x364   :  { %v3197_v59 = vpop.permute.xlu0 %3196  ;;  %v2750_v35 = vmul.f32 %v10209_v60, %v10208_v12  ;;  %v2631_v60 = vld [vmem:[%s9378_s4 + $0xc0] sm:$0xff] }
 0x365   :  { %v8326_v28 = vmul.f32 %v3197_v59, %v10204_v61  ;;  %v8329_v9 = vmul.f32 %v3197_v59, %v10206_v13  ;;  %3724 = vperm.xlu0 %4335, %v2830_v11   ;;  %3061 = vperm.xlu1 %4336, %v8313_v63   ;;  %v3510_v58 = vpop.permute.xlu1 %3509  ;;  %v2666_v11 = vld [vmem:[%s9378_s4 + $0x1d8] sm:$0xff]  ;;  %v2799_v29 = vsub.f32 %v2631_v60, %v2715_v14  ;;  %v10215_v12 = vld [vmem:[#allocation118_spill] sm:$0xff] }
 0x366   :  { %v3891_v18 = vadd.f32 %v3510_v58, %v3303_v49  ;;  %v3892_v16 = vadd.f32 %v3510_v58, %v3304_v19  ;;  %v2834_v19 = vsub.f32 %v2666_v11, %v2750_v35  ;;  %v10214_v61 = vld [vmem:[#allocation229_spill] sm:$0xff]  ;;  %v10218_v11 = vld [vmem:[#allocation244_spill] sm:$0xff] }
 0x367   :  { %10205 = vst [vmem:[#allocation16_spill] sm:$0xff] %v8326_v28  ;;  %10207 = vst [vmem:[#allocation54_spill] sm:$0xff] %v8329_v9  ;;  %v2752_v13 = vmul.f32 %v10214_v61, %v10213_v8  ;;  %v10220_v8 = vld [vmem:[#allocation138_spill] sm:$0xff]  ;;  %v2719_v9 = vmul.f32 %v8045_v15, %v7848_v27 }
 0x368   :  { %4059 = vst [vmem:[%s9379_s5 + $0xc0] sm:$0xff] %v3891_v18  ;;  %4060 = vst.msk [vmem:[%s9379_s5 + $0xc8] sm:$0xff] %vm1010_vm1, %v3892_v16  ;;  %v2997_v59 = vpop.permute.xlu0 %2996  ;;  %v2668_v18 = vld [vmem:[%s9378_s4 + $0x1e8] sm:$0xff]  ;;  %v2633_v16 = vld [vmem:[%s9378_s4 + $0xd0] sm:$0xff] }
 0x369   :  { %v8352_v51 = vmul.f32 %v2997_v59, %v10211_v45  ;;  %v8355_v47 = vmul.f32 %v2997_v59, %v10212_v21  ;;  %3734 = vperm.xlu0 %4335, %v2832_v52   ;;  %3271 = vperm.xlu1 %4336, %v8332_v4   ;;  %v2932_v49 = vpop.permute.xlu1 %2931  ;;  %v10217_v52 = vld [vmem:[#allocation120_spill] sm:$0xff]  ;;  %v2836_v35 = vsub.f32 %v2668_v18, %v2752_v13  ;;  %v10219_v21 = vld [vmem:[#allocation250_spill] sm:$0xff] }
 0x36a   :  { %v2801_v60 = vsub.f32 %v2633_v16, %v10218_v11  ;;  %v2754_v61 = vmul.f32 %v10220_v8, %v10219_v21  ;;  %v10221_v28 = vld [vmem:[#allocation58_spill] sm:$0xff]  ;;  %v10224_v16 = vld [vmem:[#allocation236_spill] sm:$0xff] }
 0x36b   :  { %v3307_v23 = vmul.f32 %v2932_v49, %v10221_v28  ;;  %v10223_v28 = vld [vmem:[#allocation253_spill] sm:$0xff] }
 0x36c   :  { %v3207_v58 = vpop.permute.xlu0 %3206 }
 0x36d   :  { %v8367_v59 = vmul.f32 %v3207_v58, %v10215_v12  ;;  %v8370_v45 = vmul.f32 %v3207_v58, %v10217_v52  ;;  %3744 = vperm.xlu0 %4335, %v2834_v19   ;;  %3569 = vperm.xlu1 %4336, %v2799_v29   ;;  %v8372_v14 = vpop.permute.xlu1 %3141  ;;  %v10222_v12 = vld [vmem:[#allocation60_spill] sm:$0xff]  ;;  %v2670_v19 = vld [vmem:[%s9378_s4 + $0x1f8] sm:$0xff]  ;;  %v2635_v29 = vld [vmem:[%s9378_s4 + $0xe0] sm:$0xff]  ;;  %v2721_v52 = vmul.f32 %v8100_v6, %v7881_v3 }
 0x36e   :  { %v2838_v27 = vsub.f32 %v2670_v19, %v2754_v61  ;;  %v2803_v15 = vsub.f32 %v2635_v29, %v2719_v9  ;;  %v2637_v9 = vld [vmem:[%s9378_s4 + $0xf0] sm:$0xff]  ;;  %v2723_v29 = vmul.f32 %v8123_v37, %v7917_v33  ;;  %v2725_v33 = vmul.f32 %v8200_v53, %v7983_v40  ;;  %v10232_v37 = vld [vmem:[#allocation66_spill] sm:$0xff] }
 0x36f   :  { %10216 = vst [vmem:[#allocation56_spill] sm:$0xff] %v8367_v59  ;;  %v3308_v59 = vmul.f32 %v2932_v49, %v10222_v12  ;;  %v2756_v49 = vmul.f32 %v10224_v16, %v10223_v28  ;;  %v10226_v6 = vld [vmem:[#allocation132_spill] sm:$0xff]  ;;  %v2805_v8 = vsub.f32 %v2637_v9, %v2721_v52  ;;  %v10228_v12 = vld [vmem:[#allocation235_spill] sm:$0xff] }
 0x370   :  { %v8381_v7 = vpop.permute.xlu0 %3006  ;;  %v10227_v61 = vld [vmem:[#allocation228_spill] sm:$0xff]  ;;  %v10230_v16 = vld [vmem:[#allocation231_spill] sm:$0xff] }
 0x371   :  { %3754 = vperm.xlu0 %4335, %v2836_v35   ;;  %3579 = vperm.xlu1 %4336, %v2801_v60   ;;  %v3520_v13 = vpop.permute.xlu1 %3519  ;;  %v2758_v19 = vmul.f32 %v10228_v12, %v10227_v61  ;;  %v10235_v12 = vld [vmem:[#allocation144_spill] sm:$0xff] }
 0x372   :  { %v3895_v58 = vadd.f32 %v3520_v13, %v3307_v23  ;;  %v3896_v18 = vadd.f32 %v3520_v13, %v3308_v59  ;;  %v2672_v23 = vld [vmem:[%s9378_s4 + $0x208] sm:$0xff]  ;;  %v10225_v59 = vld [vmem:[#allocation130_spill] sm:$0xff] }
 0x373   :  { %v2840_v21 = vsub.f32 %v2672_v23, %v2756_v49  ;;  %v10231_v49 = vld [vmem:[#allocation164_spill] sm:$0xff] }
 0x374   :  { %4063 = vst [vmem:[%s9379_s5 + $0xe0] sm:$0xff] %v3895_v58  ;;  %4064 = vst.msk [vmem:[%s9379_s5 + $0xe8] sm:$0xff] %vm1010_vm1, %v3896_v18  ;;  %v3217_v35 = vpop.permute.xlu0 %3216  ;;  %v2674_v58 = vld [vmem:[%s9378_s4 + $0x218] sm:$0xff]  ;;  %v2639_v18 = vld [vmem:[%s9378_s4 + $0x100] sm:$0xff]  ;;  %v2760_v52 = vmul.f32 %v10231_v49, %v10230_v16 }
 0x375   :  { %v8407_v3 = vmul.f32 %v3217_v35, %v10225_v59  ;;  %v8410_v11 = vmul.f32 %v3217_v35, %v10226_v6  ;;  %3764 = vperm.xlu0 %4335, %v2838_v27   ;;  %3589 = vperm.xlu1 %4336, %v2803_v15   ;;  %v2942_v60 = vpop.permute.xlu1 %2941  ;;  %v2842_v15 = vsub.f32 %v2674_v58, %v2758_v19  ;;  %v10233_v23 = vld [vmem:[#allocation68_spill] sm:$0xff]  ;;  %v2676_v6 = vld [vmem:[%s9378_s4 + $0x228] sm:$0xff]  ;;  %v10237_v16 = vld [vmem:[#allocation165_spill] sm:$0xff] }
 0x376   :  { %v2807_v28 = vsub.f32 %v2639_v18, %v2723_v29  ;;  %v3311_v35 = vmul.f32 %v2942_v60, %v10232_v37  ;;  %v3312_v9 = vmul.f32 %v2942_v60, %v10233_v23  ;;  %v2844_v29 = vsub.f32 %v2676_v6, %v2760_v52  ;;  %v10236_v18 = vld [vmem:[#allocation192_spill] sm:$0xff]  ;;  %v2643_v52 = vld [vmem:[%s9378_s4 + $0x120] sm:$0xff]  ;;  %v10239_v23 = vld [vmem:[#allocation169_spill] sm:$0xff] }
 0x377   :  { %v2762_v49 = vmul.f32 %v10237_v16, %v10236_v18  ;;  %v2727_v37 = vmul.f32 %v8239_v34, %v8034_v43  ;;  %v10244_v18 = vld [vmem:[#allocation176_spill] sm:$0xff] }
 0x378   :  { %v8416_v13 = vpop.permute.xlu0 %3016 }
 0x379   :  { %3774 = vperm.xlu0 %4335, %v2840_v21   ;;  %3599 = vperm.xlu1 %4336, %v2805_v8   ;;  %v8424_v27 = vpop.permute.xlu1 %3151  ;;  %v2641_v21 = vld [vmem:[%s9378_s4 + $0x110] sm:$0xff]  ;;  %v10234_v8 = vld [vmem:[#allocation142_spill] sm:$0xff] }
 0x37a   :  { %10229 = vst [vmem:[#allocation10_spill] sm:$0xff] %v8424_v27  ;;  %v2809_v58 = vsub.f32 %v2641_v21, %v2725_v33  ;;  %v2811_v33 = vsub.f32 %v2643_v52, %v2727_v37  ;;  %v2680_v21 = vld [vmem:[%s9378_s4 + $0x248] sm:$0xff]  ;;  %v10245_v37 = vld [vmem:[#allocation74_spill] sm:$0xff]  ;;  %v10246_v52 = vld [vmem:[#allocation76_spill] sm:$0xff] }
 0x37c   :  { %v3227_v59 = vpop.permute.xlu0 %3226 }
 0x37d   :  { %v8439_v61 = vmul.f32 %v3227_v59, %v10234_v8  ;;  %v8442_v19 = vmul.f32 %v3227_v59, %v10235_v12  ;;  %3784 = vperm.xlu0 %4335, %v2842_v15   ;;  %3609 = vperm.xlu1 %4336, %v2807_v28   ;;  %v3530_v40 = vpop.permute.xlu1 %3529  ;;  %v2678_v28 = vld [vmem:[%s9378_s4 + $0x238] sm:$0xff]  ;;  %v2729_v59 = vmul.f32 %v8269_v44, %v8091_v42  ;;  %v2645_v8 = vld [vmem:[%s9378_s4 + $0x130] sm:$0xff] }
 0x37e   :  { %v3899_v53 = vadd.f32 %v3530_v40, %v3311_v35  ;;  %v3900_v60 = vadd.f32 %v3530_v40, %v3312_v9  ;;  %v2846_v34 = vsub.f32 %v2678_v28, %v2762_v49  ;;  %v10238_v35 = vld [vmem:[#allocation152_spill] sm:$0xff]  ;;  %v10240_v12 = vld [vmem:[#allocation153_spill] sm:$0xff]  ;;  %v2731_v49 = vmul.f32 %v8313_v63, %v8152_v50 }
 0x37f   :  { %v2764_v9 = vmul.f32 %v10239_v23, %v10238_v35  ;;  %v2813_v44 = vsub.f32 %v2645_v8, %v2729_v59  ;;  %v10248_v8 = vld [vmem:[#allocation173_spill] sm:$0xff] }
 0x380   :  { %4067 = vst [vmem:[%s9379_s5 + $0x100] sm:$0xff] %v3899_v53  ;;  %4068 = vst.msk [vmem:[%s9379_s5 + $0x108] sm:$0xff] %vm1010_vm1, %v3900_v60  ;;  %v8455_v15 = vpop.permute.xlu0 %3026  ;;  %v10241_v53 = vld [vmem:[#allocation154_spill] sm:$0xff] }
 0x381   :  { %3794 = vperm.xlu0 %4335, %v2844_v29   ;;  %3619 = vperm.xlu1 %4336, %v2809_v58   ;;  %v2952_v43 = vpop.permute.xlu1 %2951  ;;  %v2848_v42 = vsub.f32 %v2680_v21, %v2764_v9  ;;  %v10243_v58 = vld [vmem:[#allocation171_spill] sm:$0xff]  ;;  %v10247_v21 = vld [vmem:[#allocation181_spill] sm:$0xff] }
 0x382   :  { %v2766_v16 = vmul.f32 %v10244_v18, %v10243_v58  ;;  %v3315_v28 = vmul.f32 %v2952_v43, %v10245_v37  ;;  %v3316_v35 = vmul.f32 %v2952_v43, %v10246_v52  ;;  %v2768_v43 = vmul.f32 %v7802_v55, %v10247_v21  ;;  %v2649_v55 = vld [vmem:[%s9378_s4 + $0x150] sm:$0xff]  ;;  %v10250_v58 = vld [vmem:[#allocation166_spill] sm:$0xff]  ;;  %v2686_v21 = vld [vmem:[%s9378_s4 + $0x278] sm:$0xff] }
 0x384   :  { %v3237_v6 = vpop.permute.xlu0 %3236 }
 0x385   :  { %v8474_v40 = vmul.f32 %v3237_v6, %v10240_v12  ;;  %v8477_v60 = vmul.f32 %v3237_v6, %v10241_v53  ;;  %3804 = vperm.xlu0 %4335, %v2846_v34   ;;  %3629 = vperm.xlu1 %4336, %v2811_v33   ;;  %v8479_v29 = vpop.permute.xlu1 %3161  ;;  %v2682_v34 = vld [vmem:[%s9378_s4 + $0x258] sm:$0xff]  ;;  %v2647_v33 = vld [vmem:[%s9378_s4 + $0x140] sm:$0xff]  ;;  %v10249_v12 = vld [vmem:[#allocation175_spill] sm:$0xff] }
 0x386   :  { %10242 = vst [vmem:[#allocation12_spill] sm:$0xff] %v8479_v29  ;;  %v2850_v50 = vsub.f32 %v2682_v34, %v2766_v16  ;;  %v2815_v63 = vsub.f32 %v2647_v33, %v2731_v49  ;;  %v2733_v53 = vmul.f32 %v10249_v12, %v10248_v8  ;;  %v10251_v16 = vld [vmem:[#allocation168_spill] sm:$0xff]  ;;  %v10253_v33 = vld [vmem:[#allocation189_spill] sm:$0xff]  ;;  %v10257_v12 = vld [vmem:[#allocation226_spill] sm:$0xff] }
 0x388   :  { %v8487_v23 = vpop.permute.xlu0 %3036  ;;  %v2817_v52 = vsub.f32 %v2649_v55, %v2733_v53  ;;  %v10259_v55 = vld [vmem:[#allocation84_spill] sm:$0xff] }
 0x389   :  { %3814 = vperm.xlu0 %4335, %v2848_v42   ;;  %3639 = vperm.xlu1 %4336, %v2813_v44   ;;  %v3540_v9 = vpop.permute.xlu1 %3539  ;;  %v2684_v44 = vld [vmem:[%s9378_s4 + $0x268] sm:$0xff] }
 0x38a   :  { %v3903_v59 = vadd.f32 %v3540_v9, %v3315_v28  ;;  %v3904_v6 = vadd.f32 %v3540_v9, %v3316_v35  ;;  %v2852_v28 = vsub.f32 %v2684_v44, %v2768_v43  ;;  %v10252_v35 = vld [vmem:[#allocation188_spill] sm:$0xff]  ;;  %v10254_v9 = vld [vmem:[#allocation210_spill] sm:$0xff] }
 0x38b   :  { %v2770_v34 = vmul.f32 %v7852_v10, %v10252_v35  ;;  %v10256_v10 = vld [vmem:[#allocation205_spill] sm:$0xff]  ;;  %v2688_v35 = vld [vmem:[%s9378_s4 + $0x288] sm:$0xff] }
 0x38c   :  { %4071 = vst [vmem:[%s9379_s5 + $0x120] sm:$0xff] %v3903_v59  ;;  %4072 = vst.msk [vmem:[%s9379_s5 + $0x128] sm:$0xff] %vm1010_vm1, %v3904_v6  ;;  %v3247_v42 = vpop.permute.xlu0 %3246  ;;  %v2735_v59 = vmul.f32 %v10254_v9, %v10253_v33  ;;  %v2737_v53 = vmul.f32 %v10257_v12, %v10256_v10 }
 0x38d   :  { %v8513_v18 = vmul.f32 %v3247_v42, %v10250_v58  ;;  %v8516_v49 = vmul.f32 %v3247_v42, %v10251_v16  ;;  %3824 = vperm.xlu0 %4335, %v2850_v50   ;;  %3649 = vperm.xlu1 %4336, %v2815_v63   ;;  %v2962_v37 = vpop.permute.xlu1 %2961  ;;  %v2651_v50 = vld [vmem:[%s9378_s4 + $0x160] sm:$0xff]  ;;  %v2854_v43 = vsub.f32 %v2686_v21, %v2770_v34  ;;  %v10261_v34 = vld [vmem:[#allocation187_spill] sm:$0xff] }
 0x38e   :  { %v2819_v8 = vsub.f32 %v2651_v50, %v2735_v59  ;;  %v10258_v42 = vld [vmem:[#allocation82_spill] sm:$0xff]  ;;  %v3320_v58 = vmul.f32 %v2962_v37, %v10259_v55  ;;  %v10262_v50 = vld [vmem:[#allocation155_spill] sm:$0xff] }
 0x38f   :  { %v3319_v44 = vmul.f32 %v2962_v37, %v10258_v42  ;;  %v2856_v10 = vsub.f32 %v2688_v35, %v10262_v50  ;;  %v2774_v42 = vmul.f32 %v7953_v22, %v7777_v48  ;;  %v10263_v55 = vld [vmem:[#allocation223_spill] sm:$0xff]  ;;  %v2655_v48 = vld [vmem:[%s9378_s4 + $0x180] sm:$0xff] }
 0x390   :  { %v8522_v6 = vpop.permute.xlu0 %3046 }
 0x391   :  { %3834 = vperm.xlu0 %4335, %v2852_v28   ;;  %3659 = vperm.xlu1 %4336, %v2817_v52   ;;  %v8530_v63 = vpop.permute.xlu1 %3171  ;;  %v2653_v28 = vld [vmem:[%s9378_s4 + $0x170] sm:$0xff]  ;;  %v10260_v52 = vld [vmem:[#allocation186_spill] sm:$0xff] }
 0x392   :  { %10255 = vst [vmem:[#allocation196_spill] sm:$0xff] %v8530_v63  ;;  %v2821_v12 = vsub.f32 %v2653_v28, %v2737_v53  ;;  %v10264_v63 = vld [vmem:[#allocation121_spill] sm:$0xff]  ;;  %v2657_v28 = vld [vmem:[%s9378_s4 + $0x190] sm:$0xff] }
 0x393   :  { %v2739_v29 = vmul.f32 %v10264_v63, %v10263_v55 }
 0x394   :  { %v3257_v16 = vpop.permute.xlu0 %3256 }
 0x395   :  { %v8543_v33 = vmul.f32 %v3257_v16, %v10260_v52  ;;  %v8546_v9 = vmul.f32 %v3257_v16, %v10261_v34  ;;  %3844 = vperm.xlu0 %4335, %v2854_v43   ;;  %3669 = vperm.xlu1 %4336, %v2819_v8   ;;  %v3550_v59 = vpop.permute.xlu1 %3549  ;;  %v2690_v8 = vld [vmem:[%s9378_s4 + $0x298] sm:$0xff]  ;;  %v2823_v53 = vsub.f32 %v2655_v48, %v2739_v29  ;;  %v10267_v52 = vld [vmem:[#allocation203_spill] sm:$0xff]  ;;  %v10270_v29 = vld [vmem:[#allocation122_spill] sm:$0xff] }
 0x396   :  { %v3907_v21 = vadd.f32 %v3550_v59, %v3319_v44  ;;  %v3908_v37 = vadd.f32 %v3550_v59, %v3320_v58  ;;  %v2858_v63 = vsub.f32 %v2690_v8, %v2774_v42  ;;  %v10265_v44 = vld [vmem:[#allocation114_spill] sm:$0xff]  ;;  %v10266_v58 = vld [vmem:[#allocation133_spill] sm:$0xff]  ;;  %v10273_v8 = vld [vmem:[#allocation92_spill] sm:$0xff] }
 0x397   :  { %v2741_v16 = vmul.f32 %v10266_v58, %v10265_v44  ;;  %v10268_v59 = vld [vmem:[#allocation206_spill] sm:$0xff] }
 0x398   :  { %4075 = vst [vmem:[%s9379_s5 + $0x140] sm:$0xff] %v3907_v21  ;;  %4076 = vst.msk [vmem:[%s9379_s5 + $0x148] sm:$0xff] %vm1010_vm1, %v3908_v37  ;;  %v8560_v43 = vpop.permute.xlu0 %3056  ;;  %v10272_v42 = vld [vmem:[#allocation90_spill] sm:$0xff] }
 0x399   :  { %3854 = vperm.xlu0 %4335, %v2856_v10   ;;  %3679 = vperm.xlu1 %4336, %v2821_v12   ;;  %v2972_v22 = vpop.permute.xlu1 %2971  ;;  %v2825_v50 = vsub.f32 %v2657_v28, %v2741_v16  ;;  %v10271_v10 = vld [vmem:[#allocation230_spill] sm:$0xff]  ;;  %v10275_v16 = vld [vmem:[#allocation232_spill] sm:$0xff] }
 0x39a   :  { %v2743_v12 = vmul.f32 %v10271_v10, %v10270_v29  ;;  %v3323_v55 = vmul.f32 %v2972_v22, %v10272_v42  ;;  %v3324_v48 = vmul.f32 %v2972_v22, %v10273_v8  ;;  %v2659_v58 = vld [vmem:[%s9378_s4 + $0x1a0] sm:$0xff]  ;;  %v10276_v29 = vld [vmem:[#allocation221_spill] sm:$0xff] }
 0x39b   :  { %v10278_v8 = vld [vmem:[#allocation98_spill] sm:$0xff] }
 0x39c   :  { %v3267_v35 = vpop.permute.xlu0 %3266 }
 0x39d   :  { %v8574_v34 = vmul.f32 %v3267_v35, %v10267_v52  ;;  %v8577_v21 = vmul.f32 %v3267_v35, %v10268_v59  ;;  %3864 = vperm.xlu0 %4335, %v2858_v63   ;;  %3689 = vperm.xlu1 %4336, %v2823_v53   ;;  %v8579_v37 = vpop.permute.xlu1 %3181  ;;  %v2827_v52 = vsub.f32 %v2659_v58, %v2743_v12  ;;  %v10274_v59 = vld [vmem:[#allocation134_spill] sm:$0xff]  ;;  %v10279_v58 = vld [vmem:[#allocation100_spill] sm:$0xff] }
 0x39e   :  { %10269 = vst [vmem:[#allocation190_spill] sm:$0xff] %v8579_v37  ;;  %v2745_v28 = vmul.f32 %v10275_v16, %v10274_v59  ;;  %v10277_v12 = vld [vmem:[#allocation222_spill] sm:$0xff]  ;;  %v10281_v59 = vld [vmem:[#allocation172_spill] sm:$0xff] }
 0x3a0   :  { %v8585_v44 = vpop.permute.xlu0 %3066 }
 0x3a1   :  { %3699 = vperm.xlu1 %4336, %v2825_v50   ;;  %v3560_v35 = vpop.permute.xlu1 %3559  ;;  %v2661_v50 = vld [vmem:[%s9378_s4 + $0x1b0] sm:$0xff] }
 0x3a2   :  { %v3911_v63 = vadd.f32 %v3560_v35, %v3323_v55  ;;  %v3912_v53 = vadd.f32 %v3560_v35, %v3324_v48 }
 0x3a4   :  { %4079 = vst [vmem:[%s9379_s5 + $0x160] sm:$0xff] %v3911_v63  ;;  %4080 = vst.msk [vmem:[%s9379_s5 + $0x168] sm:$0xff] %vm1010_vm1, %v3912_v53  ;;  %v3277_v22 = vpop.permute.xlu0 %3276  ;;  %v2829_v63 = vsub.f32 %v2661_v50, %v2745_v28  ;;  %v10280_v53 = vld [vmem:[#allocation233_spill] sm:$0xff] }
 0x3a5   :  { %v8603_v10 = vmul.f32 %v3277_v22, %v10276_v29  ;;  %v8606_v42 = vmul.f32 %v3277_v22, %v10277_v12  ;;  %3709 = vperm.xlu1 %4336, %v2827_v52   ;;  %v2982_v55 = vpop.permute.xlu1 %2981  ;;  %v2747_v16 = vmul.f32 %v10281_v59, %v10280_v53  ;;  %v2663_v29 = vld [vmem:[%s9378_s4 + $0x1c0] sm:$0xff]  ;;  %v10286_v28 = vld [vmem:[#allocation145_spill] sm:$0xff] }
 0x3a6   :  { %v8609_v48 = vmul.f32 %v2982_v55, %v10278_v8  ;;  %v8612_v35 = vmul.f32 %v2982_v55, %v10279_v58  ;;  %v10282_v8 = vld [vmem:[#allocation99_spill] sm:$0xff]  ;;  %v10284_v55 = vld [vmem:[#allocation102_spill] sm:$0xff] }
 0x3a8   :  { %v3575_v37 = vpop.permute.xlu0 %3574 }
 0x3a9   :  { %v3917_v22 = vadd.f32 %v3575_v37, %v8305_v17  ;;  %v3918_v52 = vadd.f32 %v3575_v37, %v8308_v5  ;;  %3719 = vperm.xlu1 %4336, %v2829_v63   ;;  %v3192_v12 = vpop.permute.xlu1 %3191  ;;  %v2831_v17 = vsub.f32 %v2663_v29, %v2747_v16  ;;  %v10287_v5 = vld [vmem:[#allocation239_spill] sm:$0xff]  ;;  %v2665_v63 = vld [vmem:[%s9378_s4 + $0x1d0] sm:$0xff]  ;;  %v10290_v16 = vld [vmem:[#allocation129_spill] sm:$0xff] }
 0x3aa   :  { %v8622_v27 = vmul.f32 %v3192_v12, %v10282_v8  ;;  %v8625_v58 = vmul.f32 %v3192_v12, %v10284_v55  ;;  %v2749_v37 = vmul.f32 %v10287_v5, %v10286_v28  ;;  %v10288_v12 = vld [vmem:[#allocation111_spill] sm:$0xff]  ;;  %v10289_v55 = vld [vmem:[#allocation113_spill] sm:$0xff]  ;;  %v3337_v29 = vmul.f32 %v8381_v7, %v10290_v16 }
 0x3ab   :  { %4085 = vst [vmem:[%s9379_s5 + $0x190] sm:$0xff] %v3917_v22  ;;  %4086 = vst.msk [vmem:[%s9379_s5 + $0x198] sm:$0xff] %vm1010_vm1, %v3918_v52  ;;  %v10291_v28 = vld [vmem:[#allocation131_spill] sm:$0xff] }
 0x3ac   :  { %10283 = vst [vmem:[#allocation208_spill] sm:$0xff] %v8622_v27  ;;  %10285 = vst [vmem:[#allocation62_spill] sm:$0xff] %v8625_v58  ;;  %v3585_v50 = vpop.permute.xlu0 %3584  ;;  %v3338_v5 = vmul.f32 %v8381_v7, %v10291_v28  ;;  %v10294_v28 = vld [vmem:[#allocation112_spill] sm:$0xff]  ;;  %v10295_v58 = vld [vmem:[#allocation115_spill] sm:$0xff] }
 0x3ad   :  { %v3921_v53 = vadd.f32 %v3585_v50, %v8352_v51  ;;  %v3922_v59 = vadd.f32 %v3585_v50, %v8355_v47  ;;  %3729 = vperm.xlu1 %4336, %v2831_v17   ;;  %v2992_v22 = vpop.permute.xlu1 %2991  ;;  %v2833_v51 = vsub.f32 %v2665_v63, %v2749_v37  ;;  %v10292_v47 = vld [vmem:[#allocation167_spill] sm:$0xff]  ;;  %v10293_v17 = vld [vmem:[#allocation224_spill] sm:$0xff] }
 0x3ae   :  { %v8642_v8 = vmul.f32 %v2992_v22, %v10288_v12  ;;  %v8645_v52 = vmul.f32 %v2992_v22, %v10289_v55  ;;  %v2751_v50 = vmul.f32 %v10293_v17, %v10292_v47  ;;  %v2667_v12 = vld [vmem:[%s9378_s4 + $0x1e0] sm:$0xff]  ;;  %v10297_v63 = vld [vmem:[#allocation143_spill] sm:$0xff]  ;;  %v2669_v17 = vld [vmem:[%s9378_s4 + $0x1f0] sm:$0xff] }
 0x3af   :  { %4089 = vst [vmem:[%s9379_s5 + $0x1b0] sm:$0xff] %v3921_v53  ;;  %4090 = vst.msk [vmem:[%s9379_s5 + $0x1b8] sm:$0xff] %vm1010_vm1, %v3922_v59  ;;  %v10296_v59 = vld [vmem:[#allocation141_spill] sm:$0xff]  ;;  %v3342_v47 = vmul.f32 %v8416_v13, %v10297_v63  ;;  %v2671_v63 = vld [vmem:[%s9378_s4 + $0x200] sm:$0xff] }
 0x3b0   :  { %v3595_v22 = vpop.permute.xlu0 %3594  ;;  %v3341_v37 = vmul.f32 %v8416_v13, %v10296_v59  ;;  %v10300_v59 = vld [vmem:[#allocation151_spill] sm:$0xff] }
 0x3b1   :  { %v3925_v55 = vadd.f32 %v3595_v22, %v3337_v29  ;;  %v3926_v7 = vadd.f32 %v3595_v22, %v3338_v5  ;;  %3739 = vperm.xlu1 %4336, %v2833_v51   ;;  %v3202_v16 = vpop.permute.xlu1 %3201  ;;  %v2835_v29 = vsub.f32 %v2667_v12, %v2751_v50  ;;  %v10298_v5 = vld [vmem:[#allocation159_spill] sm:$0xff]  ;;  %v10301_v50 = vld [vmem:[#allocation177_spill] sm:$0xff] }
 0x3b2   :  { %v8664_v53 = vmul.f32 %v3202_v16, %v10294_v28  ;;  %v8667_v27 = vmul.f32 %v3202_v16, %v10295_v58  ;;  %v2753_v58 = vmul.f32 %v7822_v54, %v10298_v5  ;;  %v2755_v12 = vmul.f32 %v7900_v38, %v10301_v50  ;;  %v10302_v5 = vld [vmem:[#allocation124_spill] sm:$0xff] }
 0x3b3   :  { %4093 = vst [vmem:[%s9379_s5 + $0x1d0] sm:$0xff] %v3925_v55  ;;  %4094 = vst.msk [vmem:[%s9379_s5 + $0x1d8] sm:$0xff] %vm1010_vm1, %v3926_v7  ;;  %v10299_v55 = vld [vmem:[#allocation149_spill] sm:$0xff]  ;;  %v3346_v7 = vmul.f32 %v8455_v15, %v10300_v59  ;;  %v2757_v59 = vmul.f32 %v7972_v26, %v7768_v30  ;;  %v2759_v26 = vmul.f32 %v7998_v57, %v7793_v25 }
 0x3b4   :  { %v3605_v51 = vpop.permute.xlu0 %3604  ;;  %v3345_v28 = vmul.f32 %v8455_v15, %v10299_v55  ;;  %v2837_v54 = vsub.f32 %v2669_v17, %v2753_v58  ;;  %v10305_v17 = vld [vmem:[#allocation162_spill] sm:$0xff] }
 0x3b5   :  { %v3929_v22 = vadd.f32 %v3605_v51, %v3341_v37  ;;  %v3930_v13 = vadd.f32 %v3605_v51, %v3342_v47  ;;  %3749 = vperm.xlu1 %4336, %v2835_v29   ;;  %v8685_v16 = vpop.permute.xlu1 %3001  ;;  %v3350_v38 = vmul.f32 %v8487_v23, %v10305_v17 }
 0x3b7   :  { %4097 = vst [vmem:[%s9379_s5 + $0x1f0] sm:$0xff] %v3929_v22  ;;  %4098 = vst.msk [vmem:[%s9379_s5 + $0x1f8] sm:$0xff] %vm1010_vm1, %v3930_v13  ;;  %v10303_v22 = vld [vmem:[#allocation127_spill] sm:$0xff]  ;;  %v10304_v13 = vld [vmem:[#allocation161_spill] sm:$0xff] }
 0x3b8   :  { %v3615_v37 = vpop.permute.xlu0 %3614  ;;  %v3349_v58 = vmul.f32 %v8487_v23, %v10304_v13 }
 0x3b9   :  { %v3933_v47 = vadd.f32 %v3615_v37, %v3345_v28  ;;  %v3934_v15 = vadd.f32 %v3615_v37, %v3346_v7  ;;  %3759 = vperm.xlu1 %4336, %v2837_v54   ;;  %v3212_v29 = vpop.permute.xlu1 %3211  ;;  %v2839_v28 = vsub.f32 %v2671_v63, %v2755_v12  ;;  %v2673_v54 = vld [vmem:[%s9378_s4 + $0x210] sm:$0xff]  ;;  %v2675_v63 = vld [vmem:[%s9378_s4 + $0x220] sm:$0xff] }
 0x3ba   :  { %v8704_v51 = vmul.f32 %v3212_v29, %v10302_v5  ;;  %v8707_v55 = vmul.f32 %v3212_v29, %v10303_v22  ;;  %v10307_v5 = vld [vmem:[#allocation184_spill] sm:$0xff]  ;;  %v2841_v30 = vsub.f32 %v2673_v54, %v2757_v59  ;;  %v10311_v54 = vld [vmem:[#allocation201_spill] sm:$0xff]  ;;  %v2843_v57 = vsub.f32 %v2675_v63, %v2759_v26  ;;  %v2679_v63 = vld [vmem:[%s9378_s4 + $0x240] sm:$0xff] }
 0x3bb   :  { %4101 = vst [vmem:[%s9379_s5 + $0x210] sm:$0xff] %v3933_v47  ;;  %4102 = vst.msk [vmem:[%s9379_s5 + $0x218] sm:$0xff] %vm1010_vm1, %v3934_v15  ;;  %v10306_v47 = vld [vmem:[#allocation183_spill] sm:$0xff]  ;;  %v3354_v15 = vmul.f32 %v8522_v6, %v10307_v5  ;;  %v3358_v25 = vmul.f32 %v8560_v43, %v10311_v54 }
 0x3bc   :  { %v3625_v7 = vpop.permute.xlu0 %3624  ;;  %v3353_v29 = vmul.f32 %v8522_v6, %v10306_v47  ;;  %v2677_v47 = vld [vmem:[%s9378_s4 + $0x230] sm:$0xff]  ;;  %v10316_v54 = vld [vmem:[#allocation7_spill] sm:$0xff] }
 0x3bd   :  { %v3937_v50 = vadd.f32 %v3625_v7, %v3349_v58  ;;  %v3938_v23 = vadd.f32 %v3625_v7, %v3350_v38  ;;  %3769 = vperm.xlu1 %4336, %v2839_v28   ;;  %v8725_v37 = vpop.permute.xlu1 %3011  ;;  %v10308_v58 = vld [vmem:[#allocation136_spill] sm:$0xff]  ;;  %v10309_v38 = vld [vmem:[#allocation139_spill] sm:$0xff] }
 0x3be   :  { %v10310_v7 = vld [vmem:[#allocation200_spill] sm:$0xff] }
 0x3bf   :  { %4105 = vst [vmem:[%s9379_s5 + $0x230] sm:$0xff] %v3937_v50  ;;  %4106 = vst.msk [vmem:[%s9379_s5 + $0x238] sm:$0xff] %vm1010_vm1, %v3938_v23  ;;  %v3357_v59 = vmul.f32 %v8560_v43, %v10310_v7  ;;  %v2761_v50 = vmul.f32 %v8068_v31, %v7869_v24  ;;  %v2763_v31 = vmul.f32 %v8106_v46, %v7892_v56  ;;  %v10315_v7 = vld [vmem:[#allocation150_spill] sm:$0xff] }
 0x3c0   :  { %v3635_v12 = vpop.permute.xlu0 %3634 }
 0x3c1   :  { %v3941_v22 = vadd.f32 %v3635_v12, %v3353_v29  ;;  %v3942_v6 = vadd.f32 %v3635_v12, %v3354_v15  ;;  %3779 = vperm.xlu1 %4336, %v2841_v30   ;;  %v3222_v13 = vpop.permute.xlu1 %3221  ;;  %v10312_v15 = vld [vmem:[#allocation218_spill] sm:$0xff]  ;;  %v10313_v12 = vld [vmem:[#allocation219_spill] sm:$0xff]  ;;  %v2845_v24 = vsub.f32 %v2677_v47, %v2761_v50  ;;  %v10318_v50 = vld [vmem:[#allocation8_spill] sm:$0xff]  ;;  %v2847_v46 = vsub.f32 %v2679_v63, %v2763_v31 }
 0x3c2   :  { %v8744_v17 = vmul.f32 %v3222_v13, %v10308_v58  ;;  %v8747_v28 = vmul.f32 %v3222_v13, %v10309_v38  ;;  %v3361_v30 = vmul.f32 %v8585_v44, %v10312_v15  ;;  %v10314_v58 = vld [vmem:[#allocation148_spill] sm:$0xff]  ;;  %v2683_v63 = vld [vmem:[%s9378_s4 + $0x260] sm:$0xff] }
 0x3c3   :  { %4109 = vst [vmem:[%s9379_s5 + $0x250] sm:$0xff] %v3941_v22  ;;  %4110 = vst.msk [vmem:[%s9379_s5 + $0x258] sm:$0xff] %vm1010_vm1, %v3942_v6  ;;  %v3362_v22 = vmul.f32 %v8585_v44, %v10313_v12  ;;  %v10319_v12 = vld [vmem:[#allocation15_spill] sm:$0xff] }
 0x3c4   :  { %v3645_v23 = vpop.permute.xlu0 %3644 }
 0x3c5   :  { %v3945_v29 = vadd.f32 %v3645_v23, %v3357_v59  ;;  %v3946_v43 = vadd.f32 %v3645_v23, %v3358_v25  ;;  %3789 = vperm.xlu1 %4336, %v2843_v57   ;;  %v8765_v5 = vpop.permute.xlu1 %3021  ;;  %v10317_v25 = vld [vmem:[#allocation156_spill] sm:$0xff]  ;;  %v2765_v23 = vmul.f32 %v8176_v2, %v7975_v0  ;;  %v2767_v2 = vmul.f32 %v8214_v41, %v8009_v20 }
 0x3c6   :  { %v3365_v57 = vmul.f32 %v10317_v25, %v10316_v54  ;;  %v3366_v56 = vmul.f32 %v10317_v25, %v10318_v50  ;;  %v10323_v25 = vld [vmem:[#allocation163_spill] sm:$0xff] }
 0x3c7   :  { %4113 = vst [vmem:[%s9379_s5 + $0x270] sm:$0xff] %v3945_v29  ;;  %4114 = vst.msk [vmem:[%s9379_s5 + $0x278] sm:$0xff] %vm1010_vm1, %v3946_v43  ;;  %v2681_v29 = vld [vmem:[%s9378_s4 + $0x250] sm:$0xff]  ;;  %v10324_v50 = vld [vmem:[#allocation23_spill] sm:$0xff]  ;;  %v2851_v41 = vsub.f32 %v2683_v63, %v2767_v2 }
 0x3c8   :  { %v3655_v26 = vpop.permute.xlu0 %3654  ;;  %v2849_v0 = vsub.f32 %v2681_v29, %v2765_v23  ;;  %v10326_v23 = vld [vmem:[#allocation25_spill] sm:$0xff]  ;;  %v2687_v63 = vld [vmem:[%s9378_s4 + $0x280] sm:$0xff] }
 0x3c9   :  { %v3949_v6 = vadd.f32 %v3655_v26, %v3361_v30  ;;  %v3950_v44 = vadd.f32 %v3655_v26, %v3362_v22  ;;  %3799 = vperm.xlu1 %4336, %v2845_v24   ;;  %v3232_v13 = vpop.permute.xlu1 %3231  ;;  %v10320_v22 = vld [vmem:[#allocation237_spill] sm:$0xff] }
 0x3ca   :  { %v8784_v38 = vmul.f32 %v3232_v13, %v10314_v58  ;;  %v8787_v59 = vmul.f32 %v3232_v13, %v10315_v7  ;;  %v3369_v24 = vmul.f32 %v10320_v22, %v10319_v12  ;;  %v10321_v26 = vld [vmem:[#allocation17_spill] sm:$0xff]  ;;  %v10322_v7 = vld [vmem:[#allocation160_spill] sm:$0xff] }
 0x3cb   :  { %4117 = vst [vmem:[%s9379_s5 + $0x290] sm:$0xff] %v3949_v6  ;;  %4118 = vst.msk [vmem:[%s9379_s5 + $0x298] sm:$0xff] %vm1010_vm1, %v3950_v44  ;;  %v3370_v6 = vmul.f32 %v10320_v22, %v10321_v26  ;;  %v10328_v26 = vld [vmem:[#allocation240_spill] sm:$0xff] }
 0x3cc   :  { %v3665_v47 = vpop.permute.xlu0 %3664 }
 0x3cd   :  { %v3953_v43 = vadd.f32 %v3665_v47, %v3365_v57  ;;  %v3954_v15 = vadd.f32 %v3665_v47, %v3366_v56  ;;  %3809 = vperm.xlu1 %4336, %v2847_v46   ;;  %v8805_v30 = vpop.permute.xlu1 %3031  ;;  %v10325_v56 = vld [vmem:[#allocation238_spill] sm:$0xff]  ;;  %v2769_v47 = vmul.f32 %v8254_v36, %v8075_v62  ;;  %v2771_v36 = vmul.f32 %v8294_v1, %v8117_v39 }
 0x3ce   :  { %v3373_v46 = vmul.f32 %v10325_v56, %v10324_v50  ;;  %v3374_v20 = vmul.f32 %v10325_v56, %v10326_v23  ;;  %v10331_v50 = vld [vmem:[#allocation185_spill] sm:$0xff]  ;;  %v10333_v23 = vld [vmem:[#allocation103_spill] sm:$0xff] }
 0x3cf   :  { %4121 = vst [vmem:[%s9379_s5 + $0x2b0] sm:$0xff] %v3953_v43  ;;  %4122 = vst.msk [vmem:[%s9379_s5 + $0x2b8] sm:$0xff] %vm1010_vm1, %v3954_v15  ;;  %v2685_v43 = vld [vmem:[%s9378_s4 + $0x270] sm:$0xff]  ;;  %v2855_v1 = vsub.f32 %v2687_v63, %v2771_v36 }
 0x3d0   :  { %v3675_v31 = vpop.permute.xlu0 %3674  ;;  %v2853_v62 = vsub.f32 %v2685_v43, %v2769_v47  ;;  %v2773_v47 = vmul.f32 %v8332_v4, %v8183_v32  ;;  %v2689_v43 = vld [vmem:[%s9378_s4 + $0x290] sm:$0xff] }
 0x3d1   :  { %v3957_v44 = vadd.f32 %v3675_v31, %v3369_v24  ;;  %v3958_v13 = vadd.f32 %v3675_v31, %v3370_v6  ;;  %3819 = vperm.xlu1 %4336, %v2849_v0   ;;  %v3242_v58 = vpop.permute.xlu1 %3241  ;;  %v10327_v24 = vld [vmem:[#allocation31_spill] sm:$0xff]  ;;  %v10329_v0 = vld [vmem:[#allocation33_spill] sm:$0xff] }
 0x3d2   :  { %v8824_v54 = vmul.f32 %v3242_v58, %v10322_v7  ;;  %v8827_v57 = vmul.f32 %v3242_v58, %v10323_v25  ;;  %v3377_v6 = vmul.f32 %v10328_v26, %v10327_v24  ;;  %v3378_v31 = vmul.f32 %v10328_v26, %v10329_v0  ;;  %v10330_v7 = vld [vmem:[#allocation182_spill] sm:$0xff]  ;;  %v10335_v26 = vld [vmem:[#allocation47_spill] sm:$0xff] }
 0x3d3   :  { %4125 = vst [vmem:[%s9379_s5 + $0x2d0] sm:$0xff] %v3957_v44  ;;  %4126 = vst.msk [vmem:[%s9379_s5 + $0x2d8] sm:$0xff] %vm1010_vm1, %v3958_v13  ;;  %v2857_v32 = vsub.f32 %v2689_v43, %v2773_v47  ;;  %v10343_v43 = vld [vmem:[#allocation63_spill] sm:$0xff] }
 0x3d4   :  { %v3685_v29 = vpop.permute.xlu0 %3684 }
 0x3d5   :  { %v3961_v15 = vadd.f32 %v3685_v29, %v3373_v46  ;;  %v3962_v12 = vadd.f32 %v3685_v29, %v3374_v20  ;;  %3829 = vperm.xlu1 %4336, %v2851_v41   ;;  %v8845_v22 = vpop.permute.xlu1 %3041  ;;  %v10332_v46 = vld [vmem:[#allocation39_spill] sm:$0xff]  ;;  %v10334_v41 = vld [vmem:[#allocation41_spill] sm:$0xff] }
 0x3d6   :  { %v3381_v20 = vmul.f32 %v10333_v23, %v10332_v46  ;;  %v3382_v39 = vmul.f32 %v10333_v23, %v10334_v41  ;;  %v10341_v46 = vld [vmem:[#allocation40_spill] sm:$0xff] }
 0x3d7   :  { %4129 = vst [vmem:[%s9379_s5 + $0x2f0] sm:$0xff] %v3961_v15  ;;  %4130 = vst.msk [vmem:[%s9379_s5 + $0x2f8] sm:$0xff] %vm1010_vm1, %v3962_v12 }
 0x3d8   :  { %v3695_v2 = vpop.permute.xlu0 %3694 }
 0x3d9   :  { %v3965_v44 = vadd.f32 %v3695_v2, %v3377_v6  ;;  %v3966_v13 = vadd.f32 %v3695_v2, %v3378_v31  ;;  %3839 = vperm.xlu1 %4336, %v2853_v62   ;;  %v3252_v58 = vpop.permute.xlu1 %3251  ;;  %v10336_v6 = vld [vmem:[#allocation105_spill] sm:$0xff] }
 0x3da   :  { %v8864_v25 = vmul.f32 %v3252_v58, %v10330_v7  ;;  %v8867_v56 = vmul.f32 %v3252_v58, %v10331_v50  ;;  %v3385_v0 = vmul.f32 %v10336_v6, %v10335_v26  ;;  %v10337_v31 = vld [vmem:[#allocation49_spill] sm:$0xff]  ;;  %v10339_v58 = vld [vmem:[#allocation202_spill] sm:$0xff]  ;;  %v10340_v50 = vld [vmem:[#allocation55_spill] sm:$0xff] }
 0x3db   :  { %4133 = vst [vmem:[%s9379_s5 + $0x310] sm:$0xff] %v3965_v44  ;;  %4134 = vst.msk [vmem:[%s9379_s5 + $0x318] sm:$0xff] %vm1010_vm1, %v3966_v13  ;;  %v3386_v62 = vmul.f32 %v10336_v6, %v10337_v31  ;;  %v10338_v44 = vld [vmem:[#allocation199_spill] sm:$0xff]  ;;  %v3389_v23 = vmul.f32 %v10341_v46, %v10340_v50  ;;  %v10345_v26 = vld [vmem:[#allocation65_spill] sm:$0xff] }
 0x3dc   :  { %v3705_v29 = vpop.permute.xlu0 %3704 }
 0x3dd   :  { %v3969_v15 = vadd.f32 %v3705_v29, %v3381_v20  ;;  %v3970_v12 = vadd.f32 %v3705_v29, %v3382_v39  ;;  %3849 = vperm.xlu1 %4336, %v2855_v1   ;;  %v8885_v24 = vpop.permute.xlu1 %3051  ;;  %v10342_v20 = vld [vmem:[#allocation57_spill] sm:$0xff] }
 0x3de   :  { %v3390_v41 = vmul.f32 %v10341_v46, %v10342_v20  ;;  %v10350_v46 = vld [vmem:[#allocation73_spill] sm:$0xff] }
 0x3df   :  { %4137 = vst [vmem:[%s9379_s5 + $0x330] sm:$0xff] %v3969_v15  ;;  %4138 = vst.msk [vmem:[%s9379_s5 + $0x338] sm:$0xff] %vm1010_vm1, %v3970_v12  ;;  %v10344_v15 = vld [vmem:[#allocation198_spill] sm:$0xff] }
 0x3e0   :  { %v3715_v4 = vpop.permute.xlu0 %3714  ;;  %v3393_v12 = vmul.f32 %v10344_v15, %v10343_v43  ;;  %v3394_v6 = vmul.f32 %v10344_v15, %v10345_v26  ;;  %v10351_v15 = vld [vmem:[#allocation79_spill] sm:$0xff] }
 0x3e1   :  { %v3973_v36 = vadd.f32 %v3715_v4, %v3385_v0  ;;  %v3974_v2 = vadd.f32 %v3715_v4, %v3386_v62  ;;  %3859 = vperm.xlu1 %4336, %v2857_v32   ;;  %v3262_v63 = vpop.permute.xlu1 %3261  ;;  %v10346_v4 = vld [vmem:[#allocation217_spill] sm:$0xff] }
 0x3e2   :  { %v8899_v13 = vmul.f32 %v3262_v63, %v10338_v44  ;;  %v8902_v7 = vmul.f32 %v3262_v63, %v10339_v58  ;;  %v10348_v44 = vld [vmem:[#allocation71_spill] sm:$0xff]  ;;  %v10349_v58 = vld [vmem:[#allocation6_spill] sm:$0xff] }
 0x3e3   :  { %4141 = vst [vmem:[%s9379_s5 + $0x350] sm:$0xff] %v3973_v36  ;;  %4142 = vst.msk [vmem:[%s9379_s5 + $0x358] sm:$0xff] %vm1010_vm1, %v3974_v2  ;;  %v10347_v2 = vld [vmem:[#allocation220_spill] sm:$0xff]  ;;  %v3397_v50 = vmul.f32 %v10349_v58, %v10348_v44  ;;  %v10355_v44 = vld [vmem:[#allocation46_spill] sm:$0xff] }
 0x3e4   :  { %v3725_v39 = vpop.permute.xlu0 %3724 }
 0x3e5   :  { %v3977_v1 = vadd.f32 %v3725_v39, %v3389_v23  ;;  %v3978_v47 = vadd.f32 %v3725_v39, %v3390_v41  ;;  %v8915_v29 = vpop.permute.xlu1 %3061  ;;  %v3398_v23 = vmul.f32 %v10349_v58, %v10350_v46 }
 0x3e7   :  { %4145 = vst [vmem:[%s9379_s5 + $0x370] sm:$0xff] %v3977_v1  ;;  %4146 = vst.msk [vmem:[%s9379_s5 + $0x378] sm:$0xff] %vm1010_vm1, %v3978_v47 }
 0x3e8   :  { %v3735_v0 = vpop.permute.xlu0 %3734 }
 0x3e9   :  { %v3981_v31 = vadd.f32 %v3735_v0, %v3393_v12  ;;  %v3982_v62 = vadd.f32 %v3735_v0, %v3394_v6  ;;  %v3272_v32 = vpop.permute.xlu1 %3271  ;;  %v10352_v12 = vld [vmem:[#allocation2_spill] sm:$0xff]  ;;  %v10353_v6 = vld [vmem:[#allocation81_spill] sm:$0xff] }
 0x3ea   :  { %v8929_v36 = vmul.f32 %v3272_v32, %v10346_v4  ;;  %v8932_v63 = vmul.f32 %v3272_v32, %v10347_v2  ;;  %v3401_v26 = vmul.f32 %v10352_v12, %v10351_v15  ;;  %v3402_v0 = vmul.f32 %v10352_v12, %v10353_v6  ;;  %v10354_v2 = vld [vmem:[#allocation87_spill] sm:$0xff] }
 0x3eb   :  { %4149 = vst [vmem:[%s9379_s5 + $0x390] sm:$0xff] %v3981_v31  ;;  %4150 = vst.msk [vmem:[%s9379_s5 + $0x398] sm:$0xff] %vm1010_vm1, %v3982_v62  ;;  %v3405_v58 = vmul.f32 %v10355_v44, %v10354_v2  ;;  %v10359_v12 = vld [vmem:[#allocation95_spill] sm:$0xff] }
 0x3ec   :  { %v3745_v20 = vpop.permute.xlu0 %3744 }
 0x3ed   :  { %v3985_v41 = vadd.f32 %v3745_v20, %v3397_v50  ;;  %v3986_v39 = vadd.f32 %v3745_v20, %v3398_v23  ;;  %v3570_v1 = vpop.permute.xlu1 %3569  ;;  %v10356_v50 = vld [vmem:[#allocation89_spill] sm:$0xff]  ;;  %v10357_v23 = vld [vmem:[#allocation123_spill] sm:$0xff] }
 0x3ee   :  { %v3915_v47 = vadd.f32 %v3570_v1, %v8609_v48  ;;  %v3916_v43 = vadd.f32 %v3570_v1, %v8612_v35  ;;  %v3406_v46 = vmul.f32 %v10355_v44, %v10356_v50  ;;  %v10358_v20 = vld [vmem:[#allocation125_spill] sm:$0xff] }
 0x3ef   :  { %4153 = vst [vmem:[%s9379_s5 + $0x3b0] sm:$0xff] %v3985_v41  ;;  %4154 = vst.msk [vmem:[%s9379_s5 + $0x3b8] sm:$0xff] %vm1010_vm1, %v3986_v39 }
 0x3f0   :  { %4083 = vst [vmem:[%s9379_s5 + $0x180] sm:$0xff] %v3915_v47  ;;  %4084 = vst.msk [vmem:[%s9379_s5 + $0x188] sm:$0xff] %vm1010_vm1, %v3916_v43  ;;  %v3755_v48 = vpop.permute.xlu0 %3754 }
 0x3f1   :  { %v3989_v35 = vadd.f32 %v3755_v48, %v3401_v26  ;;  %v3990_v31 = vadd.f32 %v3755_v48, %v3402_v0  ;;  %v3580_v62 = vpop.permute.xlu1 %3579  ;;  %v10360_v26 = vld [vmem:[#allocation241_spill] sm:$0xff]  ;;  %v10362_v48 = vld [vmem:[#allocation135_spill] sm:$0xff] }
 0x3f2   :  { %v3919_v32 = vadd.f32 %v3580_v62, %v8642_v8  ;;  %v3920_v4 = vadd.f32 %v3580_v62, %v8645_v52  ;;  %v3335_v8 = vmul.f32 %v8685_v16, %v10357_v23  ;;  %v3336_v52 = vmul.f32 %v8685_v16, %v10358_v20  ;;  %v10361_v0 = vld [vmem:[#allocation97_spill] sm:$0xff]  ;;  %v10365_v23 = vld [vmem:[#allocation147_spill] sm:$0xff] }
 0x3f3   :  { %4157 = vst [vmem:[%s9379_s5 + $0x3d0] sm:$0xff] %v3989_v35  ;;  %4158 = vst.msk [vmem:[%s9379_s5 + $0x3d8] sm:$0xff] %vm1010_vm1, %v3990_v31  ;;  %v3409_v6 = vmul.f32 %v10360_v26, %v10359_v12  ;;  %v3410_v16 = vmul.f32 %v10360_v26, %v10361_v0  ;;  %v3339_v35 = vmul.f32 %v8725_v37, %v10362_v48  ;;  %v10363_v31 = vld [vmem:[#allocation137_spill] sm:$0xff]  ;;  %v10369_v26 = vld [vmem:[#allocation158_spill] sm:$0xff] }
 0x3f4   :  { %4087 = vst [vmem:[%s9379_s5 + $0x1a0] sm:$0xff] %v3919_v32  ;;  %4088 = vst.msk [vmem:[%s9379_s5 + $0x1a8] sm:$0xff] %vm1010_vm1, %v3920_v4  ;;  %v3765_v41 = vpop.permute.xlu0 %3764  ;;  %v3340_v62 = vmul.f32 %v8725_v37, %v10363_v31  ;;  %v10364_v37 = vld [vmem:[#allocation146_spill] sm:$0xff] }
 0x3f5   :  { %v3993_v39 = vadd.f32 %v3765_v41, %v3405_v58  ;;  %v3994_v1 = vadd.f32 %v3765_v41, %v3406_v46  ;;  %v3590_v47 = vpop.permute.xlu1 %3589  ;;  %v3343_v46 = vmul.f32 %v8765_v5, %v10364_v37 }
 0x3f6   :  { %v3923_v43 = vadd.f32 %v3590_v47, %v3335_v8  ;;  %v3924_v15 = vadd.f32 %v3590_v47, %v3336_v52  ;;  %v3344_v8 = vmul.f32 %v8765_v5, %v10365_v23  ;;  %v10366_v52 = vld [vmem:[#allocation16_spill] sm:$0xff]  ;;  %v10368_v5 = vld [vmem:[#allocation157_spill] sm:$0xff] }
 0x3f7   :  { %4161 = vst [vmem:[%s9379_s5 + $0x3f0] sm:$0xff] %v3993_v39  ;;  %4162 = vst.msk [vmem:[%s9379_s5 + $0x3f8] sm:$0xff] %vm1010_vm1, %v3994_v1  ;;  %v10367_v39 = vld [vmem:[#allocation54_spill] sm:$0xff]  ;;  %v3347_v12 = vmul.f32 %v8805_v30, %v10368_v5 }
 0x3f8   :  { %4091 = vst [vmem:[%s9379_s5 + $0x1c0] sm:$0xff] %v3923_v43  ;;  %4092 = vst.msk [vmem:[%s9379_s5 + $0x1c8] sm:$0xff] %vm1010_vm1, %v3924_v15  ;;  %v3775_v32 = vpop.permute.xlu0 %3774 }
 0x3f9   :  { %v3997_v4 = vadd.f32 %v3775_v32, %v3409_v6  ;;  %v3998_v2 = vadd.f32 %v3775_v32, %v3410_v16  ;;  %v3600_v44 = vpop.permute.xlu1 %3599  ;;  %v3348_v6 = vmul.f32 %v8805_v30, %v10369_v26  ;;  %v10370_v16 = vld [vmem:[#allocation56_spill] sm:$0xff]  ;;  %v10371_v30 = vld [vmem:[#allocation179_spill] sm:$0xff] }
 0x3fa   :  { %v3927_v58 = vadd.f32 %v3600_v44, %v3339_v35  ;;  %v3928_v50 = vadd.f32 %v3600_v44, %v3340_v62 }
 0x3fb   :  { %4165 = vst [vmem:[%s9379_s5 + $0x410] sm:$0xff] %v3997_v4  ;;  %4166 = vst.msk [vmem:[%s9379_s5 + $0x418] sm:$0xff] %vm1010_vm1, %v3998_v2  ;;  %v3351_v4 = vmul.f32 %v8845_v22, %v10371_v30  ;;  %v10372_v2 = vld [vmem:[#allocation180_spill] sm:$0xff] }
 0x3fc   :  { %4095 = vst [vmem:[%s9379_s5 + $0x1e0] sm:$0xff] %v3927_v58  ;;  %4096 = vst.msk [vmem:[%s9379_s5 + $0x1e8] sm:$0xff] %vm1010_vm1, %v3928_v50  ;;  %v3785_v20 = vpop.permute.xlu0 %3784  ;;  %v3352_v44 = vmul.f32 %v8845_v22, %v10372_v2  ;;  %v10373_v22 = vld [vmem:[#allocation194_spill] sm:$0xff]  ;;  %v10380_v2 = vld [vmem:[#allocation11_spill] sm:$0xff] }
 0x3fd   :  { %v4001_v41 = vadd.f32 %v3785_v20, %v10366_v52  ;;  %v4002_v1 = vadd.f32 %v3785_v20, %v10367_v39  ;;  %v3610_v47 = vpop.permute.xlu1 %3609  ;;  %v10374_v20 = vld [vmem:[#allocation195_spill] sm:$0xff] }
 0x3fe   :  { %v3931_v43 = vadd.f32 %v3610_v47, %v3343_v46  ;;  %v3932_v15 = vadd.f32 %v3610_v47, %v3344_v8  ;;  %v3355_v8 = vmul.f32 %v8885_v24, %v10373_v22 }
 0x3ff   :  { %4169 = vst [vmem:[%s9379_s5 + $0x430] sm:$0xff] %v4001_v41  ;;  %4170 = vst.msk [vmem:[%s9379_s5 + $0x438] sm:$0xff] %vm1010_vm1, %v4002_v1 }
 0x400   :  { %4099 = vst [vmem:[%s9379_s5 + $0x200] sm:$0xff] %v3931_v43  ;;  %4100 = vst.msk [vmem:[%s9379_s5 + $0x208] sm:$0xff] %vm1010_vm1, %v3932_v15  ;;  %v3795_v0 = vpop.permute.xlu0 %3794  ;;  %v10376_v15 = vld [vmem:[#allocation213_spill] sm:$0xff] }
 0x401   :  { %v4005_v48 = vadd.f32 %v3795_v0, %v10370_v16  ;;  %v4006_v35 = vadd.f32 %v3795_v0, %v8370_v45  ;;  %v3620_v31 = vpop.permute.xlu1 %3619  ;;  %v10378_v16 = vld [vmem:[#allocation174_spill] sm:$0xff] }
 0x402   :  { %v3935_v62 = vadd.f32 %v3620_v31, %v3347_v12  ;;  %v3936_v32 = vadd.f32 %v3620_v31, %v3348_v6 }
 0x403   :  { %4173 = vst [vmem:[%s9379_s5 + $0x450] sm:$0xff] %v4005_v48  ;;  %4174 = vst.msk [vmem:[%s9379_s5 + $0x458] sm:$0xff] %vm1010_vm1, %v4006_v35  ;;  %v10379_v35 = vld [vmem:[#allocation5_spill] sm:$0xff] }
 0x404   :  { %4103 = vst [vmem:[%s9379_s5 + $0x220] sm:$0xff] %v3935_v62  ;;  %4104 = vst.msk [vmem:[%s9379_s5 + $0x228] sm:$0xff] %vm1010_vm1, %v3936_v32  ;;  %v3805_v45 = vpop.permute.xlu0 %3804 }
 0x405   :  { %v4009_v58 = vadd.f32 %v3805_v45, %v8407_v3  ;;  %v4010_v50 = vadd.f32 %v3805_v45, %v8410_v11  ;;  %v3630_v37 = vpop.permute.xlu1 %3629  ;;  %v3356_v3 = vmul.f32 %v8885_v24, %v10374_v20  ;;  %v10375_v24 = vld [vmem:[#allocation212_spill] sm:$0xff] }
 0x406   :  { %v3939_v46 = vadd.f32 %v3630_v37, %v3351_v4  ;;  %v3940_v23 = vadd.f32 %v3630_v37, %v3352_v44  ;;  %v3359_v43 = vmul.f32 %v8915_v29, %v10375_v24  ;;  %v10381_v44 = vld [vmem:[#allocation38_spill] sm:$0xff]  ;;  %v10384_v20 = vld [vmem:[#allocation216_spill] sm:$0xff]  ;;  %v10386_v24 = vld [vmem:[#allocation27_spill] sm:$0xff] }
 0x407   :  { %4177 = vst [vmem:[%s9379_s5 + $0x470] sm:$0xff] %v4009_v58  ;;  %4178 = vst.msk [vmem:[%s9379_s5 + $0x478] sm:$0xff] %vm1010_vm1, %v4010_v50  ;;  %v3367_v45 = vmul.f32 %v10381_v44, %v10380_v2  ;;  %v10382_v58 = vld [vmem:[#allocation13_spill] sm:$0xff] }
 0x408   :  { %4107 = vst [vmem:[%s9379_s5 + $0x240] sm:$0xff] %v3939_v46  ;;  %4108 = vst.msk [vmem:[%s9379_s5 + $0x248] sm:$0xff] %vm1010_vm1, %v3940_v23  ;;  %v3815_v11 = vpop.permute.xlu0 %3814 }
 0x409   :  { %v4013_v52 = vadd.f32 %v3815_v11, %v8439_v61  ;;  %v4014_v41 = vadd.f32 %v3815_v11, %v8442_v19  ;;  %v3640_v39 = vpop.permute.xlu1 %3639  ;;  %v3360_v61 = vmul.f32 %v8915_v29, %v10376_v15  ;;  %v10377_v29 = vld [vmem:[#allocation3_spill] sm:$0xff]  ;;  %v10385_v11 = vld [vmem:[#allocation21_spill] sm:$0xff] }
 0x40a   :  { %v3943_v1 = vadd.f32 %v3640_v39, %v3355_v8  ;;  %v3944_v47 = vadd.f32 %v3640_v39, %v3356_v3  ;;  %v3363_v48 = vmul.f32 %v10378_v16, %v10377_v29  ;;  %v10383_v8 = vld [vmem:[#allocation19_spill] sm:$0xff]  ;;  %v10390_v29 = vld [vmem:[#allocation4_spill] sm:$0xff] }
 0x40b   :  { %4181 = vst [vmem:[%s9379_s5 + $0x490] sm:$0xff] %v4013_v52  ;;  %4182 = vst.msk [vmem:[%s9379_s5 + $0x498] sm:$0xff] %vm1010_vm1, %v4014_v41  ;;  %v3371_v3 = vmul.f32 %v10384_v20, %v10383_v8 }
 0x40c   :  { %4111 = vst [vmem:[%s9379_s5 + $0x260] sm:$0xff] %v3943_v1  ;;  %4112 = vst.msk [vmem:[%s9379_s5 + $0x268] sm:$0xff] %vm1010_vm1, %v3944_v47  ;;  %v3825_v19 = vpop.permute.xlu0 %3824 }
 0x40d   :  { %v4017_v5 = vadd.f32 %v3825_v19, %v8474_v40  ;;  %v4018_v12 = vadd.f32 %v3825_v19, %v8477_v60  ;;  %v3650_v26 = vpop.permute.xlu1 %3649  ;;  %v3364_v40 = vmul.f32 %v10378_v16, %v10379_v35 }
 0x40e   :  { %v3947_v6 = vadd.f32 %v3650_v26, %v3359_v43  ;;  %v3948_v0 = vadd.f32 %v3650_v26, %v3360_v61  ;;  %v10387_v43 = vld [vmem:[#allocation9_spill] sm:$0xff] }
 0x40f   :  { %4185 = vst [vmem:[%s9379_s5 + $0x4b0] sm:$0xff] %v4017_v5  ;;  %4186 = vst.msk [vmem:[%s9379_s5 + $0x4b8] sm:$0xff] %vm1010_vm1, %v4018_v12  ;;  %v3375_v15 = vmul.f32 %v10387_v43, %v10386_v24  ;;  %v10388_v61 = vld [vmem:[#allocation29_spill] sm:$0xff] }
 0x410   :  { %4115 = vst [vmem:[%s9379_s5 + $0x280] sm:$0xff] %v3947_v6  ;;  %4116 = vst.msk [vmem:[%s9379_s5 + $0x288] sm:$0xff] %vm1010_vm1, %v3948_v0  ;;  %v3835_v60 = vpop.permute.xlu0 %3834  ;;  %v10389_v0 = vld [vmem:[#allocation35_spill] sm:$0xff] }
 0x411   :  { %v4021_v31 = vadd.f32 %v3835_v60, %v8513_v18  ;;  %v4022_v62 = vadd.f32 %v3835_v60, %v8516_v49  ;;  %v3660_v32 = vpop.permute.xlu1 %3659  ;;  %v3368_v18 = vmul.f32 %v10381_v44, %v10382_v58  ;;  %v3379_v16 = vmul.f32 %v10390_v29, %v10389_v0  ;;  %v10392_v60 = vld [vmem:[#allocation43_spill] sm:$0xff]  ;;  %v10396_v58 = vld [vmem:[#allocation14_spill] sm:$0xff]  ;;  %v10407_v0 = vld [vmem:[#allocation196_spill] sm:$0xff] }
 0x412   :  { %v3951_v30 = vadd.f32 %v3660_v32, %v3363_v48  ;;  %v3952_v4 = vadd.f32 %v3660_v32, %v3364_v40  ;;  %v10391_v48 = vld [vmem:[#allocation37_spill] sm:$0xff] }
 0x413   :  { %4189 = vst [vmem:[%s9379_s5 + $0x4d0] sm:$0xff] %v4021_v31  ;;  %4190 = vst.msk [vmem:[%s9379_s5 + $0x4d8] sm:$0xff] %vm1010_vm1, %v4022_v62  ;;  %v10393_v31 = vld [vmem:[#allocation48_spill] sm:$0xff]  ;;  %v10394_v32 = vld [vmem:[#allocation45_spill] sm:$0xff] }
 0x414   :  { %4119 = vst [vmem:[%s9379_s5 + $0x2a0] sm:$0xff] %v3951_v30  ;;  %4120 = vst.msk [vmem:[%s9379_s5 + $0x2a8] sm:$0xff] %vm1010_vm1, %v3952_v4  ;;  %v3845_v49 = vpop.permute.xlu0 %3844  ;;  %v3383_v62 = vmul.f32 %v10393_v31, %v10392_v60  ;;  %v3384_v30 = vmul.f32 %v10393_v31, %v10394_v32  ;;  %v10410_v60 = vld [vmem:[#allocation190_spill] sm:$0xff] }
 0x415   :  { %v4025_v50 = vadd.f32 %v3845_v49, %v8543_v33  ;;  %v4026_v37 = vadd.f32 %v3845_v49, %v8546_v9  ;;  %v3670_v46 = vpop.permute.xlu1 %3669  ;;  %v3372_v33 = vmul.f32 %v10384_v20, %v10385_v11  ;;  %v10397_v49 = vld [vmem:[#allocation53_spill] sm:$0xff] }
 0x416   :  { %v3955_v23 = vadd.f32 %v3670_v46, %v3367_v45  ;;  %v3956_v22 = vadd.f32 %v3670_v46, %v3368_v18  ;;  %v10395_v45 = vld [vmem:[#allocation51_spill] sm:$0xff]  ;;  %v10399_v20 = vld [vmem:[#allocation61_spill] sm:$0xff] }
 0x417   :  { %4193 = vst [vmem:[%s9379_s5 + $0x4f0] sm:$0xff] %v4025_v50  ;;  %4194 = vst.msk [vmem:[%s9379_s5 + $0x4f8] sm:$0xff] %vm1010_vm1, %v4026_v37  ;;  %v3387_v18 = vmul.f32 %v10396_v58, %v10395_v45  ;;  %v3388_v50 = vmul.f32 %v10396_v58, %v10397_v49  ;;  %v10412_v45 = vld [vmem:[#allocation208_spill] sm:$0xff] }
 0x418   :  { %4123 = vst [vmem:[%s9379_s5 + $0x2c0] sm:$0xff] %v3955_v23  ;;  %4124 = vst.msk [vmem:[%s9379_s5 + $0x2c8] sm:$0xff] %vm1010_vm1, %v3956_v22  ;;  %v3855_v9 = vpop.permute.xlu0 %3854  ;;  %v10398_v22 = vld [vmem:[#allocation59_spill] sm:$0xff] }
 0x419   :  { %v4029_v52 = vadd.f32 %v3855_v9, %v8574_v34  ;;  %v4030_v41 = vadd.f32 %v3855_v9, %v8577_v21  ;;  %v3680_v39 = vpop.permute.xlu1 %3679  ;;  %v3376_v34 = vmul.f32 %v10387_v43, %v10388_v61  ;;  %v3391_v8 = vmul.f32 %v8372_v14, %v10398_v22  ;;  %v10404_v61 = vld [vmem:[#allocation12_spill] sm:$0xff] }
 0x41a   :  { %v3959_v1 = vadd.f32 %v3680_v39, %v3371_v3  ;;  %v3960_v47 = vadd.f32 %v3680_v39, %v3372_v33  ;;  %v3392_v3 = vmul.f32 %v8372_v14, %v10399_v20 }
 0x41b   :  { %4197 = vst [vmem:[%s9379_s5 + $0x510] sm:$0xff] %v4029_v52  ;;  %4198 = vst.msk [vmem:[%s9379_s5 + $0x518] sm:$0xff] %vm1010_vm1, %v4030_v41  ;;  %v10400_v52 = vld [vmem:[#allocation67_spill] sm:$0xff]  ;;  %v10401_v41 = vld [vmem:[#allocation10_spill] sm:$0xff] }
 0x41c   :  { %4127 = vst [vmem:[%s9379_s5 + $0x2e0] sm:$0xff] %v3959_v1  ;;  %4128 = vst.msk [vmem:[%s9379_s5 + $0x2e8] sm:$0xff] %vm1010_vm1, %v3960_v47  ;;  %v3865_v21 = vpop.permute.xlu0 %3864  ;;  %v3395_v39 = vmul.f32 %v10401_v41, %v10400_v52  ;;  %v10402_v1 = vld [vmem:[#allocation69_spill] sm:$0xff] }
 0x41d   :  { %v4033_v19 = vadd.f32 %v3865_v21, %v8603_v10  ;;  %v4034_v5 = vadd.f32 %v3865_v21, %v8606_v42  ;;  %v3690_v12 = vpop.permute.xlu1 %3689  ;;  %v3380_v10 = vmul.f32 %v10390_v29, %v10391_v48  ;;  %v3396_v47 = vmul.f32 %v10401_v41, %v10402_v1  ;;  %v10405_v21 = vld [vmem:[#allocation77_spill] sm:$0xff] }
 0x41e   :  { %v3963_v26 = vadd.f32 %v3690_v12, %v3375_v15  ;;  %v3964_v6 = vadd.f32 %v3690_v12, %v3376_v34  ;;  %v10403_v15 = vld [vmem:[#allocation75_spill] sm:$0xff] }
 0x41f   :  { %4201 = vst [vmem:[%s9379_s5 + $0x530] sm:$0xff] %v4033_v19  ;;  %4202 = vst.msk [vmem:[%s9379_s5 + $0x538] sm:$0xff] %vm1010_vm1, %v4034_v5  ;;  %v3399_v34 = vmul.f32 %v10404_v61, %v10403_v15  ;;  %v3400_v19 = vmul.f32 %v10404_v61, %v10405_v21 }
 0x420   :  { %4131 = vst [vmem:[%s9379_s5 + $0x300] sm:$0xff] %v3963_v26  ;;  %4132 = vst.msk [vmem:[%s9379_s5 + $0x308] sm:$0xff] %vm1010_vm1, %v3964_v6  ;;  %v10406_v6 = vld [vmem:[#allocation83_spill] sm:$0xff] }
 0x421   :  { %v3700_v42 = vpop.permute.xlu1 %3699  ;;  %v3403_v29 = vmul.f32 %v10407_v0, %v10406_v6 }
 0x422   :  { %v3967_v35 = vadd.f32 %v3700_v42, %v3379_v16  ;;  %v3968_v40 = vadd.f32 %v3700_v42, %v3380_v10  ;;  %v10408_v16 = vld [vmem:[#allocation85_spill] sm:$0xff] }
 0x423   :  { %v3404_v48 = vmul.f32 %v10407_v0, %v10408_v16 }
 0x424   :  { %4135 = vst [vmem:[%s9379_s5 + $0x320] sm:$0xff] %v3967_v35  ;;  %4136 = vst.msk [vmem:[%s9379_s5 + $0x328] sm:$0xff] %vm1010_vm1, %v3968_v40  ;;  %v10409_v40 = vld [vmem:[#allocation91_spill] sm:$0xff] }
 0x425   :  { %v3710_v4 = vpop.permute.xlu1 %3709  ;;  %v3407_v31 = vmul.f32 %v10410_v60, %v10409_v40 }
 0x426   :  { %v3971_v2 = vadd.f32 %v3710_v4, %v3383_v62  ;;  %v3972_v44 = vadd.f32 %v3710_v4, %v3384_v30  ;;  %v10411_v62 = vld [vmem:[#allocation93_spill] sm:$0xff] }
 0x427   :  { %v3408_v32 = vmul.f32 %v10410_v60, %v10411_v62 }
 0x428   :  { %4139 = vst [vmem:[%s9379_s5 + $0x340] sm:$0xff] %v3971_v2  ;;  %4140 = vst.msk [vmem:[%s9379_s5 + $0x348] sm:$0xff] %vm1010_vm1, %v3972_v44 }
 0x429   :  { %v3720_v37 = vpop.permute.xlu1 %3719 }
 0x42a   :  { %v3975_v46 = vadd.f32 %v3720_v37, %v3387_v18  ;;  %v3976_v23 = vadd.f32 %v3720_v37, %v3388_v50  ;;  %v10413_v18 = vld [vmem:[#allocation62_spill] sm:$0xff] }
 0x42c   :  { %4143 = vst [vmem:[%s9379_s5 + $0x360] sm:$0xff] %v3975_v46  ;;  %4144 = vst.msk [vmem:[%s9379_s5 + $0x368] sm:$0xff] %vm1010_vm1, %v3976_v23 }
 0x42d   :  { %v3730_v11 = vpop.permute.xlu1 %3729 }
 0x42e   :  { %v3979_v33 = vadd.f32 %v3730_v11, %v3391_v8  ;;  %v3980_v9 = vadd.f32 %v3730_v11, %v3392_v3 }
 0x430   :  { %4147 = vst [vmem:[%s9379_s5 + $0x380] sm:$0xff] %v3979_v33  ;;  %4148 = vst.msk [vmem:[%s9379_s5 + $0x388] sm:$0xff] %vm1010_vm1, %v3980_v9 }
 0x431   :  { %v3740_v14 = vpop.permute.xlu1 %3739 }
 0x432   :  { %v3983_v24 = vadd.f32 %v3740_v14, %v3395_v39  ;;  %v3984_v43 = vadd.f32 %v3740_v14, %v3396_v47 }
 0x434   :  { %4151 = vst [vmem:[%s9379_s5 + $0x3a0] sm:$0xff] %v3983_v24  ;;  %4152 = vst.msk [vmem:[%s9379_s5 + $0x3a8] sm:$0xff] %vm1010_vm1, %v3984_v43 }
 0x435   :  { %v3750_v5 = vpop.permute.xlu1 %3749 }
 0x436   :  { %v3987_v12 = vadd.f32 %v3750_v5, %v3399_v34  ;;  %v3988_v26 = vadd.f32 %v3750_v5, %v3400_v19 }
 0x438   :  { %4155 = vst [vmem:[%s9379_s5 + $0x3c0] sm:$0xff] %v3987_v12  ;;  %4156 = vst.msk [vmem:[%s9379_s5 + $0x3c8] sm:$0xff] %vm1010_vm1, %v3988_v26 }
 0x439   :  { %v3760_v10 = vpop.permute.xlu1 %3759 }
 0x43a   :  { %v3991_v42 = vadd.f32 %v3760_v10, %v3403_v29  ;;  %v3992_v35 = vadd.f32 %v3760_v10, %v3404_v48 }
 0x43c   :  { %4159 = vst [vmem:[%s9379_s5 + $0x3e0] sm:$0xff] %v3991_v42  ;;  %4160 = vst.msk [vmem:[%s9379_s5 + $0x3e8] sm:$0xff] %vm1010_vm1, %v3992_v35 }
 0x43d   :  { %v3770_v30 = vpop.permute.xlu1 %3769 }
 0x43e   :  { %v3995_v4 = vadd.f32 %v3770_v30, %v3407_v31  ;;  %v3996_v2 = vadd.f32 %v3770_v30, %v3408_v32 }
 0x440   :  { %4163 = vst [vmem:[%s9379_s5 + $0x400] sm:$0xff] %v3995_v4  ;;  %4164 = vst.msk [vmem:[%s9379_s5 + $0x408] sm:$0xff] %vm1010_vm1, %v3996_v2 }
 0x441   :  { %v3780_v44 = vpop.permute.xlu1 %3779 }
 0x442   :  { %v3999_v58 = vadd.f32 %v3780_v44, %v10412_v45  ;;  %v4000_v49 = vadd.f32 %v3780_v44, %v10413_v18 }
 0x444   :  { %4167 = vst [vmem:[%s9379_s5 + $0x420] sm:$0xff] %v3999_v58  ;;  %4168 = vst.msk [vmem:[%s9379_s5 + $0x428] sm:$0xff] %vm1010_vm1, %v4000_v49 }
 0x445   :  { %v3790_v50 = vpop.permute.xlu1 %3789 }
 0x446   :  { %v4003_v37 = vadd.f32 %v3790_v50, %v8664_v53  ;;  %v4004_v46 = vadd.f32 %v3790_v50, %v8667_v27 }
 0x448   :  { %4171 = vst [vmem:[%s9379_s5 + $0x440] sm:$0xff] %v4003_v37  ;;  %4172 = vst.msk [vmem:[%s9379_s5 + $0x448] sm:$0xff] %vm1010_vm1, %v4004_v46 }
 0x449   :  { %v3800_v23 = vpop.permute.xlu1 %3799 }
 0x44a   :  { %v4007_v22 = vadd.f32 %v3800_v23, %v8704_v51  ;;  %v4008_v8 = vadd.f32 %v3800_v23, %v8707_v55 }
 0x44c   :  { %4175 = vst [vmem:[%s9379_s5 + $0x460] sm:$0xff] %v4007_v22  ;;  %4176 = vst.msk [vmem:[%s9379_s5 + $0x468] sm:$0xff] %vm1010_vm1, %v4008_v8 }
 0x44d   :  { %v3810_v27 = vpop.permute.xlu1 %3809 }
 0x44e   :  { %v4011_v53 = vadd.f32 %v3810_v27, %v8744_v17  ;;  %v4012_v20 = vadd.f32 %v3810_v27, %v8747_v28 }
 0x450   :  { %4179 = vst [vmem:[%s9379_s5 + $0x480] sm:$0xff] %v4011_v53  ;;  %4180 = vst.msk [vmem:[%s9379_s5 + $0x488] sm:$0xff] %vm1010_vm1, %v4012_v20 }
 0x451   :  { %v3820_v51 = vpop.permute.xlu1 %3819 }
 0x452   :  { %v4015_v55 = vadd.f32 %v3820_v51, %v8784_v38  ;;  %v4016_v3 = vadd.f32 %v3820_v51, %v8787_v59 }
 0x454   :  { %4183 = vst [vmem:[%s9379_s5 + $0x4a0] sm:$0xff] %v4015_v55  ;;  %4184 = vst.msk [vmem:[%s9379_s5 + $0x4a8] sm:$0xff] %vm1010_vm1, %v4016_v3 }
 0x455   :  { %v3830_v17 = vpop.permute.xlu1 %3829 }
 0x456   :  { %v4019_v28 = vadd.f32 %v3830_v17, %v8824_v54  ;;  %v4020_v11 = vadd.f32 %v3830_v17, %v8827_v57 }
 0x458   :  { %4187 = vst [vmem:[%s9379_s5 + $0x4c0] sm:$0xff] %v4019_v28  ;;  %4188 = vst.msk [vmem:[%s9379_s5 + $0x4c8] sm:$0xff] %vm1010_vm1, %v4020_v11 }
 0x459   :  { %v3840_v38 = vpop.permute.xlu1 %3839 }
 0x45a   :  { %v4023_v59 = vadd.f32 %v3840_v38, %v8864_v25  ;;  %v4024_v33 = vadd.f32 %v3840_v38, %v8867_v56 }
 0x45c   :  { %4191 = vst [vmem:[%s9379_s5 + $0x4e0] sm:$0xff] %v4023_v59  ;;  %4192 = vst.msk [vmem:[%s9379_s5 + $0x4e8] sm:$0xff] %vm1010_vm1, %v4024_v33 }
 0x45d   :  { %v3850_v54 = vpop.permute.xlu1 %3849 }
 0x45e   :  { %v4027_v57 = vadd.f32 %v3850_v54, %v8899_v13  ;;  %v4028_v9 = vadd.f32 %v3850_v54, %v8902_v7 }
 0x460   :  { %4195 = vst [vmem:[%s9379_s5 + $0x500] sm:$0xff] %v4027_v57  ;;  %4196 = vst.msk [vmem:[%s9379_s5 + $0x508] sm:$0xff] %vm1010_vm1, %v4028_v9 }
 0x461   :  { %v3860_v25 = vpop.permute.xlu1 %3859 }
 0x462   :  { %v4031_v56 = vadd.f32 %v3860_v25, %v8929_v36  ;;  %v4032_v52 = vadd.f32 %v3860_v25, %v8932_v63 }
 0x464   :  { %4199 = vst [vmem:[%s9379_s5 + $0x520] sm:$0xff] %v4031_v56  ;;  %4200 = vst.msk [vmem:[%s9379_s5 + $0x528] sm:$0xff] %vm1010_vm1, %v4032_v52 }

</bundles_post_ra>
